<compile_context>
chip_gen: v5e
topology: v5e:2x2
jax: 0.10.0
libtpu: 0.0.40
codegen_flags: <defaults>
</compile_context>

<pallas_src>
import math
import jax
import jax.numpy as jnp
from jax.experimental import pallas as pl
from jax.experimental.pallas import tpu as pltpu  # noqa: F401  (TPU backend)

# ---------------- model config (tiny, synthetic) ----------------
VOCAB = 256
D_MODEL = 32
N_HEADS = 4
D_HEAD = D_MODEL // N_HEADS
D_FF = 64
NUM_BUCKETS = 8
MAX_DISTANCE = 16
PAD_ID = 0
LN_EPS = 1e-6


# ============================ in-kernel helpers ============================

def _rms(x, w):
    """T5 LayerNorm (RMSNorm, no mean subtraction, no bias). x: (M, D), w: (1, D)."""
    var = jnp.mean(x * x, axis=-1, keepdims=True)
    return x * jax.lax.rsqrt(var + LN_EPS) * w


def _softmax(s):
    m = jnp.max(s, axis=-1, keepdims=True)
    p = jnp.exp(s - m)
    return p / jnp.sum(p, axis=-1, keepdims=True)


def _attention(resid, q_all, k_all, v_all, bias, mask, wo, B, Tq, Tk):
    """Multi-head attention over the whole batch.

    resid : (B*Tq, D)  residual stream (returned with attention added)
    q_all : (B*Tq, D)  per-head Q concatenated along lanes
    k_all, v_all : (B*Tk, D)
    bias  : (H, Tq, Tk) relative-position bias or None
    mask  : additive mask broadcastable to (B, Tq, Tk)
    wo    : (D, D) output projection
    T5 attention: no 1/sqrt(d) scaling.
    """
    out = resid
    for hd in range(N_HEADS):
        lo = hd * D_HEAD
        q = q_all[:, lo:lo + D_HEAD].reshape(B, Tq, D_HEAD)
        k = k_all[:, lo:lo + D_HEAD].reshape(B, Tk, D_HEAD)
        v = v_all[:, lo:lo + D_HEAD].reshape(B, Tk, D_HEAD)
        # batched contraction over the head dim -- no explicit k.T materialized
        s = jnp.einsum('bqd,bkd->bqk', q, k, preferred_element_type=jnp.float32)
        if bias is not None:
            s = s + bias[hd][None]
        s = s + mask
        p = _softmax(s)
        ctx = jnp.einsum('bqk,bkd->bqd', p, v,
                         preferred_element_type=jnp.float32)       # (B, Tq, dh)
        # concat over heads @ wo  ==  sum_h ctx_h @ wo[h*dh:(h+1)*dh, :]
        out = out + jnp.dot(ctx.reshape(B * Tq, D_HEAD), wo[lo:lo + D_HEAD, :],
                            preferred_element_type=jnp.float32)
    return out


# ============================ the fused kernel ============================

def _t5_kernel(enc_x_ref, dec_x_ref, enc_mask_ref, dec_mask_ref,
               enc_pos_ref, dec_pos_ref, labels_ref,
               e_ln1, e_wqkv, e_wo, e_ln2, e_wi, e_woff, e_lnf,
               d_ln1, d_wqkv, d_wo, d_lnc, d_cq, d_ckv, d_co,
               d_ln2, d_wi, d_woff, d_lnf, lm_w,
               logits_ref, loss_ref):
    """Entire T5 forward (1 enc layer + 1 dec layer) + LM head + CE loss."""
    B, S, D = enc_x_ref.shape
    T = dec_x_ref.shape[1]
    V = lm_w.shape[1]

    enc_mask = enc_mask_ref[...]                               # (B, 1, S)

    # ======================= encoder =======================
    x = enc_x_ref[...].reshape(B * S, D)
    # -- self-attention block (pre-LN, relative position bias) --
    h = _rms(x, e_ln1[...])
    qkv = jnp.dot(h, e_wqkv[...], preferred_element_type=jnp.float32)   # (BS, 3D)
    x = _attention(x, qkv[:, :D], qkv[:, D:2 * D], qkv[:, 2 * D:],
                   enc_pos_ref[...], enc_mask, e_wo[...], B, S, S)
    # -- FFN block --
    h = _rms(x, e_ln2[...])
    h = jnp.maximum(jnp.dot(h, e_wi[...], preferred_element_type=jnp.float32), 0.0)
    x = x + jnp.dot(h, e_woff[...], preferred_element_type=jnp.float32)
    # -- final encoder rmsnorm (kept in VMEM; never touches HBM) --
    enc_h = _rms(x, e_lnf[...])                                # (B*S, D)

    # ======================= decoder =======================
    x = dec_x_ref[...].reshape(B * T, D)
    # -- causal self-attention block --
    h = _rms(x, d_ln1[...])
    qkv = jnp.dot(h, d_wqkv[...], preferred_element_type=jnp.float32)   # (BT, 3D)
    x = _attention(x, qkv[:, :D], qkv[:, D:2 * D], qkv[:, 2 * D:],
                   dec_pos_ref[...], dec_mask_ref[...], d_wo[...], B, T, T)
    # -- cross-attention block (no position bias, per T5) --
    h = _rms(x, d_lnc[...])
    q_all = jnp.dot(h, d_cq[...], preferred_element_type=jnp.float32)   # (BT, D)
    kv = jnp.dot(enc_h, d_ckv[...], preferred_element_type=jnp.float32)  # (BS, 2D)
    x = _attention(x, q_all, kv[:, :D], kv[:, D:],
                   None, enc_mask, d_co[...], B, T, S)
    # -- FFN block --
    h = _rms(x, d_ln2[...])
    h = jnp.maximum(jnp.dot(h, d_wi[...], preferred_element_type=jnp.float32), 0.0)
    x = x + jnp.dot(h, d_woff[...], preferred_element_type=jnp.float32)

    # ============ final LN + tied LM head (d_model**-0.5 folded in) ============
    h = _rms(x, d_lnf[...])
    logits = jnp.dot(h, lm_w[...],
                     preferred_element_type=jnp.float32).reshape(B, T, V)
    logits_ref[...] = logits                                   # lane-dense (V=256)

    # ============ fused CE loss (ignore_index=-100), per-example mean ============
    labels = labels_ref[...]                                   # (B, T, 1) int32
    m = jnp.max(logits, axis=-1, keepdims=True)
    lse = jnp.log(jnp.sum(jnp.exp(logits - m), axis=-1, keepdims=True)) + m
    iota = jax.lax.broadcasted_iota(jnp.int32, logits.shape, 2)
    picked = jnp.sum(jnp.where(iota == labels, logits, 0.0),
                     axis=-1, keepdims=True)                   # (B, T, 1)
    valid = labels != -100
    nll = jnp.where(valid, lse - picked, 0.0)                  # (B, T, 1)
    length = jnp.sum(valid.astype(jnp.float32), axis=1)        # (B, 1)
    loss_ref[...] = jnp.sum(nll, axis=1) / jnp.maximum(length, 1.0)   # guard /0


# ============================ JAX glue (T5) ============================

def _relative_position_bucket(relative_position, bidirectional, num_buckets,
                              max_distance):
    relative_buckets = jnp.zeros_like(relative_position)
    if bidirectional:
        num_buckets = num_buckets // 2
        relative_buckets = relative_buckets + (
            (relative_position > 0).astype(jnp.int32) * num_buckets)
        relative_position = jnp.abs(relative_position)
    else:
        relative_position = -jnp.minimum(relative_position, 0)
    max_exact = num_buckets // 2
    is_small = relative_position < max_exact
    rp_safe = jnp.maximum(relative_position, 1).astype(jnp.float32)
    relative_position_if_large = max_exact + (
        jnp.log(rp_safe / max_exact)
        / math.log(max_distance / max_exact)
        * (num_buckets - max_exact)).astype(jnp.int32)
    relative_position_if_large = jnp.minimum(
        relative_position_if_large, num_buckets - 1)
    relative_buckets = relative_buckets + jnp.where(
        is_small, relative_position, relative_position_if_large)
    return relative_buckets


def compute_position_bias(qlen, klen, rel_emb, bidirectional):
    """rel_emb: (NUM_BUCKETS, H) -> (H, qlen, klen). Shared across the batch."""
    ctx = jnp.arange(qlen, dtype=jnp.int32)[:, None]
    mem = jnp.arange(klen, dtype=jnp.int32)[None, :]
    rel = mem - ctx
    buckets = _relative_position_bucket(rel, bidirectional, NUM_BUCKETS,
                                        MAX_DISTANCE)
    values = rel_emb[buckets]                       # (q, k, H)
    return jnp.transpose(values, (2, 0, 1))         # (H, q, k)


def t5_apply(params, input_ids, attention_mask, decoder_input_ids,
             decoder_attention_mask, lm_labels):
    """Single fused-kernel T5 forward. Returns (logits (B,T,V), per-ex loss (B,))."""
    B, S = input_ids.shape
    T = decoder_input_ids.shape[1]
    V = params["lm_head_w"].shape[1]
    emb = params["emb"]

    # embedding lookups (gathers) and tiny mask/bias constants stay in XLA
    enc_x = emb[input_ids]                                            # (B,S,D)
    dec_x = emb[decoder_input_ids]                                    # (B,T,D)

    enc_mask_ext = ((1.0 - attention_mask.astype(jnp.float32))
                    * -1e9)[:, None, :]                               # (B,1,S)
    dec_mask = decoder_attention_mask.astype(jnp.float32)
    causal = jnp.tril(jnp.ones((T, T), jnp.float32))
    dec_mask_ext = (1.0 - dec_mask[:, None, :] * causal[None, :, :]) * -1e9

    enc_pos = compute_position_bias(S, S, params["enc_rel_bias"], True)   # (H,S,S)
    dec_pos = compute_position_bias(T, T, params["dec_rel_bias"], False)  # (H,T,T)

    labels3 = lm_labels.astype(jnp.int32).reshape(B, T, 1)

    e = params["enc0"]
    d = params["dec0"]
    logits, loss = pl.pallas_call(
        _t5_kernel,
        out_shape=(jax.ShapeDtypeStruct((B, T, V), jnp.float32),
                   jax.ShapeDtypeStruct((B, 1), jnp.float32)),
    )(enc_x, dec_x, enc_mask_ext, dec_mask_ext, enc_pos, dec_pos, labels3,
      e["ln1_w"], e["wqkv"], e["wo"], e["ln2_w"], e["wi"], e["wo_ff"],
      params["enc_final_ln"],
      d["ln1_w"], d["wqkv"], d["wo"], d["lnc_w"], d["cq"], d["ckv"], d["co"],
      d["ln2_w"], d["wi"], d["wo_ff"], params["dec_final_ln"],
      params["lm_head_w"])
    return logits, loss[:, 0]


def t5_forward(params, input_ids, attention_mask, decoder_input_ids,
               decoder_attention_mask):
    """forward() equivalent: returns LM logits (B, T_dec, VOCAB)."""
    dummy_labels = jnp.full(decoder_input_ids.shape, -100, jnp.int32)
    logits, _ = t5_apply(params, input_ids, attention_mask, decoder_input_ids,
                         decoder_attention_mask, dummy_labels)
    return logits


def shift_right(labels, pad_id=PAD_ID, decoder_start_token_id=PAD_ID):
    B = labels.shape[0]
    start = jnp.full((B, 1), decoder_start_token_id, dtype=labels.dtype)
    shifted = jnp.concatenate([start, labels[:, :-1]], axis=1)
    return jnp.where(shifted == -100, pad_id, shifted)


def get_loss_for_examplars(params, input_ids, input_attn_mask, target_ids,
                           target_attn_mask):
    """UnifiedQG.get_loss_for_examplars: per-example token-averaged CE loss."""
    lm_labels = jnp.where(target_ids == PAD_ID, -100, target_ids)
    decoder_input_ids = shift_right(lm_labels)
    _, loss = t5_apply(params, input_ids, input_attn_mask, decoder_input_ids,
                       target_attn_mask, lm_labels)
    return loss


# ============================ param init ============================
# TODO(synk): pretrained T5 weight loading / T5Tokenizer have no Pallas
# equivalent; deterministic synthetic weights stand in for them.

def init_params(key):
    def nrm(k, shape, scale=0.02):
        return jax.random.normal(k, shape, jnp.float32) * scale

    keys = iter(jax.random.split(key, 64))

    def fused(n):   # concat n independent (D,D) projections along N -> (D, n*D)
        return jnp.concatenate(
            [nrm(next(keys), (D_MODEL, D_MODEL)) for _ in range(n)], axis=1)

    ones_row = jnp.ones((1, D_MODEL), jnp.float32)   # LN weights kept as (1,D)

    enc0 = {
        "ln1_w": ones_row,
        "wqkv": fused(3),                            # wq|wk|wv
        "wo": nrm(next(keys), (D_MODEL, D_MODEL)),
        "ln2_w": ones_row,
        "wi": nrm(next(keys), (D_MODEL, D_FF)),
        "wo_ff": nrm(next(keys), (D_FF, D_MODEL)),
    }
    dec0 = {
        "ln1_w": ones_row,
        "wqkv": fused(3),
        "wo": nrm(next(keys), (D_MODEL, D_MODEL)),
        "lnc_w": ones_row,
        "cq": nrm(next(keys), (D_MODEL, D_MODEL)),
        "ckv": fused(2),                             # ck|cv
        "co": nrm(next(keys), (D_MODEL, D_MODEL)),
        "ln2_w": ones_row,
        "wi": nrm(next(keys), (D_MODEL, D_FF)),
        "wo_ff": nrm(next(keys), (D_FF, D_MODEL)),
    }
    emb = nrm(next(keys), (VOCAB, D_MODEL), scale=1.0)
    params = {
        "emb": emb,
        "lm_head_w": emb.T * (D_MODEL ** -0.5),      # tied head, scale folded
        "enc0": enc0,
        "dec0": dec0,
        "enc_rel_bias": nrm(next(keys), (NUM_BUCKETS, N_HEADS)),
        "dec_rel_bias": nrm(next(keys), (NUM_BUCKETS, N_HEADS)),
        "enc_final_ln": ones_row,
        "dec_final_ln": ones_row,
    }
    return params


# ============================ main ============================

if __name__ == "__main__":
    B, S_ENC, S_DEC = 2, 8, 8
    key = jax.random.PRNGKey(0)
    k_params, k_in, k_tgt = jax.random.split(key, 3)

    params = init_params(k_params)

    input_ids = jax.random.randint(k_in, (B, S_ENC), 1, VOCAB, jnp.int32)
    input_attn_mask = jnp.ones((B, S_ENC), jnp.int32)

    target_ids = jax.random.randint(k_tgt, (B, S_DEC), 1, VOCAB, jnp.int32)
    # pad the tail of example 1 to exercise the ignore_index=-100 masking
    target_ids = target_ids.at[1, -2:].set(PAD_ID)
    target_attn_mask = (target_ids != PAD_ID).astype(jnp.int32)

    t5_forward_jit = jax.jit(t5_forward)
    get_loss_jit = jax.jit(get_loss_for_examplars)

    # forward() equivalent: produce LM logits
    lm_labels = jnp.where(target_ids == PAD_ID, -100, target_ids)
    logits = t5_forward_jit(params, input_ids, input_attn_mask,
                            shift_right(lm_labels), target_attn_mask)
    logits = jax.block_until_ready(logits)

    # get_loss_for_examplars() equivalent: per-example masked-mean CE loss
    loss = get_loss_jit(params, input_ids, input_attn_mask,
                        target_ids, target_attn_mask)
    loss = jax.block_until_ready(loss)

    assert logits.shape == (B, S_DEC, VOCAB)
    assert loss.shape == (B,)
    assert bool(jnp.all(jnp.isfinite(logits)))
    assert bool(jnp.all(jnp.isfinite(loss)))

    # get_loss() equivalent glue (note: mean of per-example means; HF's default
    # reduction is a single masked mean over all valid tokens) and ewc_loss:
    mean_loss = jnp.sum(loss) / loss.shape[0]
    ewc = mean_loss + 0.1 * jnp.float32(0.5)   # ewc_loss(loss, ewc_loss, importance)
    jax.block_until_ready(ewc)

    print("KERNEL_OK")
</pallas_src>

<mosaic_0001>
module attributes {stable_mosaic.version = 11 : i64} {
  func.func @_t5_kernel(%arg0: memref<2x8x32xf32, #tpu.memory_space<vmem>>, %arg1: memref<2x8x32xf32, #tpu.memory_space<vmem>>, %arg2: memref<2x1x8xf32, #tpu.memory_space<vmem>>, %arg3: memref<2x8x8xf32, #tpu.memory_space<vmem>>, %arg4: memref<4x8x8xf32, #tpu.memory_space<vmem>>, %arg5: memref<4x8x8xf32, #tpu.memory_space<vmem>>, %arg6: memref<2x8x1xi32, #tpu.memory_space<vmem>>, %arg7: memref<1x32xf32, #tpu.memory_space<vmem>>, %arg8: memref<32x96xf32, #tpu.memory_space<vmem>>, %arg9: memref<32x32xf32, #tpu.memory_space<vmem>>, %arg10: memref<1x32xf32, #tpu.memory_space<vmem>>, %arg11: memref<32x64xf32, #tpu.memory_space<vmem>>, %arg12: memref<64x32xf32, #tpu.memory_space<vmem>>, %arg13: memref<1x32xf32, #tpu.memory_space<vmem>>, %arg14: memref<1x32xf32, #tpu.memory_space<vmem>>, %arg15: memref<32x96xf32, #tpu.memory_space<vmem>>, %arg16: memref<32x32xf32, #tpu.memory_space<vmem>>, %arg17: memref<1x32xf32, #tpu.memory_space<vmem>>, %arg18: memref<32x32xf32, #tpu.memory_space<vmem>>, %arg19: memref<32x64xf32, #tpu.memory_space<vmem>>, %arg20: memref<32x32xf32, #tpu.memory_space<vmem>>, %arg21: memref<1x32xf32, #tpu.memory_space<vmem>>, %arg22: memref<32x64xf32, #tpu.memory_space<vmem>>, %arg23: memref<64x32xf32, #tpu.memory_space<vmem>>, %arg24: memref<1x32xf32, #tpu.memory_space<vmem>>, %arg25: memref<32x256xf32, #tpu.memory_space<vmem>>, %arg26: memref<2x8x256xf32, #tpu.memory_space<vmem>>, %arg27: memref<2x1xf32, #tpu.memory_space<vmem>>) attributes {dimension_semantics = [], scalar_prefetch = 0 : i64, scratch_operands = 0 : i64, tpu.core_type = #tpu.core_type<tc>} {
    %c0 = arith.constant 0 : index
    %c0_0 = arith.constant 0 : index
    %c0_1 = arith.constant 0 : index
    %0 = vector.load %arg2[%c0, %c0_0, %c0_1] : memref<2x1x8xf32, #tpu.memory_space<vmem>>, vector<2x1x8xf32>
    %c0_2 = arith.constant 0 : index
    %c0_3 = arith.constant 0 : index
    %c0_4 = arith.constant 0 : index
    %1 = vector.load %arg0[%c0_2, %c0_3, %c0_4] : memref<2x8x32xf32, #tpu.memory_space<vmem>>, vector<2x8x32xf32>
    %2 = vector.shape_cast %1 : vector<2x8x32xf32> to vector<16x32xf32>
    %c0_5 = arith.constant 0 : index
    %c0_6 = arith.constant 0 : index
    %3 = vector.load %arg7[%c0_5, %c0_6] : memref<1x32xf32, #tpu.memory_space<vmem>>, vector<1x32xf32>
    %4 = arith.mulf %2, %2 : vector<16x32xf32>
    %cst = arith.constant dense<0.000000e+00> : vector<16xf32>
    %5 = vector.multi_reduction <add>, %4, %cst [1] : vector<16x32xf32> to vector<16xf32>
    %6 = vector.shape_cast %5 : vector<16xf32> to vector<16x1xf32>
    %cst_7 = arith.constant 3.200000e+01 : f32
    %7 = vector.broadcast %cst_7 : f32 to vector<16x1xf32>
    %8 = arith.divf %6, %7 : vector<16x1xf32>
    %cst_8 = arith.constant 9.99999997E-7 : f32
    %9 = vector.broadcast %cst_8 : f32 to vector<16x1xf32>
    %10 = arith.addf %8, %9 : vector<16x1xf32>
    %11 = math.rsqrt %10 : vector<16x1xf32>
    %12 = vector.broadcast %11 : vector<16x1xf32> to vector<16x32xf32>
    %13 = arith.mulf %2, %12 : vector<16x32xf32>
    %14 = vector.broadcast %3 : vector<1x32xf32> to vector<16x32xf32>
    %15 = arith.mulf %13, %14 : vector<16x32xf32>
    %c0_9 = arith.constant 0 : index
    %c0_10 = arith.constant 0 : index
    %16 = vector.load %arg8[%c0_9, %c0_10] : memref<32x96xf32, #tpu.memory_space<vmem>>, vector<32x96xf32>
    %cst_11 = arith.constant dense<0.000000e+00> : vector<16x96xf32>
    %17 = tpu.matmul %15, %16, %cst_11 {dimension_numbers = #tpu.dot_dimension_numbers<[1], [0], [0], [1], [0, 0, 1, 1], [], []>} : vector<16x32xf32>, vector<32x96xf32>, vector<16x96xf32> -> vector<16x96xf32>
    %18 = vector.extract_strided_slice %17 {offsets = [0, 0], sizes = [16, 32], strides = [1, 1]} : vector<16x96xf32> to vector<16x32xf32>
    %19 = vector.extract_strided_slice %17 {offsets = [0, 32], sizes = [16, 32], strides = [1, 1]} : vector<16x96xf32> to vector<16x32xf32>
    %20 = vector.extract_strided_slice %17 {offsets = [0, 64], sizes = [16, 32], strides = [1, 1]} : vector<16x96xf32> to vector<16x32xf32>
    %c0_12 = arith.constant 0 : index
    %c0_13 = arith.constant 0 : index
    %c0_14 = arith.constant 0 : index
    %21 = vector.load %arg4[%c0_12, %c0_13, %c0_14] : memref<4x8x8xf32, #tpu.memory_space<vmem>>, vector<4x8x8xf32>
    %c0_15 = arith.constant 0 : index
    %c0_16 = arith.constant 0 : index
    %22 = vector.load %arg9[%c0_15, %c0_16] : memref<32x32xf32, #tpu.memory_space<vmem>>, vector<32x32xf32>
    %23 = vector.extract_strided_slice %18 {offsets = [0, 0], sizes = [16, 8], strides = [1, 1]} : vector<16x32xf32> to vector<16x8xf32>
    %24 = vector.shape_cast %23 : vector<16x8xf32> to vector<2x8x8xf32>
    %25 = vector.extract_strided_slice %19 {offsets = [0, 0], sizes = [16, 8], strides = [1, 1]} : vector<16x32xf32> to vector<16x8xf32>
    %26 = vector.shape_cast %25 : vector<16x8xf32> to vector<2x8x8xf32>
    %27 = vector.extract_strided_slice %20 {offsets = [0, 0], sizes = [16, 8], strides = [1, 1]} : vector<16x32xf32> to vector<16x8xf32>
    %28 = vector.shape_cast %27 : vector<16x8xf32> to vector<2x8x8xf32>
    "tpu.trace_start"() <{level = 10 : i32, message = "bqd,bkd->bqk"}> : () -> ()
    %cst_17 = arith.constant dense<0.000000e+00> : vector<2x8x8xf32>
    %29 = tpu.matmul %24, %26, %cst_17 {dimension_numbers = #tpu.dot_dimension_numbers<[2], [2], [1], [1], [0, 0, 0, 1, 1, 1], [0], [0]>} : vector<2x8x8xf32>, vector<2x8x8xf32>, vector<2x8x8xf32> -> vector<2x8x8xf32>
    "tpu.trace_stop"() : () -> ()
    %30 = vector.extract_strided_slice %21 {offsets = [0, 0, 0], sizes = [1, 8, 8], strides = [1, 1, 1]} : vector<4x8x8xf32> to vector<1x8x8xf32>
    %31 = vector.shape_cast %30 : vector<1x8x8xf32> to vector<8x8xf32>
    %32 = vector.shape_cast %31 : vector<8x8xf32> to vector<1x8x8xf32>
    %33 = vector.broadcast %32 : vector<1x8x8xf32> to vector<2x8x8xf32>
    %34 = arith.addf %29, %33 : vector<2x8x8xf32>
    %35 = vector.broadcast %0 : vector<2x1x8xf32> to vector<2x8x8xf32>
    %36 = arith.addf %34, %35 : vector<2x8x8xf32>
    %cst_18 = arith.constant dense<0xFF800000> : vector<2x8xf32>
    %37 = vector.multi_reduction <maximumf>, %36, %cst_18 [2] : vector<2x8x8xf32> to vector<2x8xf32>
    %38 = vector.shape_cast %37 : vector<2x8xf32> to vector<2x8x1xf32>
    %39 = vector.broadcast %38 : vector<2x8x1xf32> to vector<2x8x8xf32>
    %40 = arith.subf %36, %39 : vector<2x8x8xf32>
    %41 = math.exp %40 : vector<2x8x8xf32>
    %cst_19 = arith.constant dense<0.000000e+00> : vector<2x8xf32>
    %42 = vector.multi_reduction <add>, %41, %cst_19 [2] : vector<2x8x8xf32> to vector<2x8xf32>
    %43 = vector.shape_cast %42 : vector<2x8xf32> to vector<2x8x1xf32>
    %44 = vector.broadcast %43 : vector<2x8x1xf32> to vector<2x8x8xf32>
    %45 = arith.divf %41, %44 : vector<2x8x8xf32>
    "tpu.trace_start"() <{level = 10 : i32, message = "bqk,bkd->bqd"}> : () -> ()
    %cst_20 = arith.constant dense<0.000000e+00> : vector<2x8x8xf32>
    %46 = tpu.matmul %45, %28, %cst_20 {dimension_numbers = #tpu.dot_dimension_numbers<[2], [1], [1], [2], [0, 0, 0, 1, 1, 2], [0], [0]>} : vector<2x8x8xf32>, vector<2x8x8xf32>, vector<2x8x8xf32> -> vector<2x8x8xf32>
    "tpu.trace_stop"() : () -> ()
    %47 = vector.shape_cast %46 : vector<2x8x8xf32> to vector<16x8xf32>
    %48 = vector.extract_strided_slice %22 {offsets = [0, 0], sizes = [8, 32], strides = [1, 1]} : vector<32x32xf32> to vector<8x32xf32>
    %cst_21 = arith.constant dense<0.000000e+00> : vector<16x32xf32>
    %49 = tpu.matmul %47, %48, %cst_21 {dimension_numbers = #tpu.dot_dimension_numbers<[1], [0], [0], [1], [0, 0, 1, 1], [], []>} : vector<16x8xf32>, vector<8x32xf32>, vector<16x32xf32> -> vector<16x32xf32>
    %50 = arith.addf %2, %49 : vector<16x32xf32>
    %51 = vector.extract_strided_slice %18 {offsets = [0, 8], sizes = [16, 8], strides = [1, 1]} : vector<16x32xf32> to vector<16x8xf32>
    %52 = vector.shape_cast %51 : vector<16x8xf32> to vector<2x8x8xf32>
    %53 = vector.extract_strided_slice %19 {offsets = [0, 8], sizes = [16, 8], strides = [1, 1]} : vector<16x32xf32> to vector<16x8xf32>
    %54 = vector.shape_cast %53 : vector<16x8xf32> to vector<2x8x8xf32>
    %55 = vector.extract_strided_slice %20 {offsets = [0, 8], sizes = [16, 8], strides = [1, 1]} : vector<16x32xf32> to vector<16x8xf32>
    %56 = vector.shape_cast %55 : vector<16x8xf32> to vector<2x8x8xf32>
    "tpu.trace_start"() <{level = 10 : i32, message = "bqd,bkd->bqk"}> : () -> ()
    %cst_22 = arith.constant dense<0.000000e+00> : vector<2x8x8xf32>
    %57 = tpu.matmul %52, %54, %cst_22 {dimension_numbers = #tpu.dot_dimension_numbers<[2], [2], [1], [1], [0, 0, 0, 1, 1, 1], [0], [0]>} : vector<2x8x8xf32>, vector<2x8x8xf32>, vector<2x8x8xf32> -> vector<2x8x8xf32>
    "tpu.trace_stop"() : () -> ()
    %58 = vector.extract_strided_slice %21 {offsets = [1, 0, 0], sizes = [1, 8, 8], strides = [1, 1, 1]} : vector<4x8x8xf32> to vector<1x8x8xf32>
    %59 = vector.shape_cast %58 : vector<1x8x8xf32> to vector<8x8xf32>
    %60 = vector.shape_cast %59 : vector<8x8xf32> to vector<1x8x8xf32>
    %61 = vector.broadcast %60 : vector<1x8x8xf32> to vector<2x8x8xf32>
    %62 = arith.addf %57, %61 : vector<2x8x8xf32>
    %63 = vector.broadcast %0 : vector<2x1x8xf32> to vector<2x8x8xf32>
    %64 = arith.addf %62, %63 : vector<2x8x8xf32>
    %cst_23 = arith.constant dense<0xFF800000> : vector<2x8xf32>
    %65 = vector.multi_reduction <maximumf>, %64, %cst_23 [2] : vector<2x8x8xf32> to vector<2x8xf32>
    %66 = vector.shape_cast %65 : vector<2x8xf32> to vector<2x8x1xf32>
    %67 = vector.broadcast %66 : vector<2x8x1xf32> to vector<2x8x8xf32>
    %68 = arith.subf %64, %67 : vector<2x8x8xf32>
    %69 = math.exp %68 : vector<2x8x8xf32>
    %cst_24 = arith.constant dense<0.000000e+00> : vector<2x8xf32>
    %70 = vector.multi_reduction <add>, %69, %cst_24 [2] : vector<2x8x8xf32> to vector<2x8xf32>
    %71 = vector.shape_cast %70 : vector<2x8xf32> to vector<2x8x1xf32>
    %72 = vector.broadcast %71 : vector<2x8x1xf32> to vector<2x8x8xf32>
    %73 = arith.divf %69, %72 : vector<2x8x8xf32>
    "tpu.trace_start"() <{level = 10 : i32, message = "bqk,bkd->bqd"}> : () -> ()
    %cst_25 = arith.constant dense<0.000000e+00> : vector<2x8x8xf32>
    %74 = tpu.matmul %73, %56, %cst_25 {dimension_numbers = #tpu.dot_dimension_numbers<[2], [1], [1], [2], [0, 0, 0, 1, 1, 2], [0], [0]>} : vector<2x8x8xf32>, vector<2x8x8xf32>, vector<2x8x8xf32> -> vector<2x8x8xf32>
    "tpu.trace_stop"() : () -> ()
    %75 = vector.shape_cast %74 : vector<2x8x8xf32> to vector<16x8xf32>
    %76 = vector.extract_strided_slice %22 {offsets = [8, 0], sizes = [8, 32], strides = [1, 1]} : vector<32x32xf32> to vector<8x32xf32>
    %cst_26 = arith.constant dense<0.000000e+00> : vector<16x32xf32>
    %77 = tpu.matmul %75, %76, %cst_26 {dimension_numbers = #tpu.dot_dimension_numbers<[1], [0], [0], [1], [0, 0, 1, 1], [], []>} : vector<16x8xf32>, vector<8x32xf32>, vector<16x32xf32> -> vector<16x32xf32>
    %78 = arith.addf %50, %77 : vector<16x32xf32>
    %79 = vector.extract_strided_slice %18 {offsets = [0, 16], sizes = [16, 8], strides = [1, 1]} : vector<16x32xf32> to vector<16x8xf32>
    %80 = vector.shape_cast %79 : vector<16x8xf32> to vector<2x8x8xf32>
    %81 = vector.extract_strided_slice %19 {offsets = [0, 16], sizes = [16, 8], strides = [1, 1]} : vector<16x32xf32> to vector<16x8xf32>
    %82 = vector.shape_cast %81 : vector<16x8xf32> to vector<2x8x8xf32>
    %83 = vector.extract_strided_slice %20 {offsets = [0, 16], sizes = [16, 8], strides = [1, 1]} : vector<16x32xf32> to vector<16x8xf32>
    %84 = vector.shape_cast %83 : vector<16x8xf32> to vector<2x8x8xf32>
    "tpu.trace_start"() <{level = 10 : i32, message = "bqd,bkd->bqk"}> : () -> ()
    %cst_27 = arith.constant dense<0.000000e+00> : vector<2x8x8xf32>
    %85 = tpu.matmul %80, %82, %cst_27 {dimension_numbers = #tpu.dot_dimension_numbers<[2], [2], [1], [1], [0, 0, 0, 1, 1, 1], [0], [0]>} : vector<2x8x8xf32>, vector<2x8x8xf32>, vector<2x8x8xf32> -> vector<2x8x8xf32>
    "tpu.trace_stop"() : () -> ()
    %86 = vector.extract_strided_slice %21 {offsets = [2, 0, 0], sizes = [1, 8, 8], strides = [1, 1, 1]} : vector<4x8x8xf32> to vector<1x8x8xf32>
    %87 = vector.shape_cast %86 : vector<1x8x8xf32> to vector<8x8xf32>
    %88 = vector.shape_cast %87 : vector<8x8xf32> to vector<1x8x8xf32>
    %89 = vector.broadcast %88 : vector<1x8x8xf32> to vector<2x8x8xf32>
    %90 = arith.addf %85, %89 : vector<2x8x8xf32>
    %91 = vector.broadcast %0 : vector<2x1x8xf32> to vector<2x8x8xf32>
    %92 = arith.addf %90, %91 : vector<2x8x8xf32>
    %cst_28 = arith.constant dense<0xFF800000> : vector<2x8xf32>
    %93 = vector.multi_reduction <maximumf>, %92, %cst_28 [2] : vector<2x8x8xf32> to vector<2x8xf32>
    %94 = vector.shape_cast %93 : vector<2x8xf32> to vector<2x8x1xf32>
    %95 = vector.broadcast %94 : vector<2x8x1xf32> to vector<2x8x8xf32>
    %96 = arith.subf %92, %95 : vector<2x8x8xf32>
    %97 = math.exp %96 : vector<2x8x8xf32>
    %cst_29 = arith.constant dense<0.000000e+00> : vector<2x8xf32>
    %98 = vector.multi_reduction <add>, %97, %cst_29 [2] : vector<2x8x8xf32> to vector<2x8xf32>
    %99 = vector.shape_cast %98 : vector<2x8xf32> to vector<2x8x1xf32>
    %100 = vector.broadcast %99 : vector<2x8x1xf32> to vector<2x8x8xf32>
    %101 = arith.divf %97, %100 : vector<2x8x8xf32>
    "tpu.trace_start"() <{level = 10 : i32, message = "bqk,bkd->bqd"}> : () -> ()
    %cst_30 = arith.constant dense<0.000000e+00> : vector<2x8x8xf32>
    %102 = tpu.matmul %101, %84, %cst_30 {dimension_numbers = #tpu.dot_dimension_numbers<[2], [1], [1], [2], [0, 0, 0, 1, 1, 2], [0], [0]>} : vector<2x8x8xf32>, vector<2x8x8xf32>, vector<2x8x8xf32> -> vector<2x8x8xf32>
    "tpu.trace_stop"() : () -> ()
    %103 = vector.shape_cast %102 : vector<2x8x8xf32> to vector<16x8xf32>
    %104 = vector.extract_strided_slice %22 {offsets = [16, 0], sizes = [8, 32], strides = [1, 1]} : vector<32x32xf32> to vector<8x32xf32>
    %cst_31 = arith.constant dense<0.000000e+00> : vector<16x32xf32>
    %105 = tpu.matmul %103, %104, %cst_31 {dimension_numbers = #tpu.dot_dimension_numbers<[1], [0], [0], [1], [0, 0, 1, 1], [], []>} : vector<16x8xf32>, vector<8x32xf32>, vector<16x32xf32> -> vector<16x32xf32>
    %106 = arith.addf %78, %105 : vector<16x32xf32>
    %107 = vector.extract_strided_slice %18 {offsets = [0, 24], sizes = [16, 8], strides = [1, 1]} : vector<16x32xf32> to vector<16x8xf32>
    %108 = vector.shape_cast %107 : vector<16x8xf32> to vector<2x8x8xf32>
    %109 = vector.extract_strided_slice %19 {offsets = [0, 24], sizes = [16, 8], strides = [1, 1]} : vector<16x32xf32> to vector<16x8xf32>
    %110 = vector.shape_cast %109 : vector<16x8xf32> to vector<2x8x8xf32>
    %111 = vector.extract_strided_slice %20 {offsets = [0, 24], sizes = [16, 8], strides = [1, 1]} : vector<16x32xf32> to vector<16x8xf32>
    %112 = vector.shape_cast %111 : vector<16x8xf32> to vector<2x8x8xf32>
    "tpu.trace_start"() <{level = 10 : i32, message = "bqd,bkd->bqk"}> : () -> ()
    %cst_32 = arith.constant dense<0.000000e+00> : vector<2x8x8xf32>
    %113 = tpu.matmul %108, %110, %cst_32 {dimension_numbers = #tpu.dot_dimension_numbers<[2], [2], [1], [1], [0, 0, 0, 1, 1, 1], [0], [0]>} : vector<2x8x8xf32>, vector<2x8x8xf32>, vector<2x8x8xf32> -> vector<2x8x8xf32>
    "tpu.trace_stop"() : () -> ()
    %114 = vector.extract_strided_slice %21 {offsets = [3, 0, 0], sizes = [1, 8, 8], strides = [1, 1, 1]} : vector<4x8x8xf32> to vector<1x8x8xf32>
    %115 = vector.shape_cast %114 : vector<1x8x8xf32> to vector<8x8xf32>
    %116 = vector.shape_cast %115 : vector<8x8xf32> to vector<1x8x8xf32>
    %117 = vector.broadcast %116 : vector<1x8x8xf32> to vector<2x8x8xf32>
    %118 = arith.addf %113, %117 : vector<2x8x8xf32>
    %119 = vector.broadcast %0 : vector<2x1x8xf32> to vector<2x8x8xf32>
    %120 = arith.addf %118, %119 : vector<2x8x8xf32>
    %cst_33 = arith.constant dense<0xFF800000> : vector<2x8xf32>
    %121 = vector.multi_reduction <maximumf>, %120, %cst_33 [2] : vector<2x8x8xf32> to vector<2x8xf32>
    %122 = vector.shape_cast %121 : vector<2x8xf32> to vector<2x8x1xf32>
    %123 = vector.broadcast %122 : vector<2x8x1xf32> to vector<2x8x8xf32>
    %124 = arith.subf %120, %123 : vector<2x8x8xf32>
    %125 = math.exp %124 : vector<2x8x8xf32>
    %cst_34 = arith.constant dense<0.000000e+00> : vector<2x8xf32>
    %126 = vector.multi_reduction <add>, %125, %cst_34 [2] : vector<2x8x8xf32> to vector<2x8xf32>
    %127 = vector.shape_cast %126 : vector<2x8xf32> to vector<2x8x1xf32>
    %128 = vector.broadcast %127 : vector<2x8x1xf32> to vector<2x8x8xf32>
    %129 = arith.divf %125, %128 : vector<2x8x8xf32>
    "tpu.trace_start"() <{level = 10 : i32, message = "bqk,bkd->bqd"}> : () -> ()
    %cst_35 = arith.constant dense<0.000000e+00> : vector<2x8x8xf32>
    %130 = tpu.matmul %129, %112, %cst_35 {dimension_numbers = #tpu.dot_dimension_numbers<[2], [1], [1], [2], [0, 0, 0, 1, 1, 2], [0], [0]>} : vector<2x8x8xf32>, vector<2x8x8xf32>, vector<2x8x8xf32> -> vector<2x8x8xf32>
    "tpu.trace_stop"() : () -> ()
    %131 = vector.shape_cast %130 : vector<2x8x8xf32> to vector<16x8xf32>
    %132 = vector.extract_strided_slice %22 {offsets = [24, 0], sizes = [8, 32], strides = [1, 1]} : vector<32x32xf32> to vector<8x32xf32>
    %cst_36 = arith.constant dense<0.000000e+00> : vector<16x32xf32>
    %133 = tpu.matmul %131, %132, %cst_36 {dimension_numbers = #tpu.dot_dimension_numbers<[1], [0], [0], [1], [0, 0, 1, 1], [], []>} : vector<16x8xf32>, vector<8x32xf32>, vector<16x32xf32> -> vector<16x32xf32>
    %134 = arith.addf %106, %133 : vector<16x32xf32>
    %c0_37 = arith.constant 0 : index
    %c0_38 = arith.constant 0 : index
    %135 = vector.load %arg10[%c0_37, %c0_38] : memref<1x32xf32, #tpu.memory_space<vmem>>, vector<1x32xf32>
    %136 = arith.mulf %134, %134 : vector<16x32xf32>
    %cst_39 = arith.constant dense<0.000000e+00> : vector<16xf32>
    %137 = vector.multi_reduction <add>, %136, %cst_39 [1] : vector<16x32xf32> to vector<16xf32>
    %138 = vector.shape_cast %137 : vector<16xf32> to vector<16x1xf32>
    %cst_40 = arith.constant 3.200000e+01 : f32
    %139 = vector.broadcast %cst_40 : f32 to vector<16x1xf32>
    %140 = arith.divf %138, %139 : vector<16x1xf32>
    %cst_41 = arith.constant 9.99999997E-7 : f32
    %141 = vector.broadcast %cst_41 : f32 to vector<16x1xf32>
    %142 = arith.addf %140, %141 : vector<16x1xf32>
    %143 = math.rsqrt %142 : vector<16x1xf32>
    %144 = vector.broadcast %143 : vector<16x1xf32> to vector<16x32xf32>
    %145 = arith.mulf %134, %144 : vector<16x32xf32>
    %146 = vector.broadcast %135 : vector<1x32xf32> to vector<16x32xf32>
    %147 = arith.mulf %145, %146 : vector<16x32xf32>
    %c0_42 = arith.constant 0 : index
    %c0_43 = arith.constant 0 : index
    %148 = vector.load %arg11[%c0_42, %c0_43] : memref<32x64xf32, #tpu.memory_space<vmem>>, vector<32x64xf32>
    %cst_44 = arith.constant dense<0.000000e+00> : vector<16x64xf32>
    %149 = tpu.matmul %147, %148, %cst_44 {dimension_numbers = #tpu.dot_dimension_numbers<[1], [0], [0], [1], [0, 0, 1, 1], [], []>} : vector<16x32xf32>, vector<32x64xf32>, vector<16x64xf32> -> vector<16x64xf32>
    %cst_45 = arith.constant 0.000000e+00 : f32
    %150 = vector.broadcast %cst_45 : f32 to vector<16x64xf32>
    %151 = arith.maximumf %149, %150 : vector<16x64xf32>
    %c0_46 = arith.constant 0 : index
    %c0_47 = arith.constant 0 : index
    %152 = vector.load %arg12[%c0_46, %c0_47] : memref<64x32xf32, #tpu.memory_space<vmem>>, vector<64x32xf32>
    %cst_48 = arith.constant dense<0.000000e+00> : vector<16x32xf32>
    %153 = tpu.matmul %151, %152, %cst_48 {dimension_numbers = #tpu.dot_dimension_numbers<[1], [0], [0], [1], [0, 0, 1, 1], [], []>} : vector<16x64xf32>, vector<64x32xf32>, vector<16x32xf32> -> vector<16x32xf32>
    %154 = arith.addf %134, %153 : vector<16x32xf32>
    %c0_49 = arith.constant 0 : index
    %c0_50 = arith.constant 0 : index
    %155 = vector.load %arg13[%c0_49, %c0_50] : memref<1x32xf32, #tpu.memory_space<vmem>>, vector<1x32xf32>
    %156 = arith.mulf %154, %154 : vector<16x32xf32>
    %cst_51 = arith.constant dense<0.000000e+00> : vector<16xf32>
    %157 = vector.multi_reduction <add>, %156, %cst_51 [1] : vector<16x32xf32> to vector<16xf32>
    %158 = vector.shape_cast %157 : vector<16xf32> to vector<16x1xf32>
    %cst_52 = arith.constant 3.200000e+01 : f32
    %159 = vector.broadcast %cst_52 : f32 to vector<16x1xf32>
    %160 = arith.divf %158, %159 : vector<16x1xf32>
    %cst_53 = arith.constant 9.99999997E-7 : f32
    %161 = vector.broadcast %cst_53 : f32 to vector<16x1xf32>
    %162 = arith.addf %160, %161 : vector<16x1xf32>
    %163 = math.rsqrt %162 : vector<16x1xf32>
    %164 = vector.broadcast %163 : vector<16x1xf32> to vector<16x32xf32>
    %165 = arith.mulf %154, %164 : vector<16x32xf32>
    %166 = vector.broadcast %155 : vector<1x32xf32> to vector<16x32xf32>
    %167 = arith.mulf %165, %166 : vector<16x32xf32>
    %c0_54 = arith.constant 0 : index
    %c0_55 = arith.constant 0 : index
    %c0_56 = arith.constant 0 : index
    %168 = vector.load %arg1[%c0_54, %c0_55, %c0_56] : memref<2x8x32xf32, #tpu.memory_space<vmem>>, vector<2x8x32xf32>
    %169 = vector.shape_cast %168 : vector<2x8x32xf32> to vector<16x32xf32>
    %c0_57 = arith.constant 0 : index
    %c0_58 = arith.constant 0 : index
    %170 = vector.load %arg14[%c0_57, %c0_58] : memref<1x32xf32, #tpu.memory_space<vmem>>, vector<1x32xf32>
    %171 = arith.mulf %169, %169 : vector<16x32xf32>
    %cst_59 = arith.constant dense<0.000000e+00> : vector<16xf32>
    %172 = vector.multi_reduction <add>, %171, %cst_59 [1] : vector<16x32xf32> to vector<16xf32>
    %173 = vector.shape_cast %172 : vector<16xf32> to vector<16x1xf32>
    %cst_60 = arith.constant 3.200000e+01 : f32
    %174 = vector.broadcast %cst_60 : f32 to vector<16x1xf32>
    %175 = arith.divf %173, %174 : vector<16x1xf32>
    %cst_61 = arith.constant 9.99999997E-7 : f32
    %176 = vector.broadcast %cst_61 : f32 to vector<16x1xf32>
    %177 = arith.addf %175, %176 : vector<16x1xf32>
    %178 = math.rsqrt %177 : vector<16x1xf32>
    %179 = vector.broadcast %178 : vector<16x1xf32> to vector<16x32xf32>
    %180 = arith.mulf %169, %179 : vector<16x32xf32>
    %181 = vector.broadcast %170 : vector<1x32xf32> to vector<16x32xf32>
    %182 = arith.mulf %180, %181 : vector<16x32xf32>
    %c0_62 = arith.constant 0 : index
    %c0_63 = arith.constant 0 : index
    %183 = vector.load %arg15[%c0_62, %c0_63] : memref<32x96xf32, #tpu.memory_space<vmem>>, vector<32x96xf32>
    %cst_64 = arith.constant dense<0.000000e+00> : vector<16x96xf32>
    %184 = tpu.matmul %182, %183, %cst_64 {dimension_numbers = #tpu.dot_dimension_numbers<[1], [0], [0], [1], [0, 0, 1, 1], [], []>} : vector<16x32xf32>, vector<32x96xf32>, vector<16x96xf32> -> vector<16x96xf32>
    %185 = vector.extract_strided_slice %184 {offsets = [0, 0], sizes = [16, 32], strides = [1, 1]} : vector<16x96xf32> to vector<16x32xf32>
    %186 = vector.extract_strided_slice %184 {offsets = [0, 32], sizes = [16, 32], strides = [1, 1]} : vector<16x96xf32> to vector<16x32xf32>
    %187 = vector.extract_strided_slice %184 {offsets = [0, 64], sizes = [16, 32], strides = [1, 1]} : vector<16x96xf32> to vector<16x32xf32>
    %c0_65 = arith.constant 0 : index
    %c0_66 = arith.constant 0 : index
    %c0_67 = arith.constant 0 : index
    %188 = vector.load %arg5[%c0_65, %c0_66, %c0_67] : memref<4x8x8xf32, #tpu.memory_space<vmem>>, vector<4x8x8xf32>
    %c0_68 = arith.constant 0 : index
    %c0_69 = arith.constant 0 : index
    %c0_70 = arith.constant 0 : index
    %189 = vector.load %arg3[%c0_68, %c0_69, %c0_70] : memref<2x8x8xf32, #tpu.memory_space<vmem>>, vector<2x8x8xf32>
    %c0_71 = arith.constant 0 : index
    %c0_72 = arith.constant 0 : index
    %190 = vector.load %arg16[%c0_71, %c0_72] : memref<32x32xf32, #tpu.memory_space<vmem>>, vector<32x32xf32>
    %191 = vector.extract_strided_slice %185 {offsets = [0, 0], sizes = [16, 8], strides = [1, 1]} : vector<16x32xf32> to vector<16x8xf32>
    %192 = vector.shape_cast %191 : vector<16x8xf32> to vector<2x8x8xf32>
    %193 = vector.extract_strided_slice %186 {offsets = [0, 0], sizes = [16, 8], strides = [1, 1]} : vector<16x32xf32> to vector<16x8xf32>
    %194 = vector.shape_cast %193 : vector<16x8xf32> to vector<2x8x8xf32>
    %195 = vector.extract_strided_slice %187 {offsets = [0, 0], sizes = [16, 8], strides = [1, 1]} : vector<16x32xf32> to vector<16x8xf32>
    %196 = vector.shape_cast %195 : vector<16x8xf32> to vector<2x8x8xf32>
    "tpu.trace_start"() <{level = 10 : i32, message = "bqd,bkd->bqk"}> : () -> ()
    %cst_73 = arith.constant dense<0.000000e+00> : vector<2x8x8xf32>
    %197 = tpu.matmul %192, %194, %cst_73 {dimension_numbers = #tpu.dot_dimension_numbers<[2], [2], [1], [1], [0, 0, 0, 1, 1, 1], [0], [0]>} : vector<2x8x8xf32>, vector<2x8x8xf32>, vector<2x8x8xf32> -> vector<2x8x8xf32>
    "tpu.trace_stop"() : () -> ()
    %198 = vector.extract_strided_slice %188 {offsets = [0, 0, 0], sizes = [1, 8, 8], strides = [1, 1, 1]} : vector<4x8x8xf32> to vector<1x8x8xf32>
    %199 = vector.shape_cast %198 : vector<1x8x8xf32> to vector<8x8xf32>
    %200 = vector.shape_cast %199 : vector<8x8xf32> to vector<1x8x8xf32>
    %201 = vector.broadcast %200 : vector<1x8x8xf32> to vector<2x8x8xf32>
    %202 = arith.addf %197, %201 : vector<2x8x8xf32>
    %203 = arith.addf %202, %189 : vector<2x8x8xf32>
    %cst_74 = arith.constant dense<0xFF800000> : vector<2x8xf32>
    %204 = vector.multi_reduction <maximumf>, %203, %cst_74 [2] : vector<2x8x8xf32> to vector<2x8xf32>
    %205 = vector.shape_cast %204 : vector<2x8xf32> to vector<2x8x1xf32>
    %206 = vector.broadcast %205 : vector<2x8x1xf32> to vector<2x8x8xf32>
    %207 = arith.subf %203, %206 : vector<2x8x8xf32>
    %208 = math.exp %207 : vector<2x8x8xf32>
    %cst_75 = arith.constant dense<0.000000e+00> : vector<2x8xf32>
    %209 = vector.multi_reduction <add>, %208, %cst_75 [2] : vector<2x8x8xf32> to vector<2x8xf32>
    %210 = vector.shape_cast %209 : vector<2x8xf32> to vector<2x8x1xf32>
    %211 = vector.broadcast %210 : vector<2x8x1xf32> to vector<2x8x8xf32>
    %212 = arith.divf %208, %211 : vector<2x8x8xf32>
    "tpu.trace_start"() <{level = 10 : i32, message = "bqk,bkd->bqd"}> : () -> ()
    %cst_76 = arith.constant dense<0.000000e+00> : vector<2x8x8xf32>
    %213 = tpu.matmul %212, %196, %cst_76 {dimension_numbers = #tpu.dot_dimension_numbers<[2], [1], [1], [2], [0, 0, 0, 1, 1, 2], [0], [0]>} : vector<2x8x8xf32>, vector<2x8x8xf32>, vector<2x8x8xf32> -> vector<2x8x8xf32>
    "tpu.trace_stop"() : () -> ()
    %214 = vector.shape_cast %213 : vector<2x8x8xf32> to vector<16x8xf32>
    %215 = vector.extract_strided_slice %190 {offsets = [0, 0], sizes = [8, 32], strides = [1, 1]} : vector<32x32xf32> to vector<8x32xf32>
    %cst_77 = arith.constant dense<0.000000e+00> : vector<16x32xf32>
    %216 = tpu.matmul %214, %215, %cst_77 {dimension_numbers = #tpu.dot_dimension_numbers<[1], [0], [0], [1], [0, 0, 1, 1], [], []>} : vector<16x8xf32>, vector<8x32xf32>, vector<16x32xf32> -> vector<16x32xf32>
    %217 = arith.addf %169, %216 : vector<16x32xf32>
    %218 = vector.extract_strided_slice %185 {offsets = [0, 8], sizes = [16, 8], strides = [1, 1]} : vector<16x32xf32> to vector<16x8xf32>
    %219 = vector.shape_cast %218 : vector<16x8xf32> to vector<2x8x8xf32>
    %220 = vector.extract_strided_slice %186 {offsets = [0, 8], sizes = [16, 8], strides = [1, 1]} : vector<16x32xf32> to vector<16x8xf32>
    %221 = vector.shape_cast %220 : vector<16x8xf32> to vector<2x8x8xf32>
    %222 = vector.extract_strided_slice %187 {offsets = [0, 8], sizes = [16, 8], strides = [1, 1]} : vector<16x32xf32> to vector<16x8xf32>
    %223 = vector.shape_cast %222 : vector<16x8xf32> to vector<2x8x8xf32>
    "tpu.trace_start"() <{level = 10 : i32, message = "bqd,bkd->bqk"}> : () -> ()
    %cst_78 = arith.constant dense<0.000000e+00> : vector<2x8x8xf32>
    %224 = tpu.matmul %219, %221, %cst_78 {dimension_numbers = #tpu.dot_dimension_numbers<[2], [2], [1], [1], [0, 0, 0, 1, 1, 1], [0], [0]>} : vector<2x8x8xf32>, vector<2x8x8xf32>, vector<2x8x8xf32> -> vector<2x8x8xf32>
    "tpu.trace_stop"() : () -> ()
    %225 = vector.extract_strided_slice %188 {offsets = [1, 0, 0], sizes = [1, 8, 8], strides = [1, 1, 1]} : vector<4x8x8xf32> to vector<1x8x8xf32>
    %226 = vector.shape_cast %225 : vector<1x8x8xf32> to vector<8x8xf32>
    %227 = vector.shape_cast %226 : vector<8x8xf32> to vector<1x8x8xf32>
    %228 = vector.broadcast %227 : vector<1x8x8xf32> to vector<2x8x8xf32>
    %229 = arith.addf %224, %228 : vector<2x8x8xf32>
    %230 = arith.addf %229, %189 : vector<2x8x8xf32>
    %cst_79 = arith.constant dense<0xFF800000> : vector<2x8xf32>
    %231 = vector.multi_reduction <maximumf>, %230, %cst_79 [2] : vector<2x8x8xf32> to vector<2x8xf32>
    %232 = vector.shape_cast %231 : vector<2x8xf32> to vector<2x8x1xf32>
    %233 = vector.broadcast %232 : vector<2x8x1xf32> to vector<2x8x8xf32>
    %234 = arith.subf %230, %233 : vector<2x8x8xf32>
    %235 = math.exp %234 : vector<2x8x8xf32>
    %cst_80 = arith.constant dense<0.000000e+00> : vector<2x8xf32>
    %236 = vector.multi_reduction <add>, %235, %cst_80 [2] : vector<2x8x8xf32> to vector<2x8xf32>
    %237 = vector.shape_cast %236 : vector<2x8xf32> to vector<2x8x1xf32>
    %238 = vector.broadcast %237 : vector<2x8x1xf32> to vector<2x8x8xf32>
    %239 = arith.divf %235, %238 : vector<2x8x8xf32>
    "tpu.trace_start"() <{level = 10 : i32, message = "bqk,bkd->bqd"}> : () -> ()
    %cst_81 = arith.constant dense<0.000000e+00> : vector<2x8x8xf32>
    %240 = tpu.matmul %239, %223, %cst_81 {dimension_numbers = #tpu.dot_dimension_numbers<[2], [1], [1], [2], [0, 0, 0, 1, 1, 2], [0], [0]>} : vector<2x8x8xf32>, vector<2x8x8xf32>, vector<2x8x8xf32> -> vector<2x8x8xf32>
    "tpu.trace_stop"() : () -> ()
    %241 = vector.shape_cast %240 : vector<2x8x8xf32> to vector<16x8xf32>
    %242 = vector.extract_strided_slice %190 {offsets = [8, 0], sizes = [8, 32], strides = [1, 1]} : vector<32x32xf32> to vector<8x32xf32>
    %cst_82 = arith.constant dense<0.000000e+00> : vector<16x32xf32>
    %243 = tpu.matmul %241, %242, %cst_82 {dimension_numbers = #tpu.dot_dimension_numbers<[1], [0], [0], [1], [0, 0, 1, 1], [], []>} : vector<16x8xf32>, vector<8x32xf32>, vector<16x32xf32> -> vector<16x32xf32>
    %244 = arith.addf %217, %243 : vector<16x32xf32>
    %245 = vector.extract_strided_slice %185 {offsets = [0, 16], sizes = [16, 8], strides = [1, 1]} : vector<16x32xf32> to vector<16x8xf32>
    %246 = vector.shape_cast %245 : vector<16x8xf32> to vector<2x8x8xf32>
    %247 = vector.extract_strided_slice %186 {offsets = [0, 16], sizes = [16, 8], strides = [1, 1]} : vector<16x32xf32> to vector<16x8xf32>
    %248 = vector.shape_cast %247 : vector<16x8xf32> to vector<2x8x8xf32>
    %249 = vector.extract_strided_slice %187 {offsets = [0, 16], sizes = [16, 8], strides = [1, 1]} : vector<16x32xf32> to vector<16x8xf32>
    %250 = vector.shape_cast %249 : vector<16x8xf32> to vector<2x8x8xf32>
    "tpu.trace_start"() <{level = 10 : i32, message = "bqd,bkd->bqk"}> : () -> ()
    %cst_83 = arith.constant dense<0.000000e+00> : vector<2x8x8xf32>
    %251 = tpu.matmul %246, %248, %cst_83 {dimension_numbers = #tpu.dot_dimension_numbers<[2], [2], [1], [1], [0, 0, 0, 1, 1, 1], [0], [0]>} : vector<2x8x8xf32>, vector<2x8x8xf32>, vector<2x8x8xf32> -> vector<2x8x8xf32>
    "tpu.trace_stop"() : () -> ()
    %252 = vector.extract_strided_slice %188 {offsets = [2, 0, 0], sizes = [1, 8, 8], strides = [1, 1, 1]} : vector<4x8x8xf32> to vector<1x8x8xf32>
    %253 = vector.shape_cast %252 : vector<1x8x8xf32> to vector<8x8xf32>
    %254 = vector.shape_cast %253 : vector<8x8xf32> to vector<1x8x8xf32>
    %255 = vector.broadcast %254 : vector<1x8x8xf32> to vector<2x8x8xf32>
    %256 = arith.addf %251, %255 : vector<2x8x8xf32>
    %257 = arith.addf %256, %189 : vector<2x8x8xf32>
    %cst_84 = arith.constant dense<0xFF800000> : vector<2x8xf32>
    %258 = vector.multi_reduction <maximumf>, %257, %cst_84 [2] : vector<2x8x8xf32> to vector<2x8xf32>
    %259 = vector.shape_cast %258 : vector<2x8xf32> to vector<2x8x1xf32>
    %260 = vector.broadcast %259 : vector<2x8x1xf32> to vector<2x8x8xf32>
    %261 = arith.subf %257, %260 : vector<2x8x8xf32>
    %262 = math.exp %261 : vector<2x8x8xf32>
    %cst_85 = arith.constant dense<0.000000e+00> : vector<2x8xf32>
    %263 = vector.multi_reduction <add>, %262, %cst_85 [2] : vector<2x8x8xf32> to vector<2x8xf32>
    %264 = vector.shape_cast %263 : vector<2x8xf32> to vector<2x8x1xf32>
    %265 = vector.broadcast %264 : vector<2x8x1xf32> to vector<2x8x8xf32>
    %266 = arith.divf %262, %265 : vector<2x8x8xf32>
    "tpu.trace_start"() <{level = 10 : i32, message = "bqk,bkd->bqd"}> : () -> ()
    %cst_86 = arith.constant dense<0.000000e+00> : vector<2x8x8xf32>
    %267 = tpu.matmul %266, %250, %cst_86 {dimension_numbers = #tpu.dot_dimension_numbers<[2], [1], [1], [2], [0, 0, 0, 1, 1, 2], [0], [0]>} : vector<2x8x8xf32>, vector<2x8x8xf32>, vector<2x8x8xf32> -> vector<2x8x8xf32>
    "tpu.trace_stop"() : () -> ()
    %268 = vector.shape_cast %267 : vector<2x8x8xf32> to vector<16x8xf32>
    %269 = vector.extract_strided_slice %190 {offsets = [16, 0], sizes = [8, 32], strides = [1, 1]} : vector<32x32xf32> to vector<8x32xf32>
    %cst_87 = arith.constant dense<0.000000e+00> : vector<16x32xf32>
    %270 = tpu.matmul %268, %269, %cst_87 {dimension_numbers = #tpu.dot_dimension_numbers<[1], [0], [0], [1], [0, 0, 1, 1], [], []>} : vector<16x8xf32>, vector<8x32xf32>, vector<16x32xf32> -> vector<16x32xf32>
    %271 = arith.addf %244, %270 : vector<16x32xf32>
    %272 = vector.extract_strided_slice %185 {offsets = [0, 24], sizes = [16, 8], strides = [1, 1]} : vector<16x32xf32> to vector<16x8xf32>
    %273 = vector.shape_cast %272 : vector<16x8xf32> to vector<2x8x8xf32>
    %274 = vector.extract_strided_slice %186 {offsets = [0, 24], sizes = [16, 8], strides = [1, 1]} : vector<16x32xf32> to vector<16x8xf32>
    %275 = vector.shape_cast %274 : vector<16x8xf32> to vector<2x8x8xf32>
    %276 = vector.extract_strided_slice %187 {offsets = [0, 24], sizes = [16, 8], strides = [1, 1]} : vector<16x32xf32> to vector<16x8xf32>
    %277 = vector.shape_cast %276 : vector<16x8xf32> to vector<2x8x8xf32>
    "tpu.trace_start"() <{level = 10 : i32, message = "bqd,bkd->bqk"}> : () -> ()
    %cst_88 = arith.constant dense<0.000000e+00> : vector<2x8x8xf32>
    %278 = tpu.matmul %273, %275, %cst_88 {dimension_numbers = #tpu.dot_dimension_numbers<[2], [2], [1], [1], [0, 0, 0, 1, 1, 1], [0], [0]>} : vector<2x8x8xf32>, vector<2x8x8xf32>, vector<2x8x8xf32> -> vector<2x8x8xf32>
    "tpu.trace_stop"() : () -> ()
    %279 = vector.extract_strided_slice %188 {offsets = [3, 0, 0], sizes = [1, 8, 8], strides = [1, 1, 1]} : vector<4x8x8xf32> to vector<1x8x8xf32>
    %280 = vector.shape_cast %279 : vector<1x8x8xf32> to vector<8x8xf32>
    %281 = vector.shape_cast %280 : vector<8x8xf32> to vector<1x8x8xf32>
    %282 = vector.broadcast %281 : vector<1x8x8xf32> to vector<2x8x8xf32>
    %283 = arith.addf %278, %282 : vector<2x8x8xf32>
    %284 = arith.addf %283, %189 : vector<2x8x8xf32>
    %cst_89 = arith.constant dense<0xFF800000> : vector<2x8xf32>
    %285 = vector.multi_reduction <maximumf>, %284, %cst_89 [2] : vector<2x8x8xf32> to vector<2x8xf32>
    %286 = vector.shape_cast %285 : vector<2x8xf32> to vector<2x8x1xf32>
    %287 = vector.broadcast %286 : vector<2x8x1xf32> to vector<2x8x8xf32>
    %288 = arith.subf %284, %287 : vector<2x8x8xf32>
    %289 = math.exp %288 : vector<2x8x8xf32>
    %cst_90 = arith.constant dense<0.000000e+00> : vector<2x8xf32>
    %290 = vector.multi_reduction <add>, %289, %cst_90 [2] : vector<2x8x8xf32> to vector<2x8xf32>
    %291 = vector.shape_cast %290 : vector<2x8xf32> to vector<2x8x1xf32>
    %292 = vector.broadcast %291 : vector<2x8x1xf32> to vector<2x8x8xf32>
    %293 = arith.divf %289, %292 : vector<2x8x8xf32>
    "tpu.trace_start"() <{level = 10 : i32, message = "bqk,bkd->bqd"}> : () -> ()
    %cst_91 = arith.constant dense<0.000000e+00> : vector<2x8x8xf32>
    %294 = tpu.matmul %293, %277, %cst_91 {dimension_numbers = #tpu.dot_dimension_numbers<[2], [1], [1], [2], [0, 0, 0, 1, 1, 2], [0], [0]>} : vector<2x8x8xf32>, vector<2x8x8xf32>, vector<2x8x8xf32> -> vector<2x8x8xf32>
    "tpu.trace_stop"() : () -> ()
    %295 = vector.shape_cast %294 : vector<2x8x8xf32> to vector<16x8xf32>
    %296 = vector.extract_strided_slice %190 {offsets = [24, 0], sizes = [8, 32], strides = [1, 1]} : vector<32x32xf32> to vector<8x32xf32>
    %cst_92 = arith.constant dense<0.000000e+00> : vector<16x32xf32>
    %297 = tpu.matmul %295, %296, %cst_92 {dimension_numbers = #tpu.dot_dimension_numbers<[1], [0], [0], [1], [0, 0, 1, 1], [], []>} : vector<16x8xf32>, vector<8x32xf32>, vector<16x32xf32> -> vector<16x32xf32>
    %298 = arith.addf %271, %297 : vector<16x32xf32>
    %c0_93 = arith.constant 0 : index
    %c0_94 = arith.constant 0 : index
    %299 = vector.load %arg17[%c0_93, %c0_94] : memref<1x32xf32, #tpu.memory_space<vmem>>, vector<1x32xf32>
    %300 = arith.mulf %298, %298 : vector<16x32xf32>
    %cst_95 = arith.constant dense<0.000000e+00> : vector<16xf32>
    %301 = vector.multi_reduction <add>, %300, %cst_95 [1] : vector<16x32xf32> to vector<16xf32>
    %302 = vector.shape_cast %301 : vector<16xf32> to vector<16x1xf32>
    %cst_96 = arith.constant 3.200000e+01 : f32
    %303 = vector.broadcast %cst_96 : f32 to vector<16x1xf32>
    %304 = arith.divf %302, %303 : vector<16x1xf32>
    %cst_97 = arith.constant 9.99999997E-7 : f32
    %305 = vector.broadcast %cst_97 : f32 to vector<16x1xf32>
    %306 = arith.addf %304, %305 : vector<16x1xf32>
    %307 = math.rsqrt %306 : vector<16x1xf32>
    %308 = vector.broadcast %307 : vector<16x1xf32> to vector<16x32xf32>
    %309 = arith.mulf %298, %308 : vector<16x32xf32>
    %310 = vector.broadcast %299 : vector<1x32xf32> to vector<16x32xf32>
    %311 = arith.mulf %309, %310 : vector<16x32xf32>
    %c0_98 = arith.constant 0 : index
    %c0_99 = arith.constant 0 : index
    %312 = vector.load %arg18[%c0_98, %c0_99] : memref<32x32xf32, #tpu.memory_space<vmem>>, vector<32x32xf32>
    %cst_100 = arith.constant dense<0.000000e+00> : vector<16x32xf32>
    %313 = tpu.matmul %311, %312, %cst_100 {dimension_numbers = #tpu.dot_dimension_numbers<[1], [0], [0], [1], [0, 0, 1, 1], [], []>} : vector<16x32xf32>, vector<32x32xf32>, vector<16x32xf32> -> vector<16x32xf32>
    %c0_101 = arith.constant 0 : index
    %c0_102 = arith.constant 0 : index
    %314 = vector.load %arg19[%c0_101, %c0_102] : memref<32x64xf32, #tpu.memory_space<vmem>>, vector<32x64xf32>
    %cst_103 = arith.constant dense<0.000000e+00> : vector<16x64xf32>
    %315 = tpu.matmul %167, %314, %cst_103 {dimension_numbers = #tpu.dot_dimension_numbers<[1], [0], [0], [1], [0, 0, 1, 1], [], []>} : vector<16x32xf32>, vector<32x64xf32>, vector<16x64xf32> -> vector<16x64xf32>
    %316 = vector.extract_strided_slice %315 {offsets = [0, 0], sizes = [16, 32], strides = [1, 1]} : vector<16x64xf32> to vector<16x32xf32>
    %317 = vector.extract_strided_slice %315 {offsets = [0, 32], sizes = [16, 32], strides = [1, 1]} : vector<16x64xf32> to vector<16x32xf32>
    %c0_104 = arith.constant 0 : index
    %c0_105 = arith.constant 0 : index
    %318 = vector.load %arg20[%c0_104, %c0_105] : memref<32x32xf32, #tpu.memory_space<vmem>>, vector<32x32xf32>
    %319 = vector.extract_strided_slice %313 {offsets = [0, 0], sizes = [16, 8], strides = [1, 1]} : vector<16x32xf32> to vector<16x8xf32>
    %320 = vector.shape_cast %319 : vector<16x8xf32> to vector<2x8x8xf32>
    %321 = vector.extract_strided_slice %316 {offsets = [0, 0], sizes = [16, 8], strides = [1, 1]} : vector<16x32xf32> to vector<16x8xf32>
    %322 = vector.shape_cast %321 : vector<16x8xf32> to vector<2x8x8xf32>
    %323 = vector.extract_strided_slice %317 {offsets = [0, 0], sizes = [16, 8], strides = [1, 1]} : vector<16x32xf32> to vector<16x8xf32>
    %324 = vector.shape_cast %323 : vector<16x8xf32> to vector<2x8x8xf32>
    "tpu.trace_start"() <{level = 10 : i32, message = "bqd,bkd->bqk"}> : () -> ()
    %cst_106 = arith.constant dense<0.000000e+00> : vector<2x8x8xf32>
    %325 = tpu.matmul %320, %322, %cst_106 {dimension_numbers = #tpu.dot_dimension_numbers<[2], [2], [1], [1], [0, 0, 0, 1, 1, 1], [0], [0]>} : vector<2x8x8xf32>, vector<2x8x8xf32>, vector<2x8x8xf32> -> vector<2x8x8xf32>
    "tpu.trace_stop"() : () -> ()
    %326 = vector.broadcast %0 : vector<2x1x8xf32> to vector<2x8x8xf32>
    %327 = arith.addf %325, %326 : vector<2x8x8xf32>
    %cst_107 = arith.constant dense<0xFF800000> : vector<2x8xf32>
    %328 = vector.multi_reduction <maximumf>, %327, %cst_107 [2] : vector<2x8x8xf32> to vector<2x8xf32>
    %329 = vector.shape_cast %328 : vector<2x8xf32> to vector<2x8x1xf32>
    %330 = vector.broadcast %329 : vector<2x8x1xf32> to vector<2x8x8xf32>
    %331 = arith.subf %327, %330 : vector<2x8x8xf32>
    %332 = math.exp %331 : vector<2x8x8xf32>
    %cst_108 = arith.constant dense<0.000000e+00> : vector<2x8xf32>
    %333 = vector.multi_reduction <add>, %332, %cst_108 [2] : vector<2x8x8xf32> to vector<2x8xf32>
    %334 = vector.shape_cast %333 : vector<2x8xf32> to vector<2x8x1xf32>
    %335 = vector.broadcast %334 : vector<2x8x1xf32> to vector<2x8x8xf32>
    %336 = arith.divf %332, %335 : vector<2x8x8xf32>
    "tpu.trace_start"() <{level = 10 : i32, message = "bqk,bkd->bqd"}> : () -> ()
    %cst_109 = arith.constant dense<0.000000e+00> : vector<2x8x8xf32>
    %337 = tpu.matmul %336, %324, %cst_109 {dimension_numbers = #tpu.dot_dimension_numbers<[2], [1], [1], [2], [0, 0, 0, 1, 1, 2], [0], [0]>} : vector<2x8x8xf32>, vector<2x8x8xf32>, vector<2x8x8xf32> -> vector<2x8x8xf32>
    "tpu.trace_stop"() : () -> ()
    %338 = vector.shape_cast %337 : vector<2x8x8xf32> to vector<16x8xf32>
    %339 = vector.extract_strided_slice %318 {offsets = [0, 0], sizes = [8, 32], strides = [1, 1]} : vector<32x32xf32> to vector<8x32xf32>
    %cst_110 = arith.constant dense<0.000000e+00> : vector<16x32xf32>
    %340 = tpu.matmul %338, %339, %cst_110 {dimension_numbers = #tpu.dot_dimension_numbers<[1], [0], [0], [1], [0, 0, 1, 1], [], []>} : vector<16x8xf32>, vector<8x32xf32>, vector<16x32xf32> -> vector<16x32xf32>
    %341 = arith.addf %298, %340 : vector<16x32xf32>
    %342 = vector.extract_strided_slice %313 {offsets = [0, 8], sizes = [16, 8], strides = [1, 1]} : vector<16x32xf32> to vector<16x8xf32>
    %343 = vector.shape_cast %342 : vector<16x8xf32> to vector<2x8x8xf32>
    %344 = vector.extract_strided_slice %316 {offsets = [0, 8], sizes = [16, 8], strides = [1, 1]} : vector<16x32xf32> to vector<16x8xf32>
    %345 = vector.shape_cast %344 : vector<16x8xf32> to vector<2x8x8xf32>
    %346 = vector.extract_strided_slice %317 {offsets = [0, 8], sizes = [16, 8], strides = [1, 1]} : vector<16x32xf32> to vector<16x8xf32>
    %347 = vector.shape_cast %346 : vector<16x8xf32> to vector<2x8x8xf32>
    "tpu.trace_start"() <{level = 10 : i32, message = "bqd,bkd->bqk"}> : () -> ()
    %cst_111 = arith.constant dense<0.000000e+00> : vector<2x8x8xf32>
    %348 = tpu.matmul %343, %345, %cst_111 {dimension_numbers = #tpu.dot_dimension_numbers<[2], [2], [1], [1], [0, 0, 0, 1, 1, 1], [0], [0]>} : vector<2x8x8xf32>, vector<2x8x8xf32>, vector<2x8x8xf32> -> vector<2x8x8xf32>
    "tpu.trace_stop"() : () -> ()
    %349 = vector.broadcast %0 : vector<2x1x8xf32> to vector<2x8x8xf32>
    %350 = arith.addf %348, %349 : vector<2x8x8xf32>
    %cst_112 = arith.constant dense<0xFF800000> : vector<2x8xf32>
    %351 = vector.multi_reduction <maximumf>, %350, %cst_112 [2] : vector<2x8x8xf32> to vector<2x8xf32>
    %352 = vector.shape_cast %351 : vector<2x8xf32> to vector<2x8x1xf32>
    %353 = vector.broadcast %352 : vector<2x8x1xf32> to vector<2x8x8xf32>
    %354 = arith.subf %350, %353 : vector<2x8x8xf32>
    %355 = math.exp %354 : vector<2x8x8xf32>
    %cst_113 = arith.constant dense<0.000000e+00> : vector<2x8xf32>
    %356 = vector.multi_reduction <add>, %355, %cst_113 [2] : vector<2x8x8xf32> to vector<2x8xf32>
    %357 = vector.shape_cast %356 : vector<2x8xf32> to vector<2x8x1xf32>
    %358 = vector.broadcast %357 : vector<2x8x1xf32> to vector<2x8x8xf32>
    %359 = arith.divf %355, %358 : vector<2x8x8xf32>
    "tpu.trace_start"() <{level = 10 : i32, message = "bqk,bkd->bqd"}> : () -> ()
    %cst_114 = arith.constant dense<0.000000e+00> : vector<2x8x8xf32>
    %360 = tpu.matmul %359, %347, %cst_114 {dimension_numbers = #tpu.dot_dimension_numbers<[2], [1], [1], [2], [0, 0, 0, 1, 1, 2], [0], [0]>} : vector<2x8x8xf32>, vector<2x8x8xf32>, vector<2x8x8xf32> -> vector<2x8x8xf32>
    "tpu.trace_stop"() : () -> ()
    %361 = vector.shape_cast %360 : vector<2x8x8xf32> to vector<16x8xf32>
    %362 = vector.extract_strided_slice %318 {offsets = [8, 0], sizes = [8, 32], strides = [1, 1]} : vector<32x32xf32> to vector<8x32xf32>
    %cst_115 = arith.constant dense<0.000000e+00> : vector<16x32xf32>
    %363 = tpu.matmul %361, %362, %cst_115 {dimension_numbers = #tpu.dot_dimension_numbers<[1], [0], [0], [1], [0, 0, 1, 1], [], []>} : vector<16x8xf32>, vector<8x32xf32>, vector<16x32xf32> -> vector<16x32xf32>
    %364 = arith.addf %341, %363 : vector<16x32xf32>
    %365 = vector.extract_strided_slice %313 {offsets = [0, 16], sizes = [16, 8], strides = [1, 1]} : vector<16x32xf32> to vector<16x8xf32>
    %366 = vector.shape_cast %365 : vector<16x8xf32> to vector<2x8x8xf32>
    %367 = vector.extract_strided_slice %316 {offsets = [0, 16], sizes = [16, 8], strides = [1, 1]} : vector<16x32xf32> to vector<16x8xf32>
    %368 = vector.shape_cast %367 : vector<16x8xf32> to vector<2x8x8xf32>
    %369 = vector.extract_strided_slice %317 {offsets = [0, 16], sizes = [16, 8], strides = [1, 1]} : vector<16x32xf32> to vector<16x8xf32>
    %370 = vector.shape_cast %369 : vector<16x8xf32> to vector<2x8x8xf32>
    "tpu.trace_start"() <{level = 10 : i32, message = "bqd,bkd->bqk"}> : () -> ()
    %cst_116 = arith.constant dense<0.000000e+00> : vector<2x8x8xf32>
    %371 = tpu.matmul %366, %368, %cst_116 {dimension_numbers = #tpu.dot_dimension_numbers<[2], [2], [1], [1], [0, 0, 0, 1, 1, 1], [0], [0]>} : vector<2x8x8xf32>, vector<2x8x8xf32>, vector<2x8x8xf32> -> vector<2x8x8xf32>
    "tpu.trace_stop"() : () -> ()
    %372 = vector.broadcast %0 : vector<2x1x8xf32> to vector<2x8x8xf32>
    %373 = arith.addf %371, %372 : vector<2x8x8xf32>
    %cst_117 = arith.constant dense<0xFF800000> : vector<2x8xf32>
    %374 = vector.multi_reduction <maximumf>, %373, %cst_117 [2] : vector<2x8x8xf32> to vector<2x8xf32>
    %375 = vector.shape_cast %374 : vector<2x8xf32> to vector<2x8x1xf32>
    %376 = vector.broadcast %375 : vector<2x8x1xf32> to vector<2x8x8xf32>
    %377 = arith.subf %373, %376 : vector<2x8x8xf32>
    %378 = math.exp %377 : vector<2x8x8xf32>
    %cst_118 = arith.constant dense<0.000000e+00> : vector<2x8xf32>
    %379 = vector.multi_reduction <add>, %378, %cst_118 [2] : vector<2x8x8xf32> to vector<2x8xf32>
    %380 = vector.shape_cast %379 : vector<2x8xf32> to vector<2x8x1xf32>
    %381 = vector.broadcast %380 : vector<2x8x1xf32> to vector<2x8x8xf32>
    %382 = arith.divf %378, %381 : vector<2x8x8xf32>
    "tpu.trace_start"() <{level = 10 : i32, message = "bqk,bkd->bqd"}> : () -> ()
    %cst_119 = arith.constant dense<0.000000e+00> : vector<2x8x8xf32>
    %383 = tpu.matmul %382, %370, %cst_119 {dimension_numbers = #tpu.dot_dimension_numbers<[2], [1], [1], [2], [0, 0, 0, 1, 1, 2], [0], [0]>} : vector<2x8x8xf32>, vector<2x8x8xf32>, vector<2x8x8xf32> -> vector<2x8x8xf32>
    "tpu.trace_stop"() : () -> ()
    %384 = vector.shape_cast %383 : vector<2x8x8xf32> to vector<16x8xf32>
    %385 = vector.extract_strided_slice %318 {offsets = [16, 0], sizes = [8, 32], strides = [1, 1]} : vector<32x32xf32> to vector<8x32xf32>
    %cst_120 = arith.constant dense<0.000000e+00> : vector<16x32xf32>
    %386 = tpu.matmul %384, %385, %cst_120 {dimension_numbers = #tpu.dot_dimension_numbers<[1], [0], [0], [1], [0, 0, 1, 1], [], []>} : vector<16x8xf32>, vector<8x32xf32>, vector<16x32xf32> -> vector<16x32xf32>
    %387 = arith.addf %364, %386 : vector<16x32xf32>
    %388 = vector.extract_strided_slice %313 {offsets = [0, 24], sizes = [16, 8], strides = [1, 1]} : vector<16x32xf32> to vector<16x8xf32>
    %389 = vector.shape_cast %388 : vector<16x8xf32> to vector<2x8x8xf32>
    %390 = vector.extract_strided_slice %316 {offsets = [0, 24], sizes = [16, 8], strides = [1, 1]} : vector<16x32xf32> to vector<16x8xf32>
    %391 = vector.shape_cast %390 : vector<16x8xf32> to vector<2x8x8xf32>
    %392 = vector.extract_strided_slice %317 {offsets = [0, 24], sizes = [16, 8], strides = [1, 1]} : vector<16x32xf32> to vector<16x8xf32>
    %393 = vector.shape_cast %392 : vector<16x8xf32> to vector<2x8x8xf32>
    "tpu.trace_start"() <{level = 10 : i32, message = "bqd,bkd->bqk"}> : () -> ()
    %cst_121 = arith.constant dense<0.000000e+00> : vector<2x8x8xf32>
    %394 = tpu.matmul %389, %391, %cst_121 {dimension_numbers = #tpu.dot_dimension_numbers<[2], [2], [1], [1], [0, 0, 0, 1, 1, 1], [0], [0]>} : vector<2x8x8xf32>, vector<2x8x8xf32>, vector<2x8x8xf32> -> vector<2x8x8xf32>
    "tpu.trace_stop"() : () -> ()
    %395 = vector.broadcast %0 : vector<2x1x8xf32> to vector<2x8x8xf32>
    %396 = arith.addf %394, %395 : vector<2x8x8xf32>
    %cst_122 = arith.constant dense<0xFF800000> : vector<2x8xf32>
    %397 = vector.multi_reduction <maximumf>, %396, %cst_122 [2] : vector<2x8x8xf32> to vector<2x8xf32>
    %398 = vector.shape_cast %397 : vector<2x8xf32> to vector<2x8x1xf32>
    %399 = vector.broadcast %398 : vector<2x8x1xf32> to vector<2x8x8xf32>
    %400 = arith.subf %396, %399 : vector<2x8x8xf32>
    %401 = math.exp %400 : vector<2x8x8xf32>
    %cst_123 = arith.constant dense<0.000000e+00> : vector<2x8xf32>
    %402 = vector.multi_reduction <add>, %401, %cst_123 [2] : vector<2x8x8xf32> to vector<2x8xf32>
    %403 = vector.shape_cast %402 : vector<2x8xf32> to vector<2x8x1xf32>
    %404 = vector.broadcast %403 : vector<2x8x1xf32> to vector<2x8x8xf32>
    %405 = arith.divf %401, %404 : vector<2x8x8xf32>
    "tpu.trace_start"() <{level = 10 : i32, message = "bqk,bkd->bqd"}> : () -> ()
    %cst_124 = arith.constant dense<0.000000e+00> : vector<2x8x8xf32>
    %406 = tpu.matmul %405, %393, %cst_124 {dimension_numbers = #tpu.dot_dimension_numbers<[2], [1], [1], [2], [0, 0, 0, 1, 1, 2], [0], [0]>} : vector<2x8x8xf32>, vector<2x8x8xf32>, vector<2x8x8xf32> -> vector<2x8x8xf32>
    "tpu.trace_stop"() : () -> ()
    %407 = vector.shape_cast %406 : vector<2x8x8xf32> to vector<16x8xf32>
    %408 = vector.extract_strided_slice %318 {offsets = [24, 0], sizes = [8, 32], strides = [1, 1]} : vector<32x32xf32> to vector<8x32xf32>
    %cst_125 = arith.constant dense<0.000000e+00> : vector<16x32xf32>
    %409 = tpu.matmul %407, %408, %cst_125 {dimension_numbers = #tpu.dot_dimension_numbers<[1], [0], [0], [1], [0, 0, 1, 1], [], []>} : vector<16x8xf32>, vector<8x32xf32>, vector<16x32xf32> -> vector<16x32xf32>
    %410 = arith.addf %387, %409 : vector<16x32xf32>
    %c0_126 = arith.constant 0 : index
    %c0_127 = arith.constant 0 : index
    %411 = vector.load %arg21[%c0_126, %c0_127] : memref<1x32xf32, #tpu.memory_space<vmem>>, vector<1x32xf32>
    %412 = arith.mulf %410, %410 : vector<16x32xf32>
    %cst_128 = arith.constant dense<0.000000e+00> : vector<16xf32>
    %413 = vector.multi_reduction <add>, %412, %cst_128 [1] : vector<16x32xf32> to vector<16xf32>
    %414 = vector.shape_cast %413 : vector<16xf32> to vector<16x1xf32>
    %cst_129 = arith.constant 3.200000e+01 : f32
    %415 = vector.broadcast %cst_129 : f32 to vector<16x1xf32>
    %416 = arith.divf %414, %415 : vector<16x1xf32>
    %cst_130 = arith.constant 9.99999997E-7 : f32
    %417 = vector.broadcast %cst_130 : f32 to vector<16x1xf32>
    %418 = arith.addf %416, %417 : vector<16x1xf32>
    %419 = math.rsqrt %418 : vector<16x1xf32>
    %420 = vector.broadcast %419 : vector<16x1xf32> to vector<16x32xf32>
    %421 = arith.mulf %410, %420 : vector<16x32xf32>
    %422 = vector.broadcast %411 : vector<1x32xf32> to vector<16x32xf32>
    %423 = arith.mulf %421, %422 : vector<16x32xf32>
    %c0_131 = arith.constant 0 : index
    %c0_132 = arith.constant 0 : index
    %424 = vector.load %arg22[%c0_131, %c0_132] : memref<32x64xf32, #tpu.memory_space<vmem>>, vector<32x64xf32>
    %cst_133 = arith.constant dense<0.000000e+00> : vector<16x64xf32>
    %425 = tpu.matmul %423, %424, %cst_133 {dimension_numbers = #tpu.dot_dimension_numbers<[1], [0], [0], [1], [0, 0, 1, 1], [], []>} : vector<16x32xf32>, vector<32x64xf32>, vector<16x64xf32> -> vector<16x64xf32>
    %cst_134 = arith.constant 0.000000e+00 : f32
    %426 = vector.broadcast %cst_134 : f32 to vector<16x64xf32>
    %427 = arith.maximumf %425, %426 : vector<16x64xf32>
    %c0_135 = arith.constant 0 : index
    %c0_136 = arith.constant 0 : index
    %428 = vector.load %arg23[%c0_135, %c0_136] : memref<64x32xf32, #tpu.memory_space<vmem>>, vector<64x32xf32>
    %cst_137 = arith.constant dense<0.000000e+00> : vector<16x32xf32>
    %429 = tpu.matmul %427, %428, %cst_137 {dimension_numbers = #tpu.dot_dimension_numbers<[1], [0], [0], [1], [0, 0, 1, 1], [], []>} : vector<16x64xf32>, vector<64x32xf32>, vector<16x32xf32> -> vector<16x32xf32>
    %430 = arith.addf %410, %429 : vector<16x32xf32>
    %c0_138 = arith.constant 0 : index
    %c0_139 = arith.constant 0 : index
    %431 = vector.load %arg24[%c0_138, %c0_139] : memref<1x32xf32, #tpu.memory_space<vmem>>, vector<1x32xf32>
    %432 = arith.mulf %430, %430 : vector<16x32xf32>
    %cst_140 = arith.constant dense<0.000000e+00> : vector<16xf32>
    %433 = vector.multi_reduction <add>, %432, %cst_140 [1] : vector<16x32xf32> to vector<16xf32>
    %434 = vector.shape_cast %433 : vector<16xf32> to vector<16x1xf32>
    %cst_141 = arith.constant 3.200000e+01 : f32
    %435 = vector.broadcast %cst_141 : f32 to vector<16x1xf32>
    %436 = arith.divf %434, %435 : vector<16x1xf32>
    %cst_142 = arith.constant 9.99999997E-7 : f32
    %437 = vector.broadcast %cst_142 : f32 to vector<16x1xf32>
    %438 = arith.addf %436, %437 : vector<16x1xf32>
    %439 = math.rsqrt %438 : vector<16x1xf32>
    %440 = vector.broadcast %439 : vector<16x1xf32> to vector<16x32xf32>
    %441 = arith.mulf %430, %440 : vector<16x32xf32>
    %442 = vector.broadcast %431 : vector<1x32xf32> to vector<16x32xf32>
    %443 = arith.mulf %441, %442 : vector<16x32xf32>
    %c0_143 = arith.constant 0 : index
    %c0_144 = arith.constant 0 : index
    %444 = vector.load %arg25[%c0_143, %c0_144] : memref<32x256xf32, #tpu.memory_space<vmem>>, vector<32x256xf32>
    %cst_145 = arith.constant dense<0.000000e+00> : vector<16x256xf32>
    %445 = tpu.matmul %443, %444, %cst_145 {dimension_numbers = #tpu.dot_dimension_numbers<[1], [0], [0], [1], [0, 0, 1, 1], [], []>} : vector<16x32xf32>, vector<32x256xf32>, vector<16x256xf32> -> vector<16x256xf32>
    %446 = vector.shape_cast %445 : vector<16x256xf32> to vector<2x8x256xf32>
    %c0_146 = arith.constant 0 : index
    %c0_147 = arith.constant 0 : index
    %c0_148 = arith.constant 0 : index
    %447 = vector.load %arg26[%c0_146, %c0_147, %c0_148] : memref<2x8x256xf32, #tpu.memory_space<vmem>>, vector<2x8x256xf32>
    tpu.vector_store %arg26[%c0_146, %c0_147, %c0_148], %446 {strides = array<i32>} : memref<2x8x256xf32, #tpu.memory_space<vmem>>, vector<2x8x256xf32>,
    %c0_149 = arith.constant 0 : index
    %c0_150 = arith.constant 0 : index
    %c0_151 = arith.constant 0 : index
    %448 = vector.load %arg6[%c0_149, %c0_150, %c0_151] : memref<2x8x1xi32, #tpu.memory_space<vmem>>, vector<2x8x1xi32>
    %cst_152 = arith.constant dense<0xFF800000> : vector<2x8xf32>
    %449 = vector.multi_reduction <maximumf>, %446, %cst_152 [2] : vector<2x8x256xf32> to vector<2x8xf32>
    %450 = vector.shape_cast %449 : vector<2x8xf32> to vector<2x8x1xf32>
    %451 = vector.broadcast %450 : vector<2x8x1xf32> to vector<2x8x256xf32>
    %452 = arith.subf %446, %451 : vector<2x8x256xf32>
    %453 = math.exp %452 : vector<2x8x256xf32>
    %cst_153 = arith.constant dense<0.000000e+00> : vector<2x8xf32>
    %454 = vector.multi_reduction <add>, %453, %cst_153 [2] : vector<2x8x256xf32> to vector<2x8xf32>
    %455 = vector.shape_cast %454 : vector<2x8xf32> to vector<2x8x1xf32>
    %456 = math.log %455 : vector<2x8x1xf32>
    %457 = arith.addf %456, %450 : vector<2x8x1xf32>
    %458 = tpu.iota {dimensions = array<i32: 2>} : vector<2x8x256xi32>
    %459 = vector.broadcast %448 : vector<2x8x1xi32> to vector<2x8x256xi32>
    %460 = arith.cmpi eq, %458, %459 : vector<2x8x256xi32>
    %cst_154 = arith.constant 0.000000e+00 : f32
    %461 = vector.broadcast %cst_154 : f32 to vector<2x8x256xf32>
    %462 = arith.select %460, %446, %461 : vector<2x8x256xi1>, vector<2x8x256xf32>
    %cst_155 = arith.constant dense<0.000000e+00> : vector<2x8xf32>
    %463 = vector.multi_reduction <add>, %462, %cst_155 [2] : vector<2x8x256xf32> to vector<2x8xf32>
    %464 = vector.shape_cast %463 : vector<2x8xf32> to vector<2x8x1xf32>
    %c-100_i32 = arith.constant -100 : i32
    %465 = vector.broadcast %c-100_i32 : i32 to vector<2x8x1xi32>
    %466 = arith.cmpi ne, %448, %465 : vector<2x8x1xi32>
    %467 = arith.subf %457, %464 : vector<2x8x1xf32>
    %cst_156 = arith.constant 0.000000e+00 : f32
    %468 = vector.broadcast %cst_156 : f32 to vector<2x8x1xf32>
    %469 = arith.select %466, %467, %468 : vector<2x8x1xi1>, vector<2x8x1xf32>
    %470 = arith.extui %466 : vector<2x8x1xi1> to vector<2x8x1xi32>
    %471 = arith.sitofp %470 : vector<2x8x1xi32> to vector<2x8x1xf32>
    %cst_157 = arith.constant dense<0.000000e+00> : vector<2x1xf32>
    %472 = vector.multi_reduction <add>, %471, %cst_157 [1] : vector<2x8x1xf32> to vector<2x1xf32>
    %cst_158 = arith.constant dense<0.000000e+00> : vector<2x1xf32>
    %473 = vector.multi_reduction <add>, %469, %cst_158 [1] : vector<2x8x1xf32> to vector<2x1xf32>
    %cst_159 = arith.constant 1.000000e+00 : f32
    %474 = vector.broadcast %cst_159 : f32 to vector<2x1xf32>
    %475 = arith.maximumf %472, %474 : vector<2x1xf32>
    %476 = arith.divf %473, %475 : vector<2x1xf32>
    %c0_160 = arith.constant 0 : index
    %c0_161 = arith.constant 0 : index
    %477 = vector.load %arg27[%c0_160, %c0_161] : memref<2x1xf32, #tpu.memory_space<vmem>>, vector<2x1xf32>
    tpu.vector_store %arg27[%c0_160, %c0_161], %476 {strides = array<i32>} : memref<2x1xf32, #tpu.memory_space<vmem>>, vector<2x1xf32>,
    return
  }
}

</mosaic_0001>

<bundles_post_ra>
// kernel: t5_forward.1
= control target key start
LH: loop header
LB: loop body
LE: loop exit
PB: predicated region body
PF: predicated region fallthrough
CT: control target
= control target key end

     0   :  { %s4501_s0 = inlined_call_operand.vmem [shape: f32[2,8,32], index: 0, kind: input, shape index: {}]   ;;  %s4502_s1 = inlined_call_operand.vmem [shape: f32[2,8,32], index: 1, kind: input, shape index: {}]   ;;  %s4503_s2 = inlined_call_operand.vmem [shape: f32[2,1,8], index: 2, kind: input, shape index: {}]   ;;  %s4504_s3 = inlined_call_operand.vmem [shape: f32[2,8,8], index: 3, kind: input, shape index: {}]   ;;  %s4505_s4 = inlined_call_operand.vmem [shape: f32[4,8,8], index: 4, kind: input, shape index: {}]   ;;  %s4506_s5 = inlined_call_operand.vmem [shape: f32[4,8,8], index: 5, kind: input, shape index: {}]   ;;  %s4507_s6 = inlined_call_operand.vmem [shape: s32[2,8,1], index: 6, kind: input, shape index: {}]   ;;  %s4508_s7 = inlined_call_operand.vmem [shape: f32[1,32], index: 7, kind: input, shape index: {}]   ;;  %s4509_s8 = inlined_call_operand.vmem [shape: f32[32,96], index: 8, kind: input, shape index: {}]   ;;  %s4510_s9 = inlined_call_operand.vmem [shape: f32[32,32], index: 9, kind: input, shape index: {}]   ;;  %s4511_s10 = inlined_call_operand.vmem [shape: f32[1,32], index: 10, kind: input, shape index: {}]   ;;  %s4512_s11 = inlined_call_operand.vmem [shape: f32[32,64], index: 11, kind: input, shape index: {}]   ;;  %s4513_s12 = inlined_call_operand.vmem [shape: f32[64,32], index: 12, kind: input, shape index: {}]   ;;  %s4514_s13 = inlined_call_operand.vmem [shape: f32[1,32], index: 13, kind: input, shape index: {}]   ;;  %s4515_s14 = inlined_call_operand.vmem [shape: f32[1,32], index: 14, kind: input, shape index: {}]   ;;  %s4516_s15 = inlined_call_operand.vmem [shape: f32[32,96], index: 15, kind: input, shape index: {}]   ;;  %s4517_s16 = inlined_call_operand.vmem [shape: f32[32,32], index: 16, kind: input, shape index: {}]   ;;  %s4518_s17 = inlined_call_operand.vmem [shape: f32[1,32], index: 17, kind: input, shape index: {}]   ;;  %s4519_s18 = inlined_call_operand.vmem [shape: f32[32,32], index: 18, kind: input, shape index: {}]   ;;  %s4520_s19 = inlined_call_operand.vmem [shape: f32[32,64], index: 19, kind: input, shape index: {}]   ;;  %s4521_s20 = inlined_call_operand.vmem [shape: f32[32,32], index: 20, kind: input, shape index: {}]   ;;  %s4522_s21 = inlined_call_operand.vmem [shape: f32[1,32], index: 21, kind: input, shape index: {}]   ;;  %s4523_s22 = inlined_call_operand.vmem [shape: f32[32,64], index: 22, kind: input, shape index: {}]   ;;  %s4524_s23 = inlined_call_operand.vmem [shape: f32[64,32], index: 23, kind: input, shape index: {}]   ;;  %s4525_s24 = inlined_call_operand.vmem [shape: f32[1,32], index: 24, kind: input, shape index: {}]   ;;  %s4526_s25 = inlined_call_operand.vmem [shape: f32[32,256], index: 25, kind: input, shape index: {}]   ;;  %s4527_s26 = inlined_call_operand.hbm [shape: f32[2,8,256], index: 26, kind: output, shape index: {0}]   ;;  %s4528_s27 = inlined_call_operand.hbm [shape: f32[2,1], index: 27, kind: output, shape index: {1}]  }
   0x1   :  { %4555 = sst [smem:[#allocation8_spill]] %s4501_s0 }
   0x2   :  { %4556 = sst [smem:[#allocation9_spill]] %s4502_s1 }
   0x3   :  { %4557 = sst [smem:[#allocation10_spill]] %s4503_s2 }
   0x4   :  { %4558 = sst [smem:[#allocation11_spill]] %s4504_s3 }
   0x5   :  { %4559 = sst [smem:[#allocation12_spill]] %s4505_s4 }
   0x6   :  { %4560 = sst [smem:[#allocation13_spill]] %s4506_s5 }
   0x7   :  { %4561 = sst [smem:[#allocation14_spill]] %s4507_s6 }
   0x8   :  { %4562 = sst [smem:[#allocation15_spill]] %s4508_s7 }
   0x9   :  { %4563 = sst [smem:[#allocation16_spill]] %s4509_s8 }
   0xa   :  { %4564 = sst [smem:[#allocation17_spill]] %s4510_s9 }
   0xb   :  { %4565 = sst [smem:[#allocation18_spill]] %s4511_s10 }
   0xc   :  { %4566 = sst [smem:[#allocation19_spill]] %s4512_s11 }
   0xd   :  { %33 = vsyncpa [#allocation3], 0  ;;  %s4567_s8 = sld [smem:[#allocation8_spill]]  ;;  %vm94_vm0 = vcmask 261120  }
  0x13   :  { %v3680_v0 = vld [vmem:[%s4567_s8] sm:$0xff]  ;;  %v3685_v1 = vld [vmem:[%s4567_s8 + $0x8] sm:$0xff] }
  0x14   :  { %v92_v2 = vmul.f32 %v3680_v0, %v3680_v0 }
  0x16   :  { %v95_v3 = vsel %vm94_vm0, %v92_v2, 0.0 }
  0x17   :  { %96 = vadd.xlane.f32.xlu0 %v95_v3 }
  0x18   :  { %34 = vsyncpa [#allocation5], 0  ;;  %v93_v4 = vmul.f32 %v3685_v1, %v3685_v1  ;;  %v3519_v6 = vmov 32.0   ;;  %s4568_s0 = sld [smem:[#allocation16_spill]]  ;;  %s4553_s8 = smov 96   ;;  %vm183_vm8 = vcmask 64512  }
  0x19   :  { %3321 = vrcp.f32 %v3519_v6  ;;  %s4569_s4 = sld [smem:[#allocation15_spill]]  ;;  %s3521_s6 = smov 64  }
  0x1a   :  { %v98_v5 = vsel %vm94_vm0, %v93_v4, 0.0  ;;  %s4570_s5 = sld [smem:[#allocation12_spill]]  ;;  %s3522_s11 = smov 120  }
  0x1b   :  { %s4571_s10 = sld [smem:[#allocation10_spill]]  ;;  %s3523_s2 = smov 88  }
  0x1c   :  { %s4549_s3 = smov 80   ;;  %s4572_s30 = sld [smem:[#allocation17_spill]] }
  0x1d   :  { %s4543_s9 = smov 112   ;;  %s4551_s29 = smov 56  }
  0x1e   :  { %v142_v10 = vld [vmem:[%s4568_s0 + $0x18] sm:$0xff]  ;;  %v141_v11 = vld [vmem:[%s4568_s0 + $0x10] sm:$0xff]  ;;  %v140_v13 = vld [vmem:[%s4568_s0 + $0x8] sm:$0xff]  ;;  %s4547_s28 = smov 48   ;;  %s4545_s1 = smov 40  }
  0x1f   :  { %99 = vadd.xlane.f32.xlu0 %v98_v5  ;;  %v3322_v7 = vpop.eup %3321  ;;  %161 = vmatpush.msra.mxu0 %v142_v10  ;;  %v139_v14 = vld [vmem:[%s4568_s0] sm:$0xff]  ;;  %s4541_s0 = smov 72  }
  0x20   :  { %v102_v8 = vmul.f32 32.0, %v3322_v7  ;;  %vm106_vm1 = vweird.f32 %v3322_v7  ;;  %v3312_v31 = vld [vmem:[%s4569_s4] ss:$0 sm:$0xff]  ;;  %s4539_s4 = smov 104  }
  0x21   :  { %162 = vmatpush.msra.mxu0 %v141_v11  ;;  %v172_v46 = vld [vmem:[%s4570_s5] sm:$0xff] }
  0x22   :  { %v103_v9 = vsub.f32 1.0, %v102_v8  ;;  %v3736_v47 = vld [vmem:[%s4571_s10] ss:$0 sm:$0xff]  ;;  %v3743_v52 = vld [vmem:[%s4571_s10 + $0x1] ss:$0 sm:$0xff] }
  0x23   :  { %163 = vmatpush.msra.mxu0 %v140_v13  ;;  %v176_v59 = vld [vmem:[%s4572_s30] sm:$0xff] }
  0x24   :  { %v104_v12 = vmul.f32 %v3322_v7, %v103_v9 }
  0x25   :  { %164 = vmatpush.msra.mxu0 %v139_v14 }
  0x26   :  { %v105_v15 = vadd.f32 %v3322_v7, %v104_v12 }
  0x28   :  { %v3705_v16 = vsel %vm106_vm1, %v3322_v7, %v105_v15 }
  0x8a   :  { %v97_v17 = vpop.xlane.xlu0 %96 }
  0x8b   :  { %v108_v18 = vmul.f32 %v3705_v16, %v97_v17 }
  0x8d   :  { %v110_v19 = vadd.f32 1e-06, %v108_v18 }
  0x8f   :  { %3323 = vrsqrt.f32 %v110_v19  ;;  %vm118_vm3 = vweird.f32 %v110_v19 }
  0x92   :  { %v100_v20 = vpop.xlane.xlu0 %99 }
  0x93   :  { %v109_v21 = vmul.f32 %v3705_v16, %v100_v20 }
  0x95   :  { %v3324_v22 = vpop.eup %3323  ;;  %v111_v23 = vadd.f32 1e-06, %v109_v21 }
  0x96   :  { %v113_v24 = vmul.f32 %v3324_v22, %v110_v19  ;;  %vm119_vm2 = vweird.f32 %v3324_v22 }
  0x97   :  { %3325 = vrsqrt.f32 %v111_v23  ;;  %vm120_vm4 = vmor %vm118_vm3, %vm119_vm2  ;;  %vm128_vm6 = vweird.f32 %v111_v23 }
  0x98   :  { %v114_v25 = vmul.f32 %v3324_v22, %v113_v24 }
  0x9a   :  { %v115_v26 = vmul.f32 0.5, %v114_v25 }
  0x9c   :  { %v116_v27 = vsub.f32 1.5, %v115_v26 }
  0x9d   :  { %v3326_v28 = vpop.eup %3325 }
  0x9e   :  { %v117_v29 = vmul.f32 %v3324_v22, %v116_v27  ;;  %v123_v30 = vmul.f32 %v3326_v28, %v111_v23  ;;  %vm129_vm5 = vweird.f32 %v3326_v28 }
  0x9f   :  { %vm130_vm7 = vmor %vm128_vm6, %vm129_vm5 }
  0xa0   :  { %v124_v32 = vmul.f32 %v3326_v28, %v123_v30  ;;  %v121_v33 = vsel %vm120_vm4, %v3324_v22, %v117_v29 }
  0xa1   :  { %v132_v34 = vmul.f32 %v121_v33, %v3680_v0 }
  0xa2   :  { %v125_v35 = vmul.f32 0.5, %v124_v32 }
  0xa3   :  { %v137_v36 = vmul.f32 %v3312_v31, %v132_v34 }
  0xa4   :  { %v126_v37 = vsub.f32 1.5, %v125_v35 }
  0xa5   :  { %3174 = vmatmul.msk.f32.vlgmr.msra.gmra.mxu0 %vm94_vm0, %v137_v36 }
  0xa6   :  { %v127_v38 = vmul.f32 %v3326_v28, %v126_v37 }
  0xa8   :  { %v131_v39 = vsel %vm130_vm7, %v3326_v28, %v127_v38 }
  0xa9   :  { %v133_v40 = vmul.f32 %v131_v39, %v3685_v1  ;;  %v173_v39 = vld [vmem:[%s4570_s5 + $0x8] sm:$0xff] }
  0xab   :  { %v138_v41 = vmul.f32 %v3312_v31, %v133_v40 }
  0xad   :  { %3175 = vmatmul.msk.f32.gmra.mxu0 %vm94_vm0, %v138_v41 }
 0x122   :  { %v3716_v42 = vpop.f32.mrf.mxu0 }
 0x123   :  { %181 = vrot.lane.b32.xlu1 %v3716_v42, %s4553_s8 }
 0x12a   :  { %v3720_v43 = vpop.f32.mrf.mxu0 }
 0x12b   :  { %209 = vrot.lane.b32.xlu1 %v3720_v43, %s4553_s8 }
 0x195   :  { %v182_v44 = vpop.permute.xlu1 %181 }
 0x196   :  { %3176 = vmatpush.xpose.msk.msra.mxu1 %vm183_vm8, %v182_v44 }
 0x199   :  { %3177 = vmatmul.msk.f32.vlgmr.msra.gmra.mxu1 %vm183_vm8, %v3716_v42 }
 0x19a   :  { %364 = vmatpush.msrb.mxu1 %v176_v59 }
 0x19d   :  { %v210_v45 = vpop.permute.xlu1 %209 }
 0x19e   :  { %3178 = vmatpush.xpose.msk.msrb.mxu0 %vm183_vm8, %v210_v45 }
 0x1a1   :  { %3179 = vmatmul.msk.f32.vlgmr.msrb.gmra.mxu0 %vm183_vm8, %v3720_v43 }
 0x216   :  { %v205_v48 = vpop.f32.mrf.mxu1 }
 0x217   :  { %v206_v49 = vadd.f32 %v205_v48, %v172_v46 }
 0x219   :  { %v241_v50 = vadd.f32 %v3736_v47, %v206_v49 }
 0x21b   :  { %v243_v51 = vsel %vm183_vm8, %v241_v50, -inf }
 0x21c   :  { %244 = vmax.xlane.f32.xlu2 %v243_v51 }
 0x21e   :  { %v232_v53 = vpop.f32.mrf.mxu0 }
 0x21f   :  { %v233_v54 = vadd.f32 %v232_v53, %v172_v46 }
 0x221   :  { %v242_v55 = vadd.f32 %v3743_v52, %v233_v54 }
 0x223   :  { %v246_v56 = vsel %vm183_vm8, %v242_v55, -inf }
 0x224   :  { %247 = vmax.xlane.f32.xlu2 %v246_v56 }
 0x23c   :  { %291 = vrot.lane.b32.xlu2 %v3716_v42, %s3521_s6 }
 0x244   :  { %374 = vrot.lane.b32.xlu2 %v3716_v42, %s3522_s11 }
 0x24c   :  { %404 = vrot.lane.b32.xlu2 %v3720_v43, %s3523_s2 }
 0x254   :  { %565 = vrot.lane.b32.xlu2 %v3716_v42, %s4549_s3 }
 0x28f   :  { %v245_v57 = vpop.xlane.xlu2 %244 }
 0x290   :  { %v249_v58 = vsub.f32 %v241_v50, %v245_v57 }
 0x292   :  { %v251_v60 = vmul.f32 1.442695, %v249_v58 }
 0x294   :  { %3327 = vpow2.f32 %v251_v60 }
 0x297   :  { %v248_v61 = vpop.xlane.xlu2 %247 }
 0x298   :  { %v250_v62 = vsub.f32 %v242_v55, %v248_v61 }
 0x29a   :  { %v3328_v63 = vpop.eup %3327  ;;  %v253_v2 = vmul.f32 1.442695, %v250_v62 }
 0x29b   :  { %v255_v3 = vsel %vm183_vm8, %v3328_v63, 0.0 }
 0x29c   :  { %3329 = vpow2.f32 %v253_v2  ;;  %256 = vadd.xlane.f32.xlu0 %v255_v3  ;;  %v3795_v2 = vld [vmem:[%s4570_s5 + $0x10] sm:$0xff] }
 0x29f   :  { %v292_v4 = vpop.permute.xlu2 %291 }
 0x2a0   :  { %312 = vmatpush.msra.mxu3 %v292_v4 }
 0x2a2   :  { %v3330_v5 = vpop.eup %3329 }
 0x2a3   :  { %v258_v6 = vsel %vm183_vm8, %v3330_v5, 0.0 }
 0x2a4   :  { %259 = vadd.xlane.f32.xlu1 %v258_v6 }
 0x2a7   :  { %v375_v7 = vpop.permute.xlu2 %374 }
 0x2af   :  { %v405_v8 = vpop.permute.xlu2 %404 }
 0x2b0   :  { %376 = vrot.lane.b32.xlu0 %v3716_v42, %s3523_s2 }
 0x2b7   :  { %v566_v9 = vpop.permute.xlu2 %565 }
 0x2b8   :  { %317 = vrot.lane.b32.xlu0 %v3720_v43, %s3521_s6  ;;  %3192 = vmatpush.xpose.msk.msra.mxu1 %vm183_vm8, %v566_v9 }
 0x2bd   :  { %563 = vrot.lane.b32.xlu1 %v3716_v42, %s4543_s9 }
 0x2c0   :  { %402 = vrot.lane.b32.xlu0 %v3720_v43, %s3522_s11 }
 0x30f   :  { %v257_v10 = vpop.xlane.xlu0 %256 }
 0x310   :  { %3331 = vrcp.f32 %v257_v10  ;;  %v272_v15 = vand.u32 2147483648, %v257_v10  ;;  %v270_v18 = vand.u32 2147483647, %v257_v10  ;;  %vm266_vm10 = vweird.f32 %v257_v10 }
 0x312   :  { %v273_v21 = vor.u32 1.1754944e-38, %v272_v15  ;;  %vm271_vm12 = vcmp.eq.f32.partialorder %v270_v18, 8.507059e+37 }
 0x316   :  { %v3332_v11 = vpop.eup %3331 }
 0x317   :  { %v262_v12 = vmul.f32 %v3332_v11, %v257_v10  ;;  %v260_v13 = vpop.xlane.xlu1 %259  ;;  %vm267_vm9 = vweird.f32 %v3332_v11 }
 0x318   :  { %3333 = vrcp.f32 %v260_v13  ;;  %vm268_vm11 = vmor %vm266_vm10, %vm267_vm9  ;;  %v287_v27 = vand.u32 2147483648, %v260_v13  ;;  %v285_v30 = vand.u32 2147483647, %v260_v13  ;;  %vm281_vm14 = vweird.f32 %v260_v13 }
 0x319   :  { %v263_v14 = vsub.f32 1.0, %v262_v12 }
 0x31a   :  { %v288_v32 = vor.u32 1.1754944e-38, %v287_v27  ;;  %vm286_vm1 = vcmp.eq.f32.partialorder %v285_v30, 8.507059e+37 }
 0x31b   :  { %v264_v17 = vmul.f32 %v3332_v11, %v263_v14 }
 0x31d   :  { %v265_v19 = vadd.f32 %v3332_v11, %v264_v17 }
 0x31e   :  { %v3334_v20 = vpop.eup %3333 }
 0x31f   :  { %v277_v22 = vmul.f32 %v3334_v20, %v260_v13  ;;  %v269_v23 = vsel %vm268_vm11, %v3332_v11, %v265_v19  ;;  %vm282_vm13 = vweird.f32 %v3334_v20 }
 0x320   :  { %v274_v24 = vsel %vm271_vm12, %v273_v21, %v269_v23  ;;  %vm283_vm15 = vmor %vm281_vm14, %vm282_vm13 }
 0x321   :  { %v278_v25 = vsub.f32 1.0, %v277_v22  ;;  %v275_v26 = vmul.f32 %v3328_v63, %v274_v24 }
 0x322   :  { %v377_v28 = vpop.permute.xlu0 %376 }
 0x323   :  { %v279_v29 = vmul.f32 %v3334_v20, %v278_v25  ;;  %3180 = vmatmul.msk.f32.vlgmr.msra.gmra.mxu3 %vm183_vm8, %v275_v26  ;;  %3184 = vmatpush.xpose.msk.msra.mxu2 %vm183_vm8, %v377_v28 }
 0x325   :  { %v280_v31 = vadd.f32 %v3334_v20, %v279_v29 }
 0x326   :  { %3185 = vmatmul.msk.f32.vlgmr.msra.gmra.mxu2 %vm183_vm8, %v375_v7 }
 0x327   :  { %v284_v33 = vsel %vm283_vm15, %v3334_v20, %v280_v31 }
 0x328   :  { %v289_v34 = vsel %vm286_vm1, %v288_v32, %v284_v33 }
 0x329   :  { %v290_v35 = vmul.f32 %v3330_v5, %v289_v34 }
 0x32a   :  { %v318_v36 = vpop.permute.xlu0 %317 }
 0x32b   :  { %338 = vmatpush.msrb.mxu3 %v318_v36 }
 0x32c   :  { %3181 = vmatmul.msk.f32.vlgmr.msrb.gmra.mxu3 %vm183_vm8, %v290_v35  ;;  %v177_v35 = vld [vmem:[%s4572_s30 + $0x8] sm:$0xff] }
 0x32d   :  { %3186 = vmatpush.xpose.msk.msra.mxu3 %vm183_vm8, %v405_v8 }
 0x32f   :  { %v564_v48 = vpop.permute.xlu1 %563 }
 0x331   :  { %553 = vmatpush.msrb.mxu3 %v177_v35 }
 0x332   :  { %v403_v37 = vpop.permute.xlu0 %402 }
 0x334   :  { %3187 = vmatmul.msk.f32.vlgmr.msra.gmra.mxu3 %vm183_vm8, %v403_v37 }
 0x3a6   :  { %v314_v38 = vpop.f32.mrf.mxu3 }
 0x3a7   :  { %3182 = vmatmul.msk.f32.vlgmr.msrb.gmra.mxu1 %vm183_vm8, %v314_v38 }
 0x3a9   :  { %v399_v40 = vpop.f32.mrf.mxu2 }
 0x3aa   :  { %v400_v41 = vadd.f32 %v399_v40, %v173_v39 }
 0x3ac   :  { %v430_v44 = vadd.f32 %v3736_v47, %v400_v41 }
 0x3ae   :  { %v432_v45 = vsel %vm183_vm8, %v430_v44, -inf }
 0x3af   :  { %v340_v46 = vpop.f32.mrf.mxu3  ;;  %433 = vmax.xlane.f32.xlu0 %v432_v45 }
 0x3b0   :  { %3183 = vmatmul.msk.f32.gmra.mxu1 %vm183_vm8, %v340_v46 }
 0x3b7   :  { %v427_v49 = vpop.f32.mrf.mxu3 }
 0x3b8   :  { %v428_v50 = vadd.f32 %v427_v49, %v173_v39  ;;  %3193 = vmatmul.msk.f32.vlgmr.msra.gmra.mxu1 %vm183_vm8, %v564_v48 }
 0x3ba   :  { %v431_v51 = vadd.f32 %v3743_v52, %v428_v50 }
 0x3bc   :  { %v435_v53 = vsel %vm183_vm8, %v431_v51, -inf }
 0x3bd   :  { %436 = vmax.xlane.f32.xlu2 %v435_v53 }
 0x3d5   :  { %480 = vrot.lane.b32.xlu2 %v3716_v42, %s4551_s29 }
 0x422   :  { %v434_v54 = vpop.xlane.xlu0 %433 }
 0x423   :  { %v438_v55 = vsub.f32 %v430_v44, %v434_v54 }
 0x424   :  { %v3787_v56 = vpop.f32.mrf.mxu1 }
 0x425   :  { %v440_v57 = vmul.f32 1.442695, %v438_v55 }
 0x427   :  { %3335 = vpow2.f32 %v440_v57 }
 0x42d   :  { %v3336_v58 = vpop.eup %3335  ;;  %v3789_v59 = vpop.f32.mrf.mxu1 }
 0x42e   :  { %v444_v60 = vsel %vm183_vm8, %v3336_v58, 0.0 }
 0x42f   :  { %445 = vadd.xlane.f32.xlu1 %v444_v60 }
 0x430   :  { %v437_v61 = vpop.xlane.xlu2 %436 }
 0x431   :  { %v439_v62 = vsub.f32 %v431_v51, %v437_v61 }
 0x433   :  { %v442_v63 = vmul.f32 1.442695, %v439_v62 }
 0x435   :  { %3337 = vpow2.f32 %v442_v63  ;;  %v588_v3 = vpop.f32.mrf.mxu1 }
 0x436   :  { %v589_v4 = vadd.f32 %v588_v3, %v3795_v2 }
 0x438   :  { %v481_v5 = vpop.permute.xlu2 %480  ;;  %v619_v6 = vadd.f32 %v3736_v47, %v589_v4 }
 0x439   :  { %501 = vmatpush.msrb.mxu2 %v481_v5 }
 0x43a   :  { %v621_v7 = vsel %vm183_vm8, %v619_v6, -inf }
 0x43b   :  { %v3338_v8 = vpop.eup %3337  ;;  %622 = vmax.xlane.f32.xlu1 %v621_v7 }
 0x43c   :  { %v447_v9 = vsel %vm183_vm8, %v3338_v8, 0.0 }
 0x43d   :  { %448 = vadd.xlane.f32.xlu0 %v447_v9 }
 0x451   :  { %506 = vrot.lane.b32.xlu0 %v3720_v43, %s4551_s29  ;;  %s4574_s29 = sld [smem:[#allocation19_spill]] }
 0x454   :  { %591 = vrot.lane.b32.xlu1 %v3720_v43, %s4543_s9  ;;  %s4579_s9 = smov 80  }
 0x459   :  { %593 = vrot.lane.b32.xlu0 %v3720_v43, %s4549_s3  ;;  %s4577_s3 = sld [smem:[#allocation11_spill]] }
 0x45c   :  { %752 = vrot.lane.b32.xlu1 %v3716_v42, %s4539_s4 }
 0x461   :  { %669 = vrot.lane.b32.xlu0 %v3716_v42, %s4547_s28 }
 0x469   :  { %754 = vrot.lane.b32.xlu0 %v3716_v42, %s4541_s0 }
 0x471   :  { %782 = vrot.lane.b32.xlu0 %v3720_v43, %s4541_s0  ;;  %s4580_s0 = smov 112  }
 0x479   :  { %780 = vrot.lane.b32.xlu0 %v3720_v43, %s4539_s4  ;;  %s4573_s4 = sld [smem:[#allocation9_spill]] }
 0x4a2   :  { %v446_v10 = vpop.xlane.xlu1 %445 }
 0x4a3   :  { %3339 = vrcp.f32 %v446_v10  ;;  %v461_v14 = vand.u32 2147483648, %v446_v10  ;;  %v459_v17 = vand.u32 2147483647, %v446_v10  ;;  %vm455_vm3 = vweird.f32 %v446_v10 }
 0x4a5   :  { %v462_v22 = vor.u32 1.1754944e-38, %v461_v14  ;;  %vm460_vm5 = vcmp.eq.f32.partialorder %v459_v17, 8.507059e+37  ;;  %v373_v17 = vadd.f32 %v3789_v59, %v3685_v1 }
 0x4a9   :  { %v3340_v11 = vpop.eup %3339 }
 0x4aa   :  { %v451_v12 = vmul.f32 %v3340_v11, %v446_v10  ;;  %vm456_vm2 = vweird.f32 %v3340_v11 }
 0x4ab   :  { %vm457_vm4 = vmor %vm455_vm3, %vm456_vm2 }
 0x4ac   :  { %v452_v13 = vsub.f32 1.0, %v451_v12  ;;  %v178_v12 = vld [vmem:[%s4572_s30 + $0x10] sm:$0xff] }
 0x4ae   :  { %v453_v15 = vmul.f32 %v3340_v11, %v452_v13  ;;  %v623_v18 = vpop.xlane.xlu1 %622  ;;  %v372_v13 = vadd.f32 %v3787_v56, %v3680_v0 }
 0x4af   :  { %v627_v19 = vsub.f32 %v619_v6, %v623_v18 }
 0x4b0   :  { %v454_v20 = vadd.f32 %v3340_v11, %v453_v15  ;;  %v449_v21 = vpop.xlane.xlu0 %448 }
 0x4b1   :  { %v629_v23 = vmul.f32 1.442695, %v627_v19  ;;  %3341 = vrcp.f32 %v449_v21  ;;  %v476_v32 = vand.u32 2147483648, %v449_v21  ;;  %v474_v34 = vand.u32 2147483647, %v449_v21 }
 0x4b2   :  { %v458_v24 = vsel %vm457_vm4, %v3340_v11, %v454_v20  ;;  %vm470_vm7 = vweird.f32 %v449_v21 }
 0x4b3   :  { %3343 = vpow2.f32 %v629_v23  ;;  %v463_v25 = vsel %vm460_vm5, %v462_v22, %v458_v24  ;;  %v477_v37 = vor.u32 1.1754944e-38, %v476_v32  ;;  %vm475_vm10 = vcmp.eq.f32.partialorder %v474_v34, 8.507059e+37 }
 0x4b4   :  { %v464_v26 = vmul.f32 %v3336_v58, %v463_v25 }
 0x4b6   :  { %3188 = vmatmul.msk.f32.vlgmr.msrb.gmra.mxu2 %vm183_vm8, %v464_v26 }
 0x4b7   :  { %v3342_v27 = vpop.eup %3341 }
 0x4b8   :  { %v466_v28 = vmul.f32 %v3342_v27, %v449_v21  ;;  %vm471_vm6 = vweird.f32 %v3342_v27 }
 0x4b9   :  { %v3344_v29 = vpop.eup %3343  ;;  %vm472_vm9 = vmor %vm470_vm7, %vm471_vm6 }
 0x4ba   :  { %v467_v30 = vsub.f32 1.0, %v466_v28  ;;  %v633_v31 = vsel %vm183_vm8, %v3344_v29, 0.0 }
 0x4bb   :  { %634 = vadd.xlane.f32.xlu2 %v633_v31 }
 0x4bc   :  { %v468_v33 = vmul.f32 %v3342_v27, %v467_v30 }
 0x4be   :  { %v469_v36 = vadd.f32 %v3342_v27, %v468_v33 }
 0x4c0   :  { %v473_v38 = vsel %vm472_vm9, %v3342_v27, %v469_v36 }
 0x4c1   :  { %v478_v39 = vsel %vm475_vm10, %v477_v37, %v473_v38 }
 0x4c2   :  { %v479_v40 = vmul.f32 %v3338_v8, %v478_v39  ;;  %v3875_v39 = vld [vmem:[%s4573_s4] sm:$0xff] }
 0x4c3   :  { %v507_v41 = vpop.permute.xlu0 %506 }
 0x4c4   :  { %527 = vmatpush.msra.mxu0 %v507_v41 }
 0x4c5   :  { %3189 = vmatmul.msk.f32.vlgmr.msra.gmra.mxu0 %vm183_vm8, %v479_v40  ;;  %v1099_v40 = vmul.f32 %v3875_v39, %v3875_v39 }
 0x4c6   :  { %v592_v45 = vpop.permute.xlu1 %591 }
 0x4c7   :  { %v1101_v41 = vsel %vm94_vm0, %v1099_v40, 0.0 }
 0x4cb   :  { %v594_v44 = vpop.permute.xlu0 %593 }
 0x4cc   :  { %3194 = vmatpush.xpose.msk.msra.mxu2 %vm183_vm8, %v594_v44 }
 0x4ce   :  { %v753_v6 = vpop.permute.xlu1 %752 }
 0x4cf   :  { %3195 = vmatmul.msk.f32.vlgmr.msra.gmra.mxu2 %vm183_vm8, %v592_v45 }
 0x4d0   :  { %742 = vmatpush.msrb.mxu2 %v178_v12 }
 0x4d3   :  { %v670_v46 = vpop.permute.xlu0 %669 }
 0x4d4   :  { %690 = vmatpush.msrb.mxu0 %v670_v46 }
 0x4db   :  { %v755_v48 = vpop.permute.xlu0 %754 }
 0x4dc   :  { %3200 = vmatpush.xpose.msk.msra.mxu0 %vm183_vm8, %v755_v48 }
 0x4e3   :  { %v783_v49 = vpop.permute.xlu0 %782 }
 0x4e4   :  { %3202 = vmatpush.xpose.msk.msra.mxu3 %vm183_vm8, %v783_v49 }
 0x4eb   :  { %v781_v7 = vpop.permute.xlu0 %780 }
 0x52e   :  { %v635_v50 = vpop.xlane.xlu2 %634 }
 0x52f   :  { %3345 = vrcp.f32 %v635_v50  ;;  %v650_v55 = vand.u32 2147483648, %v635_v50  ;;  %v648_v60 = vand.u32 2147483647, %v635_v50  ;;  %vm644_vm12 = vweird.f32 %v635_v50 }
 0x531   :  { %v651_v62 = vor.u32 1.1754944e-38, %v650_v55  ;;  %vm649_vm14 = vcmp.eq.f32.partialorder %v648_v60, 8.507059e+37 }
 0x535   :  { %v3346_v51 = vpop.eup %3345 }
 0x536   :  { %v640_v53 = vmul.f32 %v3346_v51, %v635_v50  ;;  %vm645_vm11 = vweird.f32 %v3346_v51 }
 0x537   :  { %vm646_vm13 = vmor %vm644_vm12, %vm645_vm11 }
 0x538   :  { %v641_v54 = vsub.f32 1.0, %v640_v53 }
 0x539   :  { %v503_v57 = vpop.f32.mrf.mxu2 }
 0x53a   :  { %v642_v58 = vmul.f32 %v3346_v51, %v641_v54  ;;  %3190 = vmatmul.msk.f32.vlgmr.msrb.gmra.mxu3 %vm183_vm8, %v503_v57 }
 0x53c   :  { %v643_v61 = vadd.f32 %v3346_v51, %v642_v58 }
 0x53e   :  { %v647_v63 = vsel %vm646_vm13, %v3346_v51, %v643_v61 }
 0x53f   :  { %v652_v3 = vsel %vm649_vm14, %v651_v62, %v647_v63 }
 0x540   :  { %v653_v4 = vmul.f32 %v3344_v29, %v652_v3 }
 0x542   :  { %v529_v5 = vpop.f32.mrf.mxu0  ;;  %3196 = vmatmul.msk.f32.vlgmr.msrb.gmra.mxu0 %vm183_vm8, %v653_v4 }
 0x543   :  { %3191 = vmatmul.msk.f32.gmra.mxu3 %vm183_vm8, %v529_v5 }
 0x54a   :  { %3201 = vmatmul.msk.f32.vlgmr.msra.gmra.mxu0 %vm183_vm8, %v753_v6 }
 0x54b   :  { %3203 = vmatmul.msk.f32.vlgmr.msra.gmra.mxu3 %vm183_vm8, %v781_v7 }
 0x552   :  { %v616_v8 = vpop.f32.mrf.mxu2 }
 0x553   :  { %v617_v9 = vadd.f32 %v616_v8, %v3795_v2 }
 0x555   :  { %v620_v10 = vadd.f32 %v3743_v52, %v617_v9 }
 0x557   :  { %v624_v11 = vsel %vm183_vm8, %v620_v10, -inf }
 0x558   :  { %625 = vmax.xlane.f32.xlu1 %v624_v11 }
 0x571   :  { %858 = vrot.lane.b32.xlu1 %v3716_v42, %s4545_s1  ;;  %v175_v42 = vld [vmem:[%s4570_s5 + $0x18] sm:$0xff]  ;;  %s4576_s5 = sld [smem:[#allocation13_spill]] }
 0x5bd   :  { %v555_v14 = vpop.f32.mrf.mxu3 }
 0x5be   :  { %v3842_v15 = vadd.f32 %v555_v14, %v372_v13 }
 0x5bf   :  { %v692_v2 = vpop.f32.mrf.mxu0 }
 0x5c0   :  { %3198 = vmatmul.msk.f32.vlgmr.msrb.gmra.mxu2 %vm183_vm8, %v692_v2 }
 0x5c6   :  { %v558_v18 = vpop.f32.mrf.mxu3 }
 0x5c7   :  { %v3850_v19 = vadd.f32 %v558_v18, %v373_v17  ;;  %v777_v20 = vpop.f32.mrf.mxu0 }
 0x5c8   :  { %v778_v21 = vadd.f32 %v777_v20, %v175_v42 }
 0x5ca   :  { %v808_v0 = vadd.f32 %v3736_v47, %v778_v21 }
 0x5cb   :  { %v626_v56 = vpop.xlane.xlu1 %625 }
 0x5cc   :  { %v628_v22 = vsub.f32 %v620_v10, %v626_v56  ;;  %v810_v23 = vsel %vm183_vm8, %v808_v0, -inf }
 0x5cd   :  { %811 = vmax.xlane.f32.xlu0 %v810_v23 }
 0x5ce   :  { %v631_v24 = vmul.f32 1.442695, %v628_v22  ;;  %v805_v25 = vpop.f32.mrf.mxu3 }
 0x5cf   :  { %v806_v59 = vadd.f32 %v805_v25, %v175_v42  ;;  %v1141_v25 = vld [vmem:[%s4516_s15 + $0x18] sm:$0xff] }
 0x5d0   :  { %3347 = vpow2.f32 %v631_v24 }
 0x5d1   :  { %v809_v27 = vadd.f32 %v3743_v52, %v806_v59  ;;  %v1139_v59 = vld [vmem:[%s4516_s15 + $0x8] sm:$0xff] }
 0x5d3   :  { %v813_v28 = vsel %vm183_vm8, %v809_v27, -inf }
 0x5d6   :  { %v3854_v1 = vpop.eup %3347 }
 0x5d7   :  { %v636_v26 = vsel %vm183_vm8, %v3854_v1, 0.0 }
 0x5d8   :  { %637 = vadd.xlane.f32.xlu2 %v636_v26  ;;  %v1138_v26 = vld [vmem:[%s4516_s15] sm:$0xff] }
 0x5e0   :  { %814 = vmax.xlane.f32.xlu2 %v813_v28 }
 0x5e1   :  { %884 = vrot.lane.b32.xlu0 %v3720_v43, %s4545_s1 }
 0x5e3   :  { %v859_v12 = vpop.permute.xlu1 %858 }
 0x640   :  { %v812_v47 = vpop.xlane.xlu0 %811 }
 0x641   :  { %v816_v29 = vsub.f32 %v808_v0, %v812_v47 }
 0x643   :  { %v818_v30 = vmul.f32 1.442695, %v816_v29 }
 0x645   :  { %3349 = vpow2.f32 %v818_v30 }
 0x64b   :  { %v3862_v31 = vpop.eup %3349  ;;  %v638_v32 = vpop.xlane.xlu2 %637 }
 0x64c   :  { %v822_v33 = vsel %vm183_vm8, %v3862_v31, 0.0  ;;  %v665_v58 = vand.u32 2147483648, %v638_v32  ;;  %vm659_vm1 = vweird.f32 %v638_v32  ;;  %v663_v60 = vand.u32 2147483647, %v638_v32 }
 0x64d   :  { %823 = vadd.xlane.f32.xlu2 %v822_v33 }
 0x64e   :  { %v666_v3 = vor.u32 1.1754944e-38, %v665_v58  ;;  %vm664_vm3 = vcmp.eq.f32.partialorder %v663_v60, 8.507059e+37 }
 0x653   :  { %v885_v34 = vpop.permute.xlu0 %884  ;;  %v815_v35 = vpop.xlane.xlu2 %814 }
 0x654   :  { %v817_v52 = vsub.f32 %v809_v27, %v815_v35  ;;  %905 = vmatpush.msrb.mxu0 %v885_v34  ;;  %v3315_v35 = vld [vmem:[%s4515_s14] ss:$0 sm:$0xff]  ;;  %s4575_s14 = sld [smem:[#allocation18_spill]] }
 0x656   :  { %v820_v36 = vmul.f32 1.442695, %v817_v52  ;;  %1160 = vmatpush.msra.mxu0 %v1141_v25 }
 0x658   :  { %3351 = vpow2.f32 %v820_v36 }
 0x659   :  { %3353 = vrcp.f32 %v638_v32 }
 0x65e   :  { %v3866_v37 = vpop.eup %3351 }
 0x65f   :  { %v825_v38 = vsel %vm183_vm8, %v3866_v37, 0.0  ;;  %v3354_v45 = vpop.eup %3353 }
 0x660   :  { %826 = vadd.xlane.f32.xlu2 %v825_v38  ;;  %v655_v46 = vmul.f32 %v3354_v45, %v638_v32  ;;  %vm660_vm15 = vweird.f32 %v3354_v45  ;;  %v179_v38 = vld [vmem:[%s4572_s30 + $0x18] sm:$0xff]  ;;  %s4582_s30 = smov 104  }
 0x661   :  { %vm661_vm2 = vmor %vm659_vm1, %vm660_vm15  ;;  %931 = vmatpush.msrb.mxu3 %v179_v38 }
 0x662   :  { %v656_v49 = vsub.f32 1.0, %v655_v46 }
 0x664   :  { %v657_v53 = vmul.f32 %v3354_v45, %v656_v49 }
 0x666   :  { %v658_v55 = vadd.f32 %v3354_v45, %v657_v53 }
 0x668   :  { %v662_v62 = vsel %vm661_vm2, %v3354_v45, %v658_v55 }
 0x669   :  { %v667_v4 = vsel %vm664_vm3, %v666_v3, %v662_v62 }
 0x66a   :  { %v668_v11 = vmul.f32 %v3854_v1, %v667_v4  ;;  %v1140_v1 = vld [vmem:[%s4516_s15 + $0x10] sm:$0xff] }
 0x66b   :  { %1161 = vmatpush.msra.mxu0 %v1140_v1 }
 0x66d   :  { %1162 = vmatpush.msra.mxu0 %v1139_v59 }
 0x66f   :  { %1163 = vmatpush.msra.mxu0 %v1138_v26 }
 0x678   :  { %695 = vrot.lane.b32.xlu2 %v3720_v43, %s4547_s28  ;;  %v3883_v43 = vld [vmem:[%s4573_s4 + $0x8] sm:$0xff]  ;;  %s4584_s28 = smov 40  }
 0x679   :  { %v1100_v48 = vmul.f32 %v3883_v43, %v3883_v43 }
 0x67b   :  { %v1104_v51 = vsel %vm94_vm0, %v1100_v48, 0.0 }
 0x67c   :  { %1105 = vadd.xlane.f32.xlu0 %v1104_v51 }
 0x6a1   :  { %1102 = vadd.xlane.f32.xlu2 %v1101_v41 }
 0x6c0   :  { %v824_v44 = vpop.xlane.xlu2 %823 }
 0x6c1   :  { %3355 = vrcp.f32 %v824_v44  ;;  %v839_v7 = vand.u32 2147483648, %v824_v44  ;;  %vm833_vm5 = vweird.f32 %v824_v44  ;;  %v837_v8 = vand.u32 2147483647, %v824_v44 }
 0x6c3   :  { %v840_v2 = vor.u32 1.1754944e-38, %v839_v7  ;;  %vm838_vm7 = vcmp.eq.f32.partialorder %v837_v8, 8.507059e+37 }
 0x6c7   :  { %v3356_v50 = vpop.eup %3355 }
 0x6c8   :  { %v829_v54 = vmul.f32 %v3356_v50, %v824_v44  ;;  %vm834_vm4 = vweird.f32 %v3356_v50 }
 0x6c9   :  { %vm835_vm6 = vmor %vm833_vm5, %vm834_vm4 }
 0x6ca   :  { %v830_v57 = vsub.f32 1.0, %v829_v54 }
 0x6cc   :  { %v831_v63 = vmul.f32 %v3356_v50, %v830_v57 }
 0x6ce   :  { %v832_v5 = vadd.f32 %v3356_v50, %v831_v63 }
 0x6d0   :  { %v836_v13 = vsel %vm835_vm6, %v3356_v50, %v832_v5 }
 0x6d1   :  { %v841_v20 = vsel %vm838_vm7, %v840_v2, %v836_v13  ;;  %v983_v13 = vld [vmem:[%s4574_s29 + $0x10] sm:$0xff]  ;;  %v981_v2 = vld [vmem:[%s4574_s29] sm:$0xff] }
 0x6d2   :  { %v842_v22 = vmul.f32 %v3862_v31, %v841_v20 }
 0x6d3   :  { %v827_v61 = vpop.xlane.xlu2 %826 }
 0x6d4   :  { %3357 = vrcp.f32 %v827_v61  ;;  %v854_v17 = vand.u32 2147483648, %v827_v61  ;;  %v852_v18 = vand.u32 2147483647, %v827_v61  ;;  %vm848_vm10 = vweird.f32 %v827_v61 }
 0x6d6   :  { %v855_v0 = vor.u32 1.1754944e-38, %v854_v17  ;;  %vm853_vm12 = vcmp.eq.f32.partialorder %v852_v18, 8.507059e+37 }
 0x6da   :  { %v3358_v6 = vpop.eup %3357 }
 0x6db   :  { %v844_v9 = vmul.f32 %v3358_v6, %v827_v61  ;;  %v696_v10 = vpop.permute.xlu2 %695  ;;  %vm849_vm9 = vweird.f32 %v3358_v6 }
 0x6dc   :  { %716 = vmatpush.msrb.mxu1 %v696_v10  ;;  %vm850_vm11 = vmor %vm848_vm10, %vm849_vm9 }
 0x6dd   :  { %v845_v14 = vsub.f32 1.0, %v844_v9  ;;  %3197 = vmatmul.msk.f32.vlgmr.msrb.gmra.mxu1 %vm183_vm8, %v668_v11 }
 0x6de   :  { %879 = vmatpush.msra.mxu1 %v859_v12  ;;  %v984_v12 = vld [vmem:[%s4574_s29 + $0x18] sm:$0xff] }
 0x6df   :  { %v846_v42 = vmul.f32 %v3358_v6, %v845_v14  ;;  %v982_v14 = vld [vmem:[%s4574_s29 + $0x8] sm:$0xff] }
 0x6e0   :  { %1003 = vmatpush.msrb.mxu1 %v984_v12 }
 0x6e1   :  { %v847_v21 = vadd.f32 %v3358_v6, %v846_v42 }
 0x6e2   :  { %1004 = vmatpush.msrb.mxu1 %v983_v13 }
 0x6e3   :  { %v851_v56 = vsel %vm850_vm11, %v3358_v6, %v847_v21  ;;  %vm1024_vm11 = vcmask 523264  }
 0x6e4   :  { %v856_v23 = vsel %vm853_vm12, %v855_v0, %v851_v56  ;;  %1005 = vmatpush.msrb.mxu1 %v982_v14 }
 0x6e5   :  { %3204 = vmatmul.msk.f32.vlgmr.msra.gmra.mxu1 %vm183_vm8, %v842_v22  ;;  %v857_v24 = vmul.f32 %v3866_v37, %v856_v23 }
 0x6e6   :  { %1006 = vmatpush.msrb.mxu1 %v981_v2 }
 0x6e7   :  { %3205 = vmatmul.msk.f32.vlgmr.msrb.gmra.mxu0 %vm183_vm8, %v857_v24 }
 0x6ef   :  { %v1106_v40 = vpop.xlane.xlu0 %1105 }
 0x6f0   :  { %v1108_v41 = vmul.f32 %v1106_v40, %v3705_v16  ;;  %v1171_v40 = vld [vmem:[%s4576_s5] sm:$0xff] }
 0x6f2   :  { %v1110_v44 = vadd.f32 1e-06, %v1108_v41  ;;  %v1023_v41 = vld [vmem:[%s4513_s12 + $0x38] sm:$0xff] }
 0x6f3   :  { %1039 = vmatpush.msra.mxu2 %v1023_v41 }
 0x6f4   :  { %vm1127_vm1 = vweird.f32 %v1110_v44 }
 0x714   :  { %v1103_v27 = vpop.xlane.xlu2 %1102 }
 0x715   :  { %v1107_v28 = vmul.f32 %v1103_v27, %v3705_v16 }
 0x717   :  { %v1109_v47 = vadd.f32 1e-06, %v1107_v28  ;;  %v3316_v28 = vld [vmem:[%s4575_s14] ss:$0 sm:$0xff] }
 0x719   :  { %3359 = vrsqrt.f32 %v1109_v47  ;;  %vm1117_vm13 = vweird.f32 %v1109_v47 }
 0x71a   :  { %3361 = vrsqrt.f32 %v1110_v44 }
 0x71f   :  { %v3360_v29 = vpop.eup %3359 }
 0x720   :  { %v1112_v30 = vmul.f32 %v3360_v29, %v1109_v47  ;;  %vm1118_vm14 = vweird.f32 %v3360_v29  ;;  %v3362_v45 = vpop.eup %3361 }
 0x721   :  { %vm1119_vm15 = vmor %vm1117_vm13, %vm1118_vm14  ;;  %v1122_v46 = vmul.f32 %v3362_v45, %v1110_v44  ;;  %vm1128_vm2 = vweird.f32 %v3362_v45  ;;  %v1022_v44 = vld [vmem:[%s4513_s12 + $0x30] sm:$0xff] }
 0x722   :  { %v1113_v31 = vmul.f32 %v3360_v29, %v1112_v30  ;;  %vm1129_vm3 = vmor %vm1127_vm1, %vm1128_vm2  ;;  %1040 = vmatpush.msra.mxu2 %v1022_v44 }
 0x723   :  { %v1123_v48 = vmul.f32 %v3362_v45, %v1122_v46  ;;  %v3988_v46 = vld [vmem:[%s4577_s3] sm:$0xff] }
 0x724   :  { %v1114_v32 = vmul.f32 0.5, %v1113_v31 }
 0x725   :  { %v1124_v49 = vmul.f32 0.5, %v1123_v48  ;;  %v1021_v48 = vld [vmem:[%s4513_s12 + $0x28] sm:$0xff] }
 0x726   :  { %v1115_v33 = vsub.f32 1.5, %v1114_v32  ;;  %1041 = vmatpush.msra.mxu2 %v1021_v48 }
 0x728   :  { %v1116_v34 = vmul.f32 %v3360_v29, %v1115_v33 }
 0x72a   :  { %v1120_v52 = vsel %vm1119_vm15, %v3360_v29, %v1116_v34 }
 0x72b   :  { %v1131_v36 = vmul.f32 %v1120_v52, %v3875_v39  ;;  %v1125_v39 = vsub.f32 1.5, %v1124_v49 }
 0x72d   :  { %v1136_v37 = vmul.f32 %v3315_v35, %v1131_v36  ;;  %v1126_v50 = vmul.f32 %v3362_v45, %v1125_v39  ;;  %v1020_v39 = vld [vmem:[%s4513_s12 + $0x20] sm:$0xff] }
 0x72e   :  { %1042 = vmatpush.msra.mxu2 %v1020_v39 }
 0x72f   :  { %3212 = vmatmul.msk.f32.vlgmr.msra.gmra.mxu0 %vm94_vm0, %v1136_v37  ;;  %v1130_v53 = vsel %vm1129_vm3, %v3362_v45, %v1126_v50 }
 0x730   :  { %v1132_v54 = vmul.f32 %v1130_v53, %v3883_v43  ;;  %v744_v43 = vpop.f32.mrf.mxu2 }
 0x731   :  { %v750_v62 = vadd.f32 %v744_v43, %v3842_v15 }
 0x732   :  { %v1137_v55 = vmul.f32 %v3315_v35, %v1132_v54  ;;  %v1018_v54 = vld [vmem:[%s4513_s12 + $0x10] sm:$0xff] }
 0x737   :  { %3213 = vmatmul.msk.f32.gmra.mxu0 %vm94_vm0, %v1137_v55  ;;  %v1017_v55 = vld [vmem:[%s4513_s12 + $0x8] sm:$0xff] }
 0x75a   :  { %v718_v51 = vpop.f32.mrf.mxu1 }
 0x75b   :  { %3199 = vmatmul.msk.f32.gmra.mxu2 %vm183_vm8, %v718_v51  ;;  %v1019_v51 = vld [vmem:[%s4513_s12 + $0x18] sm:$0xff] }
 0x75c   :  { %1043 = vmatpush.msra.mxu2 %v1019_v51 }
 0x75e   :  { %1044 = vmatpush.msra.mxu2 %v1018_v54 }
 0x760   :  { %1045 = vmatpush.msra.mxu2 %v1017_v55 }
 0x762   :  { %v881_v57 = vpop.f32.mrf.mxu1 }
 0x763   :  { %3206 = vmatmul.msk.f32.vlgmr.msrb.gmra.mxu3 %vm183_vm8, %v881_v57  ;;  %v1016_v57 = vld [vmem:[%s4513_s12] sm:$0xff]  ;;  %s4583_s12 = smov 48  }
 0x764   :  { %v907_v58 = vpop.f32.mrf.mxu0  ;;  %1046 = vmatpush.msra.mxu2 %v1016_v57 }
 0x76b   :  { %3207 = vmatmul.msk.f32.gmra.mxu3 %vm183_vm8, %v907_v58 }
 0x7ac   :  { %v3921_v60 = vpop.f32.mrf.mxu0 }
 0x7ad   :  { %1182 = vrot.lane.b32.xlu0 %v3921_v60, %s4553_s8 }
 0x7b4   :  { %v3927_v61 = vpop.f32.mrf.mxu0 }
 0x7b5   :  { %1368 = vrot.lane.b32.xlu0 %v3921_v60, %s3522_s11 }
 0x7bd   :  { %1311 = vrot.lane.b32.xlu0 %v3927_v61, %s3521_s6 }
 0x7de   :  { %v747_v5 = vpop.f32.mrf.mxu2 }
 0x7df   :  { %v751_v7 = vadd.f32 %v747_v5, %v3850_v19  ;;  %v4017_v5 = vld [vmem:[%s4577_s3 + $0x8] sm:$0xff]  ;;  %s4578_s3 = smov 56  }
 0x7e6   :  { %v933_v63 = vpop.f32.mrf.mxu3 }
 0x7e7   :  { %v3932_v3 = vadd.f32 %v933_v63, %v750_v62 }
 0x7e9   :  { %v942_v4 = vmul.f32 %v3932_v3, %v3932_v3 }
 0x7eb   :  { %v944_v6 = vsel %vm94_vm0, %v942_v4, 0.0 }
 0x7ec   :  { %945 = vadd.xlane.f32.xlu1 %v944_v6 }
 0x7ee   :  { %v936_v8 = vpop.f32.mrf.mxu3 }
 0x7ef   :  { %v3938_v9 = vadd.f32 %v936_v8, %v751_v7 }
 0x7f1   :  { %v943_v10 = vmul.f32 %v3938_v9, %v3938_v9 }
 0x7f3   :  { %v947_v15 = vsel %vm94_vm0, %v943_v10, 0.0  ;;  %v4024_v10 = vld [vmem:[%s4576_s5 + $0x8] sm:$0xff] }
 0x7f4   :  { %948 = vadd.xlane.f32.xlu2 %v947_v15 }
 0x805   :  { %1209 = vrot.lane.b32.xlu1 %v3927_v61, %s4553_s8 }
 0x80c   :  { %1370 = vrot.lane.b32.xlu2 %v3921_v60, %s3523_s2 }
 0x81f   :  { %v1183_v11 = vpop.permute.xlu0 %1182 }
 0x820   :  { %3214 = vmatpush.xpose.msk.msra.mxu3 %vm183_vm8, %v1183_v11 }
 0x823   :  { %3215 = vmatmul.msk.f32.vlgmr.msra.gmra.mxu3 %vm183_vm8, %v3921_v60 }
 0x827   :  { %v1369_v19 = vpop.permute.xlu0 %1368 }
 0x82f   :  { %v1312_v17 = vpop.permute.xlu0 %1311 }
 0x830   :  { %1332 = vmatpush.msrb.mxu0 %v1312_v17 }
 0x85f   :  { %v946_v42 = vpop.xlane.xlu1 %945 }
 0x860   :  { %v950_v18 = vmul.f32 %v946_v42, %v3705_v16 }
 0x862   :  { %v952_v20 = vadd.f32 1e-06, %v950_v18 }
 0x864   :  { %3363 = vrsqrt.f32 %v952_v20  ;;  %vm960_vm5 = vweird.f32 %v952_v20 }
 0x867   :  { %v949_v21 = vpop.xlane.xlu2 %948 }
 0x868   :  { %v951_v0 = vmul.f32 %v949_v21, %v3705_v16 }
 0x86a   :  { %v3364_v56 = vpop.eup %3363  ;;  %v953_v22 = vadd.f32 1e-06, %v951_v0 }
 0x86b   :  { %v955_v23 = vmul.f32 %v3364_v56, %v952_v20  ;;  %vm961_vm4 = vweird.f32 %v3364_v56 }
 0x86c   :  { %3365 = vrsqrt.f32 %v953_v22  ;;  %vm962_vm6 = vmor %vm960_vm5, %vm961_vm4  ;;  %vm970_vm9 = vweird.f32 %v953_v22 }
 0x86d   :  { %v956_v24 = vmul.f32 %v3364_v56, %v955_v23 }
 0x86f   :  { %v957_v25 = vmul.f32 0.5, %v956_v24  ;;  %v1371_v35 = vpop.permute.xlu2 %1370 }
 0x871   :  { %v958_v1 = vsub.f32 1.5, %v957_v25 }
 0x872   :  { %v3366_v59 = vpop.eup %3365 }
 0x873   :  { %v959_v26 = vmul.f32 %v3364_v56, %v958_v1  ;;  %v965_v27 = vmul.f32 %v3366_v59, %v953_v22  ;;  %vm971_vm7 = vweird.f32 %v3366_v59 }
 0x874   :  { %vm972_vm10 = vmor %vm970_vm9, %vm971_vm7 }
 0x875   :  { %v963_v47 = vsel %vm962_vm6, %v3364_v56, %v959_v26  ;;  %v966_v29 = vmul.f32 %v3366_v59, %v965_v27 }
 0x876   :  { %v974_v30 = vmul.f32 %v963_v47, %v3932_v3 }
 0x877   :  { %v967_v31 = vmul.f32 0.5, %v966_v29  ;;  %v1210_v32 = vpop.permute.xlu1 %1209 }
 0x878   :  { %v979_v33 = vmul.f32 %v3316_v28, %v974_v30  ;;  %3216 = vmatpush.xpose.msk.msra.mxu1 %vm183_vm8, %v1210_v32 }
 0x879   :  { %v968_v34 = vsub.f32 1.5, %v967_v31 }
 0x87a   :  { %3208 = vmatmul.msk.f32.vlgmr.msrb.gmra.mxu1 %vm94_vm0, %v979_v33 }
 0x87b   :  { %v969_v52 = vmul.f32 %v3366_v59, %v968_v34 }
 0x87c   :  { %3222 = vmatpush.xpose.msk.msrb.mxu1 %vm183_vm8, %v1371_v35 }
 0x87d   :  { %v973_v36 = vsel %vm972_vm10, %v3366_v59, %v969_v52 }
 0x87e   :  { %v975_v37 = vmul.f32 %v973_v36, %v3938_v9 }
 0x880   :  { %v980_v38 = vmul.f32 %v3316_v28, %v975_v37 }
 0x882   :  { %3209 = vmatmul.msk.f32.gmra.mxu1 %vm94_vm0, %v980_v38 }
 0x88a   :  { %3217 = vmatmul.msk.f32.vlgmr.msra.gmra.mxu1 %vm183_vm8, %v3927_v61 }
 0x892   :  { %3223 = vmatmul.msk.f32.vlgmr.msrb.gmra.mxu1 %vm183_vm8, %v1369_v19 }
 0x8a6   :  { %v1205_v45 = vpop.f32.mrf.mxu3 }
 0x8a7   :  { %v1206_v49 = vadd.f32 %v1205_v45, %v1171_v40 }
 0x8a9   :  { %v1235_v50 = vadd.f32 %v1206_v49, %v3988_v46 }
 0x8ab   :  { %v1237_v53 = vsel %vm183_vm8, %v1235_v50, -inf }
 0x8ac   :  { %1238 = vmax.xlane.f32.xlu2 %v1237_v53 }
 0x8c4   :  { %1285 = vrot.lane.b32.xlu2 %v3921_v60, %s3521_s6  ;;  %s4581_s6 = smov 72  }
 0x8f7   :  { %v1008_v58 = vpop.f32.mrf.mxu1 }
 0x8f8   :  { %v1014_v43 = vmax.f32 %v1008_v58, 0.0 }
 0x8fa   :  { %3210 = vmatmul.msk.f32.vlgmr.msra.gmra.mxu2 %vm1024_vm11, %v1014_v43 }
 0x8ff   :  { %v1011_v62 = vpop.f32.mrf.mxu1 }
 0x900   :  { %v1015_v63 = vmax.f32 %v1011_v62, 0.0 }
 0x902   :  { %3211 = vmatmul.msk.f32.gmra.mxu2 %vm1024_vm11, %v1015_v63 }
 0x907   :  { %v1232_v4 = vpop.f32.mrf.mxu1 }
 0x908   :  { %v1233_v6 = vadd.f32 %v1232_v4, %v1171_v40 }
 0x90a   :  { %v1236_v7 = vadd.f32 %v1233_v6, %v4017_v5 }
 0x90c   :  { %v1240_v8 = vsel %vm183_vm8, %v1236_v7, -inf }
 0x90d   :  { %1241 = vmax.xlane.f32.xlu1 %v1240_v8  ;;  %v1177_v8 = vld [vmem:[%s4517_s16] sm:$0xff] }
 0x90e   :  { %1358 = vmatpush.msrb.mxu3 %v1177_v8 }
 0x90f   :  { %v1393_v15 = vpop.f32.mrf.mxu1 }
 0x910   :  { %v1394_v11 = vadd.f32 %v1393_v15, %v4024_v10 }
 0x912   :  { %v1424_v19 = vadd.f32 %v1394_v11, %v3988_v46 }
 0x914   :  { %v1426_v12 = vsel %vm183_vm8, %v1424_v19, -inf }
 0x915   :  { %1427 = vmax.xlane.f32.xlu0 %v1426_v12 }
 0x91f   :  { %v1239_v13 = vpop.xlane.xlu2 %1238 }
 0x920   :  { %v1243_v14 = vsub.f32 %v1235_v50, %v1239_v13 }
 0x922   :  { %v1245_v2 = vmul.f32 1.442695, %v1243_v14 }
 0x924   :  { %3367 = vpow2.f32 %v1245_v2 }
 0x926   :  { %1398 = vrot.lane.b32.xlu1 %v3927_v61, %s3523_s2 }
 0x927   :  { %v1286_v17 = vpop.permute.xlu2 %1285 }
 0x928   :  { %1306 = vmatpush.msrb.mxu2 %v1286_v17 }
 0x929   :  { %1396 = vrot.lane.b32.xlu0 %v3927_v61, %s3522_s11 }
 0x92a   :  { %v3368_v42 = vpop.eup %3367 }
 0x92b   :  { %v1249_v18 = vsel %vm183_vm8, %v3368_v42, 0.0 }
 0x92c   :  { %1250 = vadd.xlane.f32.xlu2 %v1249_v18 }
 0x944   :  { %1474 = vrot.lane.b32.xlu2 %v3921_v60, %s4578_s3 }
 0x97d   :  { %v4055_v2 = vpop.f32.mrf.mxu2 }
 0x980   :  { %v1242_v20 = vpop.xlane.xlu1 %1241 }
 0x981   :  { %v1244_v21 = vsub.f32 %v1236_v7, %v1242_v20 }
 0x983   :  { %v1247_v0 = vmul.f32 1.442695, %v1244_v21 }
 0x985   :  { %3369 = vpow2.f32 %v1247_v0  ;;  %v4058_v17 = vpop.f32.mrf.mxu2 }
 0x988   :  { %v1428_v56 = vpop.xlane.xlu0 %1427 }
 0x989   :  { %v1432_v22 = vsub.f32 %v1424_v19, %v1428_v56  ;;  %v1178_v56 = vld [vmem:[%s4517_s16 + $0x8] sm:$0xff] }
 0x98b   :  { %v3370_v23 = vpop.eup %3369  ;;  %v1434_v24 = vmul.f32 1.442695, %v1432_v22 }
 0x98c   :  { %v1252_v25 = vsel %vm183_vm8, %v3370_v23, 0.0 }
 0x98d   :  { %3371 = vpow2.f32 %v1434_v24  ;;  %1253 = vadd.xlane.f32.xlu1 %v1252_v25 }
 0x993   :  { %v4037_v1 = vpop.eup %3371 }
 0x994   :  { %v1438_v59 = vsel %vm183_vm8, %v4037_v1, 0.0 }
 0x995   :  { %1439 = vadd.xlane.f32.xlu0 %v1438_v59 }
 0x998   :  { %v1399_v26 = vpop.permute.xlu1 %1398 }
 0x999   :  { %3224 = vmatpush.xpose.msk.msra.mxu2 %vm183_vm8, %v1399_v26 }
 0x99b   :  { %v1397_v38 = vpop.permute.xlu0 %1396 }
 0x99f   :  { %v1251_v27 = vpop.xlane.xlu2 %1250 }
 0x9a0   :  { %3373 = vrcp.f32 %v1251_v27  ;;  %v1266_v31 = vand.u32 2147483648, %v1251_v27  ;;  %v1264_v33 = vand.u32 2147483647, %v1251_v27  ;;  %vm1260_vm13 = vweird.f32 %v1251_v27 }
 0x9a2   :  { %v1267_v35 = vor.u32 1.1754944e-38, %v1266_v31  ;;  %vm1265_vm15 = vcmp.eq.f32.partialorder %v1264_v33, 8.507059e+37 }
 0x9a6   :  { %v3374_v28 = vpop.eup %3373  ;;  %1559 = vrot.lane.b32.xlu1 %v3921_v60, %s4579_s9 }
 0x9a7   :  { %v1256_v47 = vmul.f32 %v3374_v28, %v1251_v27  ;;  %v1475_v29 = vpop.permute.xlu2 %1474  ;;  %vm1261_vm12 = vweird.f32 %v3374_v28 }
 0x9a8   :  { %1495 = vmatpush.msra.mxu0 %v1475_v29  ;;  %vm1262_vm14 = vmor %vm1260_vm13, %vm1261_vm12 }
 0x9a9   :  { %v1257_v30 = vsub.f32 1.0, %v1256_v47  ;;  %1557 = vrot.lane.b32.xlu0 %v3921_v60, %s4580_s0 }
 0x9ab   :  { %v1258_v32 = vmul.f32 %v3374_v28, %v1257_v30 }
 0x9ad   :  { %v1259_v34 = vadd.f32 %v3374_v28, %v1258_v32 }
 0x9af   :  { %v1263_v52 = vsel %vm1262_vm14, %v3374_v28, %v1259_v34 }
 0x9b0   :  { %v1268_v36 = vsel %vm1265_vm15, %v1267_v35, %v1263_v52 }
 0x9b1   :  { %v1269_v37 = vmul.f32 %v3368_v42, %v1268_v36 }
 0x9b3   :  { %3218 = vmatmul.msk.f32.vlgmr.msrb.gmra.mxu2 %vm183_vm8, %v1269_v37 }
 0x9b4   :  { %1547 = vmatpush.msrb.mxu2 %v1178_v56 }
 0x9bb   :  { %3225 = vmatmul.msk.f32.vlgmr.msra.gmra.mxu2 %vm183_vm8, %v1397_v38 }
 0xa00   :  { %v1254_v40 = vpop.xlane.xlu1 %1253 }
 0xa01   :  { %3375 = vrcp.f32 %v1254_v40  ;;  %v1281_v49 = vand.u32 2147483648, %v1254_v40  ;;  %v1279_v50 = vand.u32 2147483647, %v1254_v40  ;;  %vm1275_vm2 = vweird.f32 %v1254_v40 }
 0xa03   :  { %v1282_v54 = vor.u32 1.1754944e-38, %v1281_v49  ;;  %vm1280_vm4 = vcmp.eq.f32.partialorder %v1279_v50, 8.507059e+37 }
 0xa07   :  { %v3376_v41 = vpop.eup %3375 }
 0xa08   :  { %v1271_v44 = vmul.f32 %v3376_v41, %v1254_v40  ;;  %v1440_v45 = vpop.xlane.xlu0 %1439  ;;  %vm1276_vm1 = vweird.f32 %v3376_v41 }
 0xa09   :  { %3377 = vrcp.f32 %v1440_v45  ;;  %vm1277_vm3 = vmor %vm1275_vm2, %vm1276_vm1  ;;  %v1455_v63 = vand.u32 2147483648, %v1440_v45  ;;  %v1453_v6 = vand.u32 2147483647, %v1440_v45  ;;  %vm1449_vm6 = vweird.f32 %v1440_v45 }
 0xa0a   :  { %v1272_v48 = vsub.f32 1.0, %v1271_v44 }
 0xa0b   :  { %v1456_v15 = vor.u32 1.1754944e-38, %v1455_v63  ;;  %vm1454_vm9 = vcmp.eq.f32.partialorder %v1453_v6, 8.507059e+37 }
 0xa0c   :  { %v1273_v39 = vmul.f32 %v3376_v41, %v1272_v48 }
 0xa0e   :  { %v1274_v51 = vadd.f32 %v3376_v41, %v1273_v39 }
 0xa0f   :  { %v3378_v53 = vpop.eup %3377 }
 0xa10   :  { %v1278_v55 = vsel %vm1277_vm3, %v3376_v41, %v1274_v51  ;;  %v1445_v57 = vmul.f32 %v3378_v53, %v1440_v45  ;;  %vm1450_vm5 = vweird.f32 %v3378_v53 }
 0xa11   :  { %v1283_v58 = vsel %vm1280_vm4, %v1282_v54, %v1278_v55  ;;  %vm1451_vm7 = vmor %vm1449_vm6, %vm1450_vm5 }
 0xa12   :  { %v1446_v43 = vsub.f32 1.0, %v1445_v57  ;;  %v1284_v62 = vmul.f32 %v3370_v23, %v1283_v58 }
 0xa14   :  { %v1447_v4 = vmul.f32 %v3378_v53, %v1446_v43  ;;  %3219 = vmatmul.msk.f32.vlgmr.msrb.gmra.mxu0 %vm183_vm8, %v1284_v62 }
 0xa16   :  { %v1448_v7 = vadd.f32 %v3378_v53, %v1447_v4 }
 0xa18   :  { %v1452_v11 = vsel %vm1451_vm7, %v3378_v53, %v1448_v7  ;;  %v1560_v19 = vpop.permute.xlu1 %1559 }
 0xa19   :  { %v1457_v12 = vsel %vm1454_vm9, %v1456_v15, %v1452_v11  ;;  %3230 = vmatpush.xpose.msk.msrb.mxu0 %vm183_vm8, %v1560_v19 }
 0xa1a   :  { %v1458_v13 = vmul.f32 %v4037_v1, %v1457_v12 }
 0xa1b   :  { %v1558_v14 = vpop.permute.xlu0 %1557 }
 0xa1c   :  { %3226 = vmatmul.msk.f32.vlgmr.msra.gmra.mxu0 %vm183_vm8, %v1458_v13 }
 0xa24   :  { %3231 = vmatmul.msk.f32.vlgmr.msrb.gmra.mxu0 %vm183_vm8, %v1558_v14 }
 0xa36   :  { %v1308_v42 = vpop.f32.mrf.mxu2 }
 0xa37   :  { %3220 = vmatmul.msk.f32.vlgmr.msrb.gmra.mxu3 %vm183_vm8, %v1308_v42 }
 0xa3e   :  { %v1421_v18 = vpop.f32.mrf.mxu2 }
 0xa3f   :  { %v1422_v20 = vadd.f32 %v1421_v18, %v4024_v10  ;;  %v4074_v10 = vld [vmem:[%s4576_s5 + $0x10] sm:$0xff] }
 0xa41   :  { %v1425_v21 = vadd.f32 %v1422_v20, %v4017_v5 }
 0xa43   :  { %v1429_v0 = vsel %vm183_vm8, %v1425_v21, -inf }
 0xa44   :  { %1430 = vmax.xlane.f32.xlu2 %v1429_v0 }
 0xa5c   :  { %1587 = vrot.lane.b32.xlu2 %v3927_v61, %s4579_s9 }
 0xa91   :  { %v1334_v22 = vpop.f32.mrf.mxu0 }
 0xa92   :  { %3221 = vmatmul.msk.f32.gmra.mxu3 %vm183_vm8, %v1334_v22 }
 0xa99   :  { %v1497_v23 = vpop.f32.mrf.mxu0 }
 0xa9a   :  { %3228 = vmatmul.msk.f32.vlgmr.msrb.gmra.mxu2 %vm183_vm8, %v1497_v23  ;;  %v1179_v23 = vld [vmem:[%s4517_s16 + $0x10] sm:$0xff] }
 0xaa1   :  { %v1582_v24 = vpop.f32.mrf.mxu0 }
 0xaa2   :  { %v1583_v25 = vadd.f32 %v1582_v24, %v4074_v10 }
 0xaa4   :  { %v1613_v1 = vadd.f32 %v1583_v25, %v3988_v46 }
 0xaa6   :  { %v1615_v59 = vsel %vm183_vm8, %v1613_v1, -inf }
 0xaa7   :  { %1616 = vmax.xlane.f32.xlu1 %v1615_v59 }
 0xab7   :  { %v1431_v26 = vpop.xlane.xlu2 %1430 }
 0xab8   :  { %v1433_v27 = vsub.f32 %v1425_v21, %v1431_v26 }
 0xaba   :  { %v1436_v28 = vmul.f32 1.442695, %v1433_v27  ;;  %v4102_v14 = vpop.f32.mrf.mxu3 }
 0xabc   :  { %3379 = vpow2.f32 %v1436_v28 }
 0xabf   :  { %v1588_v47 = vpop.permute.xlu2 %1587 }
 0xac0   :  { %1500 = vrot.lane.b32.xlu1 %v3927_v61, %s4578_s3  ;;  %3232 = vmatpush.xpose.msk.msra.mxu3 %vm183_vm8, %v1588_v47 }
 0xac2   :  { %v3380_v29 = vpop.eup %3379 }
 0xac3   :  { %v1441_v30 = vsel %vm183_vm8, %v3380_v29, 0.0 }
 0xac4   :  { %1442 = vadd.xlane.f32.xlu0 %v1441_v30  ;;  %1736 = vmatpush.msrb.mxu3 %v1179_v23 }
 0xac8   :  { %1748 = vrot.lane.b32.xlu1 %v3921_v60, %s4581_s6 }
 0xad0   :  { %1774 = vrot.lane.b32.xlu1 %v3927_v61, %s4582_s30 }
 0xad8   :  { %1585 = vrot.lane.b32.xlu0 %v3927_v61, %s4580_s0 }
 0xae0   :  { %1663 = vrot.lane.b32.xlu0 %v3921_v60, %s4583_s12 }
 0xae8   :  { %1776 = vrot.lane.b32.xlu0 %v3927_v61, %s4581_s6 }
 0xb15   :  { %v4104_v42 = vpop.f32.mrf.mxu3 }
 0xb1a   :  { %v1617_v31 = vpop.xlane.xlu1 %1616 }
 0xb1b   :  { %v1621_v32 = vsub.f32 %v1613_v1, %v1617_v31 }
 0xb1d   :  { %v1623_v33 = vmul.f32 1.442695, %v1621_v32 }
 0xb1f   :  { %3381 = vpow2.f32 %v1623_v33  ;;  %v4132_v33 = vpop.f32.mrf.mxu2 }
 0xb25   :  { %v3382_v34 = vpop.eup %3381 }
 0xb26   :  { %v1627_v35 = vsel %vm183_vm8, %v3382_v34, 0.0 }
 0xb27   :  { %1628 = vadd.xlane.f32.xlu2 %v1627_v35 }
 0xb32   :  { %v1501_v52 = vpop.permute.xlu1 %1500 }
 0xb33   :  { %1521 = vmatpush.msra.mxu1 %v1501_v52 }
 0xb37   :  { %v1443_v36 = vpop.xlane.xlu0 %1442 }
 0xb38   :  { %3383 = vrcp.f32 %v1443_v36  ;;  %v1470_v41 = vand.u32 2147483648, %v1443_v36  ;;  %v1468_v45 = vand.u32 2147483647, %v1443_v36  ;;  %vm1464_vm12 = vweird.f32 %v1443_v36 }
 0xb3a   :  { %v1471_v49 = vor.u32 1.1754944e-38, %v1470_v41  ;;  %vm1469_vm14 = vcmp.eq.f32.partialorder %v1468_v45, 8.507059e+37  ;;  %v1749_v55 = vpop.permute.xlu1 %1748 }
 0xb3e   :  { %v3384_v37 = vpop.eup %3383 }
 0xb3f   :  { %v1460_v38 = vmul.f32 %v3384_v37, %v1443_v36  ;;  %1746 = vrot.lane.b32.xlu2 %v3921_v60, %s4582_s30  ;;  %vm1465_vm10 = vweird.f32 %v3384_v37 }
 0xb40   :  { %vm1466_vm13 = vmor %vm1464_vm12, %vm1465_vm10 }
 0xb41   :  { %v1461_v40 = vsub.f32 1.0, %v1460_v38 }
 0xb42   :  { %v1775_v0 = vpop.permute.xlu1 %1774 }
 0xb43   :  { %v1462_v44 = vmul.f32 %v3384_v37, %v1461_v40 }
 0xb45   :  { %v1463_v48 = vadd.f32 %v3384_v37, %v1462_v44 }
 0xb47   :  { %v1467_v39 = vsel %vm1466_vm13, %v3384_v37, %v1463_v48 }
 0xb48   :  { %v1472_v50 = vsel %vm1469_vm14, %v1471_v49, %v1467_v39 }
 0xb49   :  { %v1473_v51 = vmul.f32 %v3380_v29, %v1472_v50 }
 0xb4a   :  { %v1586_v53 = vpop.permute.xlu0 %1585 }
 0xb4b   :  { %3227 = vmatmul.msk.f32.vlgmr.msra.gmra.mxu1 %vm183_vm8, %v1473_v51  ;;  %3233 = vmatmul.msk.f32.vlgmr.msra.gmra.mxu3 %vm183_vm8, %v1586_v53 }
 0xb52   :  { %v1664_v54 = vpop.permute.xlu0 %1663 }
 0xb53   :  { %1684 = vmatpush.msrb.mxu1 %v1664_v54 }
 0xb55   :  { %3238 = vmatpush.xpose.msk.msra.mxu1 %vm183_vm8, %v1749_v55 }
 0xb5a   :  { %v1777_v57 = vpop.permute.xlu0 %1776 }
 0xb5b   :  { %3240 = vmatpush.xpose.msk.msra.mxu2 %vm183_vm8, %v1777_v57 }
 0xb9a   :  { %v1629_v58 = vpop.xlane.xlu2 %1628 }
 0xb9b   :  { %3385 = vrcp.f32 %v1629_v58  ;;  %v1644_v4 = vand.u32 2147483648, %v1629_v58  ;;  %v1642_v7 = vand.u32 2147483647, %v1629_v58  ;;  %vm1638_vm1 = vweird.f32 %v1629_v58 }
 0xb9d   :  { %v1645_v15 = vor.u32 1.1754944e-38, %v1644_v4  ;;  %vm1643_vm3 = vcmp.eq.f32.partialorder %v1642_v7, 8.507059e+37 }
 0xba1   :  { %v3386_v43 = vpop.eup %3385 }
 0xba2   :  { %v1634_v62 = vmul.f32 %v3386_v43, %v1629_v58  ;;  %vm1639_vm15 = vweird.f32 %v3386_v43  ;;  %v1747_v13 = vpop.permute.xlu2 %1746 }
 0xba3   :  { %vm1640_vm2 = vmor %vm1638_vm1, %vm1639_vm15 }
 0xba4   :  { %v1635_v63 = vsub.f32 1.0, %v1634_v62 }
 0xba6   :  { %v1636_v6 = vmul.f32 %v3386_v43, %v1635_v63 }
 0xba8   :  { %v1637_v8 = vadd.f32 %v3386_v43, %v1636_v6 }
 0xbaa   :  { %v1641_v11 = vsel %vm1640_vm2, %v3386_v43, %v1637_v8 }
 0xbab   :  { %v1646_v19 = vsel %vm1643_vm3, %v1645_v15, %v1641_v11 }
 0xbac   :  { %v1647_v12 = vmul.f32 %v3382_v34, %v1646_v19 }
 0xbae   :  { %3234 = vmatmul.msk.f32.vlgmr.msrb.gmra.mxu1 %vm183_vm8, %v1647_v12 }
 0xbb6   :  { %3239 = vmatmul.msk.f32.vlgmr.msra.gmra.mxu1 %vm183_vm8, %v1747_v13 }
 0xbc8   :  { %v1523_v18 = vpop.f32.mrf.mxu1 }
 0xbc9   :  { %3229 = vmatmul.msk.f32.gmra.mxu2 %vm183_vm8, %v1523_v18 }
 0xbce   :  { %v1610_v20 = vpop.f32.mrf.mxu3 }
 0xbcf   :  { %v1611_v21 = vadd.f32 %v1610_v20, %v4074_v10  ;;  %v1174_v10 = vld [vmem:[%s4576_s5 + $0x18] sm:$0xff] }
 0xbd0   :  { %v2011_v20 = vld [vmem:[%s4520_s19 + $0x18] sm:$0xff] }
 0xbd1   :  { %3241 = vmatmul.msk.f32.vlgmr.msra.gmra.mxu2 %vm183_vm8, %v1775_v0  ;;  %v1614_v56 = vadd.f32 %v1611_v21, %v4017_v5  ;;  %v2010_v21 = vld [vmem:[%s4520_s19 + $0x10] sm:$0xff]  ;;  %2030 = vmatpush.msra.mxu3 %v2011_v20 }
 0xbd3   :  { %v1618_v22 = vsel %vm183_vm8, %v1614_v56, -inf  ;;  %2031 = vmatpush.msra.mxu3 %v2010_v21 }
 0xbd4   :  { %1619 = vmax.xlane.f32.xlu2 %v1618_v22  ;;  %v2009_v22 = vld [vmem:[%s4520_s19 + $0x8] sm:$0xff] }
 0xbd5   :  { %2032 = vmatpush.msra.mxu3 %v2009_v22 }
 0xc2b   :  { %v1686_v24 = vpop.f32.mrf.mxu1 }
 0xc2c   :  { %3236 = vmatmul.msk.f32.vlgmr.msrb.gmra.mxu3 %vm183_vm8, %v1686_v24 }
 0xc33   :  { %v1771_v25 = vpop.f32.mrf.mxu1 }
 0xc34   :  { %v1772_v1 = vadd.f32 %v1771_v25, %v1174_v10 }
 0xc36   :  { %v1802_v59 = vadd.f32 %v1772_v1, %v3988_v46  ;;  %v4127_v46 = vadd.f32 %v4055_v2, %v3932_v3 }
 0xc38   :  { %v1804_v26 = vsel %vm183_vm8, %v1802_v59, -inf  ;;  %v1057_v31 = vmul.f32 %v4127_v46, %v4127_v46 }
 0xc39   :  { %1805 = vmax.xlane.f32.xlu0 %v1804_v26 }
 0xc3a   :  { %v1059_v32 = vsel %vm94_vm0, %v1057_v31, 0.0 }
 0xc47   :  { %v1620_v27 = vpop.xlane.xlu2 %1619 }
 0xc48   :  { %v1622_v28 = vsub.f32 %v1614_v56, %v1620_v27 }
 0xc4a   :  { %v1625_v47 = vmul.f32 1.442695, %v1622_v28 }
 0xc4c   :  { %3387 = vpow2.f32 %v1625_v47  ;;  %v4134_v34 = vpop.f32.mrf.mxu2 }
 0xc4d   :  { %1689 = vrot.lane.b32.xlu0 %v3927_v61, %s4583_s12  ;;  %s3160_s12 = sshll.u32 %s4528_s27, 4  ;;  %s3161_s12 = int_to_ptr.hbm [resolvable:$true] %s3160_s12 }
 0xc52   :  { %v3388_v29 = vpop.eup %3387 }
 0xc53   :  { %v1630_v30 = vsel %vm183_vm8, %v3388_v29, 0.0 }
 0xc54   :  { %1631 = vadd.xlane.f32.xlu1 %v1630_v30  ;;  %v1799_v37 = vpop.f32.mrf.mxu2 }
 0xc55   :  { %v1800_v38 = vadd.f32 %v1799_v37, %v1174_v10  ;;  %v2008_v10 = vld [vmem:[%s4520_s19] sm:$0xff]  ;;  %v1055_v37 = vadd.f32 %v4058_v17, %v3938_v9 }
 0xc56   :  { %2033 = vmatpush.msra.mxu3 %v2008_v10 }
 0xc57   :  { %v1803_v2 = vadd.f32 %v1800_v38, %v4017_v5 }
 0xc59   :  { %v1807_v41 = vsel %vm183_vm8, %v1803_v2, -inf }
 0xc6d   :  { %1852 = vrot.lane.b32.xlu1 %v3921_v60, %s4584_s28 }
 0xc77   :  { %1060 = vadd.xlane.f32.xlu0 %v1059_v32 }
 0xcac   :  { %v1806_v35 = vpop.xlane.xlu0 %1805 }
 0xcad   :  { %v1810_v52 = vsub.f32 %v1802_v59, %v1806_v35  ;;  %v3317_v35 = vld [vmem:[%s4514_s13] ss:$0 sm:$0xff]  ;;  %s4585_s13 = smov 96  }
 0xcaf   :  { %v1812_v36 = vmul.f32 1.442695, %v1810_v52 }
 0xcb1   :  { %3389 = vpow2.f32 %v1812_v36 }
 0xcb7   :  { %v3390_v60 = vpop.eup %3389 }
 0xcb8   :  { %v1816_v3 = vsel %vm183_vm8, %v3390_v60, 0.0 }
 0xcb9   :  { %1817 = vadd.xlane.f32.xlu2 %v1816_v3 }
 0xcbf   :  { %v1690_v40 = vpop.permute.xlu0 %1689 }
 0xcc0   :  { %1710 = vmatpush.msra.mxu0 %v1690_v40 }
 0xcc1   :  { %1808 = vmax.xlane.f32.xlu2 %v1807_v41 }
 0xcc7   :  { %v1632_v44 = vpop.xlane.xlu1 %1631 }
 0xcc8   :  { %3391 = vrcp.f32 %v1632_v44  ;;  %v1659_v39 = vand.u32 2147483648, %v1632_v44  ;;  %v1657_v51 = vand.u32 2147483647, %v1632_v44  ;;  %vm1653_vm5 = vweird.f32 %v1632_v44 }
 0xcca   :  { %v1660_v54 = vor.u32 1.1754944e-38, %v1659_v39  ;;  %vm1658_vm7 = vcmp.eq.f32.partialorder %v1657_v51, 8.507059e+37 }
 0xcce   :  { %v3392_v45 = vpop.eup %3391 }
 0xccf   :  { %v1649_v48 = vmul.f32 %v3392_v45, %v1632_v44  ;;  %vm1654_vm4 = vweird.f32 %v3392_v45 }
 0xcd0   :  { %vm1655_vm6 = vmor %vm1653_vm5, %vm1654_vm4 }
 0xcd1   :  { %v1650_v49 = vsub.f32 1.0, %v1649_v48 }
 0xcd3   :  { %v1651_v50 = vmul.f32 %v3392_v45, %v1650_v49 }
 0xcd5   :  { %v1652_v53 = vadd.f32 %v3392_v45, %v1651_v50 }
 0xcd7   :  { %v1656_v55 = vsel %vm1655_vm6, %v3392_v45, %v1652_v53  ;;  %v1738_v53 = vpop.f32.mrf.mxu3 }
 0xcd8   :  { %v1661_v5 = vsel %vm1658_vm7, %v1660_v54, %v1656_v55  ;;  %v3463_v54 = vld [vmem:[%s4573_s4 + $0x8] sm:$0xff] }
 0xcd9   :  { %v1662_v57 = vmul.f32 %v3388_v29, %v1661_v5  ;;  %v1367_v55 = vadd.f32 %v3463_v54, %v4104_v42 }
 0xcdb   :  { %3235 = vmatmul.msk.f32.vlgmr.msra.gmra.mxu0 %vm183_vm8, %v1662_v57  ;;  %v1556_v5 = vadd.f32 %v4134_v34, %v1367_v55  ;;  %v4237_v55 = vld [vmem:[%s4571_s10] ss:$0 sm:$0xff] }
 0xcdf   :  { %v1853_v58 = vpop.permute.xlu1 %1852 }
 0xce0   :  { %1873 = vmatpush.msrb.mxu0 %v1853_v58 }
 0xcea   :  { %v1061_v62 = vpop.xlane.xlu0 %1060 }
 0xceb   :  { %v1065_v4 = vmul.f32 %v1061_v62, %v3705_v16 }
 0xced   :  { %v1067_v11 = vadd.f32 1e-06, %v1065_v4 }
 0xcef   :  { %vm1075_vm15 = vweird.f32 %v1067_v11 }
 0xd2c   :  { %v1818_v43 = vpop.xlane.xlu2 %1817 }
 0xd2d   :  { %3393 = vrcp.f32 %v1818_v43  ;;  %v1833_v19 = vand.u32 2147483648, %v1818_v43  ;;  %v1831_v18 = vand.u32 2147483647, %v1818_v43  ;;  %vm1827_vm10 = vweird.f32 %v1818_v43 }
 0xd2f   :  { %v1834_v56 = vor.u32 1.1754944e-38, %v1833_v19  ;;  %vm1832_vm13 = vcmp.eq.f32.partialorder %v1831_v18, 8.507059e+37 }
 0xd33   :  { %v3394_v63 = vpop.eup %3393 }
 0xd34   :  { %v1823_v6 = vmul.f32 %v3394_v63, %v1818_v43  ;;  %v1809_v7 = vpop.xlane.xlu2 %1808  ;;  %vm1828_vm9 = vweird.f32 %v3394_v63 }
 0xd35   :  { %v1811_v8 = vsub.f32 %v1803_v2, %v1809_v7  ;;  %vm1829_vm12 = vmor %vm1827_vm10, %vm1828_vm9 }
 0xd36   :  { %v1824_v15 = vsub.f32 1.0, %v1823_v6 }
 0xd37   :  { %v1814_v12 = vmul.f32 1.442695, %v1811_v8 }
 0xd38   :  { %v1825_v13 = vmul.f32 %v3394_v63, %v1824_v15 }
 0xd39   :  { %3395 = vpow2.f32 %v1814_v12 }
 0xd3a   :  { %v1826_v0 = vadd.f32 %v3394_v63, %v1825_v13  ;;  %3397 = vrsqrt.f32 %v1067_v11  ;;  %v3464_v13 = vld [vmem:[%s4573_s4] sm:$0xff] }
 0xd3b   :  { %v1366_v18 = vadd.f32 %v3464_v13, %v4102_v14  ;;  %v1978_v14 = vld [vmem:[%s4519_s18 + $0x18] sm:$0xff] }
 0xd3c   :  { %v1830_v23 = vsel %vm1829_vm12, %v3394_v63, %v1826_v0  ;;  %1997 = vmatpush.msra.mxu0 %v1978_v14 }
 0xd3d   :  { %v1835_v24 = vsel %vm1832_vm13, %v1834_v56, %v1830_v23  ;;  %v1555_v20 = vadd.f32 %v4132_v33, %v1366_v18  ;;  %v1977_v33 = vld [vmem:[%s4519_s18 + $0x10] sm:$0xff] }
 0xd3e   :  { %v1836_v25 = vmul.f32 %v3390_v60, %v1835_v24  ;;  %v1058_v60 = vmul.f32 %v1055_v37, %v1055_v37  ;;  %1998 = vmatpush.msra.mxu0 %v1977_v33 }
 0xd3f   :  { %v3396_v1 = vpop.eup %3395  ;;  %v1744_v21 = vadd.f32 %v1738_v53, %v1555_v20 }
 0xd40   :  { %3242 = vmatmul.msk.f32.vlgmr.msrb.gmra.mxu0 %vm183_vm8, %v1836_v25  ;;  %v1819_v59 = vsel %vm183_vm8, %v3396_v1, 0.0  ;;  %v3398_v26 = vpop.eup %3397  ;;  %v1062_v38 = vsel %vm94_vm0, %v1058_v60, 0.0  ;;  %v1976_v25 = vld [vmem:[%s4519_s18 + $0x8] sm:$0xff]  ;;  %v3318_v60 = vld [vmem:[%s4518_s17] ss:$0 sm:$0xff] }
 0xd41   :  { %1820 = vadd.xlane.f32.xlu2 %v1819_v59  ;;  %v1070_v27 = vmul.f32 %v3398_v26, %v1067_v11  ;;  %vm1076_vm14 = vweird.f32 %v3398_v26  ;;  %1999 = vmatpush.msra.mxu0 %v1976_v25 }
 0xd42   :  { %vm1077_vm1 = vmor %vm1075_vm15, %vm1076_vm14 }
 0xd43   :  { %v1071_v28 = vmul.f32 %v3398_v26, %v1070_v27 }
 0xd45   :  { %v1072_v47 = vmul.f32 0.5, %v1071_v28 }
 0xd47   :  { %v1073_v29 = vsub.f32 1.5, %v1072_v47 }
 0xd49   :  { %v1074_v30 = vmul.f32 %v3398_v26, %v1073_v29 }
 0xd4b   :  { %v1078_v31 = vsel %vm1077_vm1, %v3398_v26, %v1074_v30 }
 0xd4c   :  { %v1089_v52 = vmul.f32 %v1078_v31, %v4127_v46 }
 0xd4e   :  { %v1094_v36 = vmul.f32 %v3317_v35, %v1089_v52 }
 0xd58   :  { %v1712_v32 = vpop.f32.mrf.mxu0 }
 0xd59   :  { %3237 = vmatmul.msk.f32.gmra.mxu3 %vm183_vm8, %v1712_v32  ;;  %1878 = vrot.lane.b32.xlu2 %v3927_v61, %s4584_s28  ;;  %v1180_v61 = vld [vmem:[%s4517_s16 + $0x18] sm:$0xff] }
 0xd5a   :  { %1925 = vmatpush.msrb.mxu2 %v1180_v61 }
 0xd61   :  { %3248 = vmatmul.msk.f32.vlgmr.msra.gmra.mxu3 %vm94_vm0, %v1094_v36 }
 0xd82   :  { %1063 = vadd.xlane.f32.xlu2 %v1062_v38 }
 0xdb4   :  { %v1821_v3 = vpop.xlane.xlu2 %1820 }
 0xdb5   :  { %3399 = vrcp.f32 %v1821_v3  ;;  %v1848_v9 = vand.u32 2147483648, %v1821_v3  ;;  %v1846_v45 = vand.u32 2147483647, %v1821_v3  ;;  %vm1842_vm3 = vweird.f32 %v1821_v3 }
 0xdb7   :  { %v1849_v49 = vor.u32 1.1754944e-38, %v1848_v9  ;;  %vm1847_vm5 = vcmp.eq.f32.partialorder %v1846_v45, 8.507059e+37 }
 0xdbb   :  { %v3400_v2 = vpop.eup %3399 }
 0xdbc   :  { %v1838_v40 = vmul.f32 %v3400_v2, %v1821_v3  ;;  %v1879_v46 = vpop.permute.xlu2 %1878  ;;  %vm1843_vm2 = vweird.f32 %v3400_v2 }
 0xdbd   :  { %v1875_v41 = vpop.f32.mrf.mxu0  ;;  %1899 = vmatpush.msrb.mxu1 %v1879_v46  ;;  %vm1844_vm4 = vmor %vm1842_vm3, %vm1843_vm2 }
 0xdbe   :  { %v1839_v44 = vsub.f32 1.0, %v1838_v40  ;;  %3244 = vmatmul.msk.f32.vlgmr.msrb.gmra.mxu2 %vm183_vm8, %v1875_v41 }
 0xdc0   :  { %v1840_v17 = vmul.f32 %v3400_v2, %v1839_v44 }
 0xdc2   :  { %v1841_v48 = vadd.f32 %v3400_v2, %v1840_v17 }
 0xdc4   :  { %v1845_v39 = vsel %vm1844_vm4, %v3400_v2, %v1841_v48 }
 0xdc5   :  { %v1850_v50 = vsel %vm1847_vm5, %v1849_v49, %v1845_v39 }
 0xdc6   :  { %v1851_v51 = vmul.f32 %v3396_v1, %v1850_v50  ;;  %v1975_v1 = vld [vmem:[%s4519_s18] sm:$0xff] }
 0xdc7   :  { %2000 = vmatpush.msra.mxu0 %v1975_v1 }
 0xdc8   :  { %3243 = vmatmul.msk.f32.vlgmr.msrb.gmra.mxu1 %vm183_vm8, %v1851_v51 }
 0xddc   :  { %v1741_v57 = vpop.f32.mrf.mxu3 }
 0xddd   :  { %v1745_v58 = vadd.f32 %v1741_v57, %v1556_v5 }
 0xde4   :  { %v4176_v43 = vpop.f32.mrf.mxu3 }
 0xde5   :  { %3250 = vmatpush.xpose.msk.msra.mxu1 %vm183_vm8, %v4176_v43 }
 0xdf5   :  { %v1064_v62 = vpop.xlane.xlu2 %1063 }
 0xdf6   :  { %v1066_v63 = vmul.f32 %v1064_v62, %v3705_v16 }
 0xdf8   :  { %v1068_v4 = vadd.f32 1e-06, %v1066_v63 }
 0xdfa   :  { %3401 = vrsqrt.f32 %v1068_v4  ;;  %vm1085_vm7 = vweird.f32 %v1068_v4 }
 0xe00   :  { %v3402_v6 = vpop.eup %3401 }
 0xe01   :  { %v1080_v7 = vmul.f32 %v3402_v6, %v1068_v4  ;;  %vm1086_vm6 = vweird.f32 %v3402_v6 }
 0xe02   :  { %vm1087_vm9 = vmor %vm1085_vm7, %vm1086_vm6 }
 0xe03   :  { %v1081_v8 = vmul.f32 %v3402_v6, %v1080_v7 }
 0xe05   :  { %v1082_v15 = vmul.f32 0.5, %v1081_v8 }
 0xe07   :  { %v1083_v11 = vsub.f32 1.5, %v1082_v15 }
 0xe09   :  { %v1084_v42 = vmul.f32 %v3402_v6, %v1083_v11 }
 0xe0b   :  { %v1088_v34 = vsel %vm1087_vm9, %v3402_v6, %v1084_v42 }
 0xe0c   :  { %v1090_v19 = vmul.f32 %v1088_v34, %v1055_v37  ;;  %v4255_v34 = vld [vmem:[%s4571_s10 + $0x1] ss:$0 sm:$0xff]  ;;  %s4586_s10 = sld [smem:[#allocation14_spill]] }
 0xe0e   :  { %v1095_v12 = vmul.f32 %v3317_v35, %v1090_v19 }
 0xe10   :  { %3249 = vmatmul.msk.f32.gmra.mxu3 %vm94_vm0, %v1095_v12 }
 0xe41   :  { %v1927_v0 = vpop.f32.mrf.mxu2 }
 0xe42   :  { %v4187_v56 = vadd.f32 %v1927_v0, %v1744_v21 }
 0xe44   :  { %v1936_v22 = vmul.f32 %v4187_v56, %v4187_v56 }
 0xe45   :  { %v1901_v23 = vpop.f32.mrf.mxu1 }
 0xe46   :  { %3245 = vmatmul.msk.f32.gmra.mxu2 %vm183_vm8, %v1901_v23  ;;  %v1938_v24 = vsel %vm94_vm0, %v1936_v22, 0.0 }
 0xe47   :  { %1939 = vadd.xlane.f32.xlu1 %v1938_v24 }
 0xe60   :  { %2230 = vrot.lane.b32.xlu1 %v4176_v43, %s3522_s11 }
 0xe93   :  { %v4195_v10 = vpop.f32.mrf.mxu3 }
 0xe94   :  { %2258 = vrot.lane.b32.xlu1 %v4195_v10, %s3522_s11  ;;  %3252 = vmatpush.xpose.msk.msrb.mxu1 %vm183_vm8, %v4195_v10 }
 0xeba   :  { %v1940_v59 = vpop.xlane.xlu1 %1939 }
 0xebb   :  { %v1944_v26 = vmul.f32 %v1940_v59, %v3705_v16 }
 0xebd   :  { %v1946_v27 = vadd.f32 1e-06, %v1944_v26 }
 0xebf   :  { %3403 = vrsqrt.f32 %v1946_v27  ;;  %vm1954_vm12 = vweird.f32 %v1946_v27 }
 0xec5   :  { %v3404_v28 = vpop.eup %3403 }
 0xec6   :  { %v1949_v47 = vmul.f32 %v3404_v28, %v1946_v27  ;;  %vm1955_vm10 = vweird.f32 %v3404_v28 }
 0xec7   :  { %vm1956_vm13 = vmor %vm1954_vm12, %vm1955_vm10 }
 0xec8   :  { %v1950_v29 = vmul.f32 %v3404_v28, %v1949_v47 }
 0xec9   :  { %v1930_v30 = vpop.f32.mrf.mxu2 }
 0xeca   :  { %v1951_v31 = vmul.f32 0.5, %v1950_v29  ;;  %v4214_v32 = vadd.f32 %v1930_v30, %v1745_v58 }
 0xecc   :  { %v1952_v35 = vsub.f32 1.5, %v1951_v31  ;;  %v1937_v52 = vmul.f32 %v4214_v32, %v4214_v32 }
 0xece   :  { %v1953_v36 = vmul.f32 %v3404_v28, %v1952_v35  ;;  %v1941_v37 = vsel %vm94_vm0, %v1937_v52, 0.0 }
 0xecf   :  { %1942 = vadd.xlane.f32.xlu0 %v1941_v37 }
 0xed0   :  { %v1957_v38 = vsel %vm1956_vm13, %v3404_v28, %v1953_v36 }
 0xed1   :  { %v1968_v61 = vmul.f32 %v1957_v38, %v4187_v56 }
 0xed2   :  { %v2231_v48 = vpop.permute.xlu1 %2230 }
 0xed3   :  { %v1973_v3 = vmul.f32 %v3318_v60, %v1968_v61 }
 0xed5   :  { %3246 = vmatmul.msk.f32.vlgmr.msra.gmra.mxu0 %vm94_vm0, %v1973_v3 }
 0xf06   :  { %v2259_v8 = vpop.permute.xlu1 %2258 }
 0xf42   :  { %v1943_v2 = vpop.xlane.xlu0 %1942 }
 0xf43   :  { %v1945_v40 = vmul.f32 %v1943_v2, %v3705_v16 }
 0xf45   :  { %v1947_v46 = vadd.f32 1e-06, %v1945_v40 }
 0xf47   :  { %3405 = vrsqrt.f32 %v1947_v46  ;;  %vm1964_vm15 = vweird.f32 %v1947_v46 }
 0xf4d   :  { %v3406_v41 = vpop.eup %3405 }
 0xf4e   :  { %v1959_v44 = vmul.f32 %v3406_v41, %v1947_v46  ;;  %vm1965_vm14 = vweird.f32 %v3406_v41  ;;  %v2041_v46 = vld [vmem:[%s4521_s20] sm:$0xff] }
 0xf4f   :  { %vm1966_vm1 = vmor %vm1964_vm15, %vm1965_vm14  ;;  %2218 = vmatpush.msrb.mxu3 %v2041_v46 }
 0xf50   :  { %v1960_v9 = vmul.f32 %v3406_v41, %v1959_v44 }
 0xf52   :  { %v1961_v17 = vmul.f32 0.5, %v1960_v9  ;;  %v4225_v45 = vpop.f32.mrf.mxu0 }
 0xf53   :  { %3251 = vmatmul.msk.f32.vlgmr.msra.gmra.mxu1 %vm183_vm8, %v4225_v45  ;;  %2228 = vrot.lane.b32.xlu0 %v4225_v45, %s3522_s11 }
 0xf54   :  { %v1962_v49 = vsub.f32 1.5, %v1961_v17  ;;  %3258 = vmatpush.xpose.msk.msra.mxu1 %vm183_vm8, %v2231_v48 }
 0xf56   :  { %v1963_v39 = vmul.f32 %v3406_v41, %v1962_v49 }
 0xf58   :  { %v1967_v50 = vsel %vm1966_vm1, %v3406_v41, %v1963_v39 }
 0xf59   :  { %v1969_v51 = vmul.f32 %v1967_v50, %v4214_v32 }
 0xf5b   :  { %v1974_v53 = vmul.f32 %v3318_v60, %v1969_v51 }
 0xf5d   :  { %3247 = vmatmul.msk.f32.gmra.mxu0 %vm94_vm0, %v1974_v53 }
 0xfc5   :  { %v2229_v62 = vpop.permute.xlu0 %2228 }
 0xfd0   :  { %v2068_v54 = vpop.f32.mrf.mxu1 }
 0xfd1   :  { %v2069_v5 = vadd.f32 %v4237_v55, %v2068_v54 }
 0xfd3   :  { %v2097_v57 = vsel %vm183_vm8, %v2069_v5, -inf }
 0xfd4   :  { %2098 = vmax.xlane.f32.xlu2 %v2097_v57 }
 0xfda   :  { %v4241_v58 = vpop.f32.mrf.mxu0 }
 0xfdb   :  { %2256 = vrot.lane.b32.xlu1 %v4241_v58, %s3522_s11  ;;  %3253 = vmatmul.msk.f32.vlgmr.msrb.gmra.mxu1 %vm183_vm8, %v4241_v58 }
 0xfe3   :  { %3259 = vmatmul.msk.f32.vlgmr.msra.gmra.mxu1 %vm183_vm8, %v2229_v62 }
 0xfec   :  { %2145 = vrot.lane.b32.xlu2 %v4176_v43, %s4585_s13 }
0x1047   :  { %v2099_v63 = vpop.xlane.xlu2 %2098 }
0x1048   :  { %v2103_v4 = vsub.f32 %v2069_v5, %v2099_v63 }
0x104a   :  { %v2105_v6 = vmul.f32 1.442695, %v2103_v4 }
0x104c   :  { %3407 = vpow2.f32 %v2105_v6 }
0x104d   :  { %v2257_v21 = vpop.permute.xlu1 %2256 }
0x104f   :  { %v2146_v7 = vpop.permute.xlu2 %2145 }
0x1050   :  { %2166 = vmatpush.msra.mxu2 %v2146_v7 }
0x1052   :  { %3260 = vmatpush.xpose.msk.msrb.mxu2 %vm183_vm8, %v2259_v8  ;;  %v3408_v15 = vpop.eup %3407 }
0x1053   :  { %v2109_v11 = vsel %vm183_vm8, %v3408_v15, 0.0 }
0x1054   :  { %2110 = vadd.xlane.f32.xlu0 %v2109_v11 }
0x1058   :  { %v2094_v42 = vpop.f32.mrf.mxu1 }
0x1059   :  { %v2095_v19 = vadd.f32 %v4255_v34, %v2094_v42 }
0x105b   :  { %v2100_v12 = vsel %vm183_vm8, %v2095_v19, -inf }
0x105c   :  { %2101 = vmax.xlane.f32.xlu1 %v2100_v12 }
0x1060   :  { %v2253_v13 = vpop.f32.mrf.mxu1 }
0x1061   :  { %v2254_v18 = vadd.f32 %v4237_v55, %v2253_v13 }
0x1063   :  { %v2284_v20 = vsel %vm183_vm8, %v2254_v18, -inf }
0x1064   :  { %2285 = vmax.xlane.f32.xlu2 %v2284_v20 }
0x1068   :  { %2171 = vrot.lane.b32.xlu0 %v4195_v10, %s4585_s13 }
0x1075   :  { %2332 = vrot.lane.b32.xlu1 %v4176_v43, %s3523_s2 }
0x107c   :  { %2417 = vrot.lane.b32.xlu2 %v4176_v43, %s4580_s0 }
0x1084   :  { %2358 = vrot.lane.b32.xlu2 %v4195_v10, %s3523_s2 }
0x10c7   :  { %v2111_v0 = vpop.xlane.xlu0 %2110 }
0x10c8   :  { %3409 = vrcp.f32 %v2111_v0  ;;  %v2126_v25 = vand.u32 2147483648, %v2111_v0  ;;  %v2124_v26 = vand.u32 2147483647, %v2111_v0  ;;  %vm2120_vm3 = vweird.f32 %v2111_v0 }
0x10ca   :  { %v2127_v28 = vor.u32 1.1754944e-38, %v2126_v25  ;;  %vm2125_vm5 = vcmp.eq.f32.partialorder %v2124_v26, 8.507059e+37 }
0x10ce   :  { %v3410_v22 = vpop.eup %3409 }
0x10cf   :  { %v2116_v23 = vmul.f32 %v3410_v22, %v2111_v0  ;;  %v2102_v24 = vpop.xlane.xlu1 %2101  ;;  %vm2121_vm2 = vweird.f32 %v3410_v22 }
0x10d0   :  { %v2104_v14 = vsub.f32 %v2095_v19, %v2102_v24  ;;  %vm2122_vm4 = vmor %vm2120_vm3, %vm2121_vm2 }
0x10d1   :  { %v2117_v33 = vsub.f32 1.0, %v2116_v23 }
0x10d2   :  { %v2107_v1 = vmul.f32 1.442695, %v2104_v14 }
0x10d3   :  { %v2118_v59 = vmul.f32 %v3410_v22, %v2117_v33 }
0x10d4   :  { %3411 = vpow2.f32 %v2107_v1 }
0x10d5   :  { %v2119_v27 = vadd.f32 %v3410_v22, %v2118_v59 }
0x10d7   :  { %v2123_v47 = vsel %vm2122_vm4, %v3410_v22, %v2119_v27  ;;  %v2286_v29 = vpop.xlane.xlu2 %2285  ;;  %v2042_v22 = vld [vmem:[%s4521_s20 + $0x8] sm:$0xff] }
0x10d8   :  { %v2128_v30 = vsel %vm2125_vm5, %v2127_v28, %v2123_v47  ;;  %v2290_v31 = vsub.f32 %v2254_v18, %v2286_v29 }
0x10d9   :  { %v2129_v35 = vmul.f32 %v3408_v15, %v2128_v30 }
0x10da   :  { %v3412_v52 = vpop.eup %3411  ;;  %v2292_v36 = vmul.f32 1.442695, %v2290_v31  ;;  %v2172_v37 = vpop.permute.xlu0 %2171 }
0x10db   :  { %3254 = vmatmul.msk.f32.vlgmr.msra.gmra.mxu2 %vm183_vm8, %v2129_v35  ;;  %2192 = vmatpush.msrb.mxu0 %v2172_v37  ;;  %v2112_v60 = vsel %vm183_vm8, %v3412_v52, 0.0 }
0x10dc   :  { %3413 = vpow2.f32 %v2292_v36  ;;  %2113 = vadd.xlane.f32.xlu0 %v2112_v60  ;;  %2405 = vmatpush.msra.mxu2 %v2042_v22 }
0x10df   :  { %v2418_v38 = vpop.permute.xlu2 %2417 }
0x10e2   :  { %v3414_v61 = vpop.eup %3413 }
0x10e3   :  { %3261 = vmatmul.msk.f32.vlgmr.msrb.gmra.mxu2 %vm183_vm8, %v2257_v21  ;;  %v2296_v3 = vsel %vm183_vm8, %v3414_v61, 0.0 }
0x10e4   :  { %2297 = vadd.xlane.f32.xlu0 %v2296_v3 }
0x10e7   :  { %v2333_v2 = vpop.permute.xlu1 %2332  ;;  %v2359_v40 = vpop.permute.xlu2 %2358 }
0x10e8   :  { %2353 = vmatpush.msra.mxu0 %v2333_v2  ;;  %2379 = vmatpush.msrb.mxu1 %v2359_v40 }
0x10f8   :  { %2415 = vrot.lane.b32.xlu0 %v4225_v45, %s4580_s0 }
0x114f   :  { %v2114_v41 = vpop.xlane.xlu0 %2113 }
0x1150   :  { %3415 = vrcp.f32 %v2114_v41  ;;  %v2141_v49 = vand.u32 2147483648, %v2114_v41  ;;  %v2139_v50 = vand.u32 2147483647, %v2114_v41  ;;  %vm2135_vm7 = vweird.f32 %v2114_v41 }
0x1152   :  { %v2142_v54 = vor.u32 1.1754944e-38, %v2141_v49  ;;  %vm2140_vm10 = vcmp.eq.f32.partialorder %v2139_v50, 8.507059e+37 }
0x1156   :  { %v3416_v44 = vpop.eup %3415 }
0x1157   :  { %v2131_v9 = vmul.f32 %v3416_v44, %v2114_v41  ;;  %v2298_v17 = vpop.xlane.xlu0 %2297  ;;  %vm2136_vm6 = vweird.f32 %v3416_v44 }
0x1158   :  { %3417 = vrcp.f32 %v2298_v17  ;;  %vm2137_vm9 = vmor %vm2135_vm7, %vm2136_vm6  ;;  %v2313_v7 = vand.u32 2147483648, %v2298_v17  ;;  %v2311_v15 = vand.u32 2147483647, %v2298_v17  ;;  %vm2307_vm13 = vweird.f32 %v2298_v17 }
0x1159   :  { %v2132_v48 = vsub.f32 1.0, %v2131_v9 }
0x115a   :  { %v2314_v42 = vor.u32 1.1754944e-38, %v2313_v7  ;;  %vm2312_vm15 = vcmp.eq.f32.partialorder %v2311_v15, 8.507059e+37 }
0x115b   :  { %v2133_v39 = vmul.f32 %v3416_v44, %v2132_v48 }
0x115d   :  { %v2134_v51 = vadd.f32 %v3416_v44, %v2133_v39 }
0x115e   :  { %v3418_v53 = vpop.eup %3417  ;;  %v2168_v5 = vpop.f32.mrf.mxu2 }
0x115f   :  { %v2138_v57 = vsel %vm2137_vm9, %v3416_v44, %v2134_v51  ;;  %v2303_v62 = vmul.f32 %v3418_v53, %v2298_v17  ;;  %3256 = vmatmul.msk.f32.vlgmr.msrb.gmra.mxu3 %vm183_vm8, %v2168_v5  ;;  %vm2308_vm12 = vweird.f32 %v3418_v53 }
0x1160   :  { %v2143_v63 = vsel %vm2140_vm10, %v2142_v54, %v2138_v57  ;;  %vm2309_vm14 = vmor %vm2307_vm13, %vm2308_vm12 }
0x1161   :  { %v2304_v4 = vsub.f32 1.0, %v2303_v62  ;;  %v2144_v6 = vmul.f32 %v3412_v52, %v2143_v63 }
0x1163   :  { %v2305_v8 = vmul.f32 %v3418_v53, %v2304_v4  ;;  %3255 = vmatmul.msk.f32.vlgmr.msrb.gmra.mxu0 %vm183_vm8, %v2144_v6 }
0x1164   :  { %3266 = vmatpush.xpose.msk.msrb.mxu0 %vm183_vm8, %v2418_v38 }
0x1165   :  { %v2306_v11 = vadd.f32 %v3418_v53, %v2305_v8 }
0x1166   :  { %v2281_v19 = vpop.f32.mrf.mxu2 }
0x1167   :  { %v2310_v12 = vsel %vm2309_vm14, %v3418_v53, %v2306_v11  ;;  %v2282_v13 = vadd.f32 %v4255_v34, %v2281_v19 }
0x1168   :  { %v2315_v18 = vsel %vm2312_vm15, %v2314_v42, %v2310_v12 }
0x1169   :  { %v2287_v20 = vsel %vm183_vm8, %v2282_v13, -inf  ;;  %v2316_v21 = vmul.f32 %v3414_v61, %v2315_v18  ;;  %v2043_v18 = vld [vmem:[%s4521_s20 + $0x10] sm:$0xff] }
0x116a   :  { %2288 = vmax.xlane.f32.xlu1 %v2287_v20  ;;  %v2416_v0 = vpop.permute.xlu0 %2415 }
0x116b   :  { %3262 = vmatmul.msk.f32.vlgmr.msra.gmra.mxu0 %vm183_vm8, %v2316_v21 }
0x1173   :  { %3267 = vmatmul.msk.f32.vlgmr.msrb.gmra.mxu0 %vm183_vm8, %v2416_v0 }
0x1183   :  { %2443 = vrot.lane.b32.xlu1 %v4241_v58, %s4580_s0 }
0x11dd   :  { %v2289_v23 = vpop.xlane.xlu1 %2288 }
0x11de   :  { %v2291_v24 = vsub.f32 %v2282_v13, %v2289_v23 }
0x11e0   :  { %v2294_v14 = vmul.f32 1.442695, %v2291_v24  ;;  %v2194_v33 = vpop.f32.mrf.mxu0 }
0x11e1   :  { %3257 = vmatmul.msk.f32.gmra.mxu3 %vm183_vm8, %v2194_v33 }
0x11e2   :  { %3419 = vpow2.f32 %v2294_v14  ;;  %v4313_v39 = vpop.f32.mrf.mxu3 }
0x11e8   :  { %v3420_v25 = vpop.eup %3419  ;;  %v2355_v1 = vpop.f32.mrf.mxu0 }
0x11e9   :  { %3264 = vmatmul.msk.f32.vlgmr.msra.gmra.mxu2 %vm183_vm8, %v2355_v1  ;;  %v2299_v59 = vsel %vm183_vm8, %v3420_v25, 0.0 }
0x11ea   :  { %2300 = vadd.xlane.f32.xlu0 %v2299_v59 }
0x11f0   :  { %v2440_v26 = vpop.f32.mrf.mxu0 }
0x11f1   :  { %v2441_v27 = vadd.f32 %v4237_v55, %v2440_v26 }
0x11f3   :  { %v2471_v28 = vsel %vm183_vm8, %v2441_v27, -inf }
0x11f4   :  { %2472 = vmax.xlane.f32.xlu2 %v2471_v28 }
0x11f5   :  { %v2444_v9 = vpop.permute.xlu1 %2443 }
0x11fe   :  { %2445 = vrot.lane.b32.xlu0 %v4195_v10, %s4580_s0 }
0x1206   :  { %2604 = vrot.lane.b32.xlu0 %v4176_v43, %s4582_s30 }
0x120c   :  { %2519 = vrot.lane.b32.xlu2 %v4176_v43, %s4579_s9 }
0x120e   :  { %2632 = vrot.lane.b32.xlu0 %v4195_v10, %s4582_s30 }
0x1214   :  { %2630 = vrot.lane.b32.xlu2 %v4241_v58, %s4582_s30 }
0x125d   :  { %v2301_v47 = vpop.xlane.xlu0 %2300 }
0x125e   :  { %3421 = vrcp.f32 %v2301_v47  ;;  %v2328_v52 = vand.u32 2147483648, %v2301_v47  ;;  %v2326_v60 = vand.u32 2147483647, %v2301_v47  ;;  %vm2322_vm2 = vweird.f32 %v2301_v47 }
0x1260   :  { %v2329_v3 = vor.u32 1.1754944e-38, %v2328_v52  ;;  %vm2327_vm4 = vcmp.eq.f32.partialorder %v2326_v60, 8.507059e+37 }
0x1264   :  { %v3422_v29 = vpop.eup %3421  ;;  %v4315_v54 = vpop.f32.mrf.mxu3 }
0x1265   :  { %v2318_v30 = vmul.f32 %v3422_v29, %v2301_v47  ;;  %vm2323_vm1 = vweird.f32 %v3422_v29 }
0x1266   :  { %vm2324_vm3 = vmor %vm2322_vm2, %vm2323_vm1 }
0x1267   :  { %v2319_v31 = vsub.f32 1.0, %v2318_v30  ;;  %v2473_v35 = vpop.xlane.xlu2 %2472 }
0x1268   :  { %v2477_v36 = vsub.f32 %v2441_v27, %v2473_v35 }
0x1269   :  { %v2320_v37 = vmul.f32 %v3422_v29, %v2319_v31 }
0x126a   :  { %v2479_v38 = vmul.f32 1.442695, %v2477_v36 }
0x126b   :  { %v2321_v61 = vadd.f32 %v3422_v29, %v2320_v37 }
0x126c   :  { %3423 = vpow2.f32 %v2479_v38  ;;  %v4326_v20 = vpop.f32.mrf.mxu2 }
0x126d   :  { %v2325_v2 = vsel %vm2324_vm3, %v3422_v29, %v2321_v61 }
0x126e   :  { %v2330_v58 = vsel %vm2327_vm4, %v2329_v3, %v2325_v2 }
0x126f   :  { %v2520_v40 = vpop.permute.xlu2 %2519  ;;  %v2331_v46 = vmul.f32 %v3420_v25, %v2330_v58 }
0x1270   :  { %v2446_v41 = vpop.permute.xlu0 %2445  ;;  %2540 = vmatpush.msra.mxu1 %v2520_v40 }
0x1271   :  { %3263 = vmatmul.msk.f32.vlgmr.msrb.gmra.mxu1 %vm183_vm8, %v2331_v46  ;;  %3268 = vmatpush.xpose.msk.msra.mxu3 %vm183_vm8, %v2446_v41 }
0x1272   :  { %v3424_v44 = vpop.eup %3423 }
0x1273   :  { %v2483_v17 = vsel %vm183_vm8, %v3424_v44, 0.0 }
0x1274   :  { %3269 = vmatmul.msk.f32.vlgmr.msra.gmra.mxu3 %vm183_vm8, %v2444_v9  ;;  %2484 = vadd.xlane.f32.xlu1 %v2483_v17 }
0x1275   :  { %2592 = vmatpush.msrb.mxu3 %v2043_v18 }
0x1277   :  { %v2631_v7 = vpop.permute.xlu2 %2630 }
0x1278   :  { %v2605_v48 = vpop.permute.xlu0 %2604 }
0x1279   :  { %3274 = vmatpush.xpose.msk.msrb.mxu1 %vm183_vm8, %v2605_v48 }
0x1280   :  { %v2633_v49 = vpop.permute.xlu0 %2632 }
0x1281   :  { %3276 = vmatpush.xpose.msk.msrb.mxu2 %vm183_vm8, %v2633_v49 }
0x128d   :  { %2602 = vrot.lane.b32.xlu1 %v4225_v45, %s4582_s30  ;;  %s3532_s30 = smov [#allocation2]  }
0x12e7   :  { %v2485_v50 = vpop.xlane.xlu1 %2484 }
0x12e8   :  { %3425 = vrcp.f32 %v2485_v50  ;;  %v2500_v62 = vand.u32 2147483648, %v2485_v50  ;;  %v2498_v4 = vand.u32 2147483647, %v2485_v50  ;;  %vm2494_vm6 = vweird.f32 %v2485_v50 }
0x12ea   :  { %v2501_v45 = vor.u32 1.1754944e-38, %v2500_v62  ;;  %vm2499_vm9 = vcmp.eq.f32.partialorder %v2498_v4, 8.507059e+37 }
0x12ee   :  { %v3426_v51 = vpop.eup %3425  ;;  %v2381_v53 = vpop.f32.mrf.mxu1 }
0x12ef   :  { %v2490_v5 = vmul.f32 %v3426_v51, %v2485_v50  ;;  %3265 = vmatmul.msk.f32.gmra.mxu2 %vm183_vm8, %v2381_v53  ;;  %vm2495_vm5 = vweird.f32 %v3426_v51 }
0x12f0   :  { %vm2496_vm7 = vmor %vm2494_vm6, %vm2495_vm5 }
0x12f1   :  { %v2491_v57 = vsub.f32 1.0, %v2490_v5 }
0x12f3   :  { %v2492_v63 = vmul.f32 %v3426_v51, %v2491_v57 }
0x12f5   :  { %v2493_v6 = vadd.f32 %v3426_v51, %v2492_v63 }
0x12f7   :  { %v2497_v8 = vsel %vm2496_vm7, %v3426_v51, %v2493_v6  ;;  %v2468_v15 = vpop.f32.mrf.mxu3  ;;  %3277 = vmatmul.msk.f32.vlgmr.msrb.gmra.mxu2 %vm183_vm8, %v2631_v7 }
0x12f8   :  { %v2502_v11 = vsel %vm2499_vm9, %v2501_v45, %v2497_v8  ;;  %v2469_v42 = vadd.f32 %v4255_v34, %v2468_v15 }
0x12f9   :  { %v2503_v19 = vmul.f32 %v3424_v44, %v2502_v11 }
0x12fa   :  { %v2474_v12 = vsel %vm183_vm8, %v2469_v42, -inf }
0x12fb   :  { %2475 = vmax.xlane.f32.xlu0 %v2474_v12  ;;  %3270 = vmatmul.msk.f32.vlgmr.msra.gmra.mxu1 %vm183_vm8, %v2503_v19 }
0x12ff   :  { %v2603_v13 = vpop.permute.xlu1 %2602 }
0x1303   :  { %3275 = vmatmul.msk.f32.vlgmr.msrb.gmra.mxu1 %vm183_vm8, %v2603_v13 }
0x136e   :  { %v2476_v21 = vpop.xlane.xlu0 %2475 }
0x136f   :  { %v2478_v0 = vsub.f32 %v2469_v42, %v2476_v21 }
0x1371   :  { %v2481_v22 = vmul.f32 1.442695, %v2478_v0 }
0x1372   :  { %v4328_v23 = vpop.f32.mrf.mxu2 }
0x1373   :  { %3427 = vpow2.f32 %v2481_v22 }
0x1378   :  { %v2542_v24 = vpop.f32.mrf.mxu1 }
0x1379   :  { %v3428_v14 = vpop.eup %3427  ;;  %3272 = vmatmul.msk.f32.vlgmr.msrb.gmra.mxu3 %vm183_vm8, %v2542_v24 }
0x137a   :  { %v2655_v33 = vpop.f32.mrf.mxu2  ;;  %v2486_v25 = vsel %vm183_vm8, %v3428_v14, 0.0 }
0x137b   :  { %v2656_v1 = vadd.f32 %v4255_v34, %v2655_v33  ;;  %2487 = vadd.xlane.f32.xlu0 %v2486_v25  ;;  %v2044_v33 = vld [vmem:[%s4521_s20 + $0x18] sm:$0xff] }
0x137c   :  { %2779 = vmatpush.msra.mxu2 %v2044_v33 }
0x137d   :  { %v2661_v59 = vsel %vm183_vm8, %v2656_v1, -inf }
0x137e   :  { %2662 = vmax.xlane.f32.xlu2 %v2661_v59  ;;  %v2226_v59 = vadd.f32 %v4313_v39, %v4187_v56 }
0x1380   :  { %v2627_v26 = vpop.f32.mrf.mxu1 }
0x1381   :  { %v2628_v27 = vadd.f32 %v4237_v55, %v2627_v26 }
0x1383   :  { %v2658_v28 = vsel %vm183_vm8, %v2628_v27, -inf }
0x1384   :  { %2659 = vmax.xlane.f32.xlu1 %v2658_v28 }
0x138f   :  { %2545 = vrot.lane.b32.xlu0 %v4195_v10, %s4579_s9  ;;  %s3144_s9 = sshll.u32 %s3532_s30, 4  ;;  %s3145_s9 = int_to_ptr.vmem [resolvable:$true] %s3144_s9 }
0x13ee   :  { %v2488_v47 = vpop.xlane.xlu0 %2487 }
0x13ef   :  { %3429 = vrcp.f32 %v2488_v47  ;;  %v2515_v60 = vand.u32 2147483648, %v2488_v47  ;;  %v2513_v55 = vand.u32 2147483647, %v2488_v47  ;;  %vm2509_vm12 = vweird.f32 %v2488_v47 }
0x13f1   :  { %v2663_v29 = vpop.xlane.xlu2 %2662  ;;  %v2516_v58 = vor.u32 1.1754944e-38, %v2515_v60  ;;  %vm2514_vm14 = vcmp.eq.f32.partialorder %v2513_v55, 8.507059e+37  ;;  %v2829_v60 = vld [vmem:[%s4523_s22] sm:$0xff] }
0x13f2   :  { %v2665_v30 = vsub.f32 %v2656_v1, %v2663_v29 }
0x13f4   :  { %v2668_v31 = vmul.f32 1.442695, %v2665_v30  ;;  %v2227_v30 = vadd.f32 %v4315_v54, %v4214_v32  ;;  %v2832_v32 = vld [vmem:[%s4523_s22 + $0x18] sm:$0xff]  ;;  %v2831_v54 = vld [vmem:[%s4523_s22 + $0x10] sm:$0xff] }
0x13f5   :  { %v3430_v35 = vpop.eup %3429 }
0x13f6   :  { %v2505_v34 = vmul.f32 %v3430_v35, %v2488_v47  ;;  %3431 = vpow2.f32 %v2668_v31  ;;  %vm2510_vm10 = vweird.f32 %v3430_v35 }
0x13f7   :  { %v2660_v52 = vpop.xlane.xlu1 %2659  ;;  %vm2511_vm13 = vmor %vm2509_vm12, %vm2510_vm10 }
0x13f8   :  { %v2506_v36 = vsub.f32 1.0, %v2505_v34  ;;  %v2664_v37 = vsub.f32 %v2628_v27, %v2660_v52  ;;  %v2413_v27 = vadd.f32 %v4326_v20, %v2226_v59  ;;  %v2414_v34 = vadd.f32 %v4328_v23, %v2227_v30  ;;  %v2830_v23 = vld [vmem:[%s4523_s22 + $0x8] sm:$0xff]  ;;  %v2945_v30 = vld [vmem:[%s4526_s25 + $0x10] sm:$0xff] }
0x13fa   :  { %v2507_v38 = vmul.f32 %v3430_v35, %v2506_v36  ;;  %v2666_v61 = vmul.f32 1.442695, %v2664_v37 }
0x13fc   :  { %v3432_v3 = vpop.eup %3431  ;;  %v2508_v2 = vadd.f32 %v3430_v35, %v2507_v38  ;;  %3433 = vpow2.f32 %v2666_v61  ;;  %v2594_v26 = vpop.f32.mrf.mxu3 }
0x13fd   :  { %v2673_v40 = vsel %vm183_vm8, %v3432_v3, 0.0  ;;  %v2600_v28 = vadd.f32 %v2594_v26, %v2413_v27  ;;  %v2949_v27 = vld [vmem:[%s4526_s25 + $0x30] sm:$0xff] }
0x13fe   :  { %v2512_v46 = vsel %vm2511_vm13, %v3430_v35, %v2508_v2  ;;  %2674 = vadd.xlane.f32.xlu2 %v2673_v40  ;;  %v2870_v2 = vld [vmem:[%s4524_s23 + $0x30] sm:$0xff]  ;;  %v2868_v40 = vld [vmem:[%s4524_s23 + $0x20] sm:$0xff] }
0x13ff   :  { %v2517_v41 = vsel %vm2514_vm14, %v2516_v58, %v2512_v46  ;;  %v2869_v58 = vld [vmem:[%s4524_s23 + $0x28] sm:$0xff] }
0x1400   :  { %v2518_v44 = vmul.f32 %v3428_v14, %v2517_v41 }
0x1401   :  { %v2546_v9 = vpop.permute.xlu0 %2545 }
0x1402   :  { %v3434_v17 = vpop.eup %3433  ;;  %2566 = vmatpush.msra.mxu0 %v2546_v9 }
0x1403   :  { %3271 = vmatmul.msk.f32.vlgmr.msra.gmra.mxu0 %vm183_vm8, %v2518_v44  ;;  %v2670_v48 = vsel %vm183_vm8, %v3434_v17, 0.0  ;;  %v2867_v44 = vld [vmem:[%s4524_s23 + $0x18] sm:$0xff] }
0x1404   :  { %2671 = vadd.xlane.f32.xlu1 %v2670_v48  ;;  %v2866_v48 = vld [vmem:[%s4524_s23 + $0x10] sm:$0xff] }
0x1416   :  { %2732 = vrot.lane.b32.xlu2 %v4195_v10, %s4581_s6 }
0x141d   :  { %2706 = vrot.lane.b32.xlu1 %v4176_v43, %s4581_s6  ;;  %s3533_s6 = smov 256  }
0x1471   :  { %v2675_v49 = vpop.xlane.xlu2 %2674 }
0x1472   :  { %3435 = vrcp.f32 %v2675_v49  ;;  %v2702_v62 = vand.u32 2147483648, %v2675_v49  ;;  %v2700_v4 = vand.u32 2147483647, %v2675_v49  ;;  %vm2696_vm1 = vweird.f32 %v2675_v49 }
0x1474   :  { %v2703_v45 = vor.u32 1.1754944e-38, %v2702_v62  ;;  %vm2701_vm3 = vcmp.eq.f32.partialorder %v2700_v4, 8.507059e+37 }
0x1477   :  { %v2672_v50 = vpop.xlane.xlu1 %2671 }
0x1478   :  { %v3436_v51 = vpop.eup %3435  ;;  %3437 = vrcp.f32 %v2672_v50  ;;  %v2687_v13 = vand.u32 2147483648, %v2672_v50  ;;  %vm2681_vm5 = vweird.f32 %v2672_v50  ;;  %v2685_v18 = vand.u32 2147483647, %v2672_v50 }
0x1479   :  { %v2692_v53 = vmul.f32 %v3436_v51, %v2675_v49  ;;  %v2733_v5 = vpop.permute.xlu2 %2732  ;;  %vm2697_vm15 = vweird.f32 %v3436_v51 }
0x147a   :  { %2753 = vmatpush.msra.mxu1 %v2733_v5  ;;  %vm2698_vm2 = vmor %vm2696_vm1, %vm2697_vm15  ;;  %v2688_v0 = vor.u32 1.1754944e-38, %v2687_v13  ;;  %vm2686_vm7 = vcmp.eq.f32.partialorder %v2685_v18, 8.507059e+37 }
0x147b   :  { %v2693_v57 = vsub.f32 1.0, %v2692_v53 }
0x147c   :  { %2969 = vmatpush.msrb.mxu1 %v2949_v27 }
0x147d   :  { %v2694_v63 = vmul.f32 %v3436_v51, %v2693_v57 }
0x147e   :  { %v3438_v6 = vpop.eup %3437 }
0x147f   :  { %v2695_v7 = vadd.f32 %v3436_v51, %v2694_v63  ;;  %v2677_v10 = vmul.f32 %v3438_v6, %v2672_v50  ;;  %vm2682_vm4 = vweird.f32 %v3438_v6  ;;  %v3319_v63 = vld [vmem:[%s4522_s21] ss:$0 sm:$0xff]  ;;  %s3146_s21 = sshll.u32 %s4527_s26, 4  ;;  %s3536_s26 = smov [#allocation4]   ;;  %s3147_s21 = int_to_ptr.hbm [resolvable:$true] %s3146_s21 }
0x1480   :  { %v2568_v43 = vpop.f32.mrf.mxu0  ;;  %vm2683_vm6 = vmor %vm2681_vm5, %vm2682_vm4  ;;  %s3158_s20 = sshll.u32 %s3536_s26, 4  ;;  %s3159_s20 = int_to_ptr.vmem [resolvable:$true] %s3158_s20 }
0x1481   :  { %v2699_v8 = vsel %vm2698_vm2, %v3436_v51, %v2695_v7  ;;  %v2678_v15 = vsub.f32 1.0, %v2677_v10  ;;  %3273 = vmatmul.msk.f32.gmra.mxu3 %vm183_vm8, %v2568_v43 }
0x1482   :  { %v2704_v11 = vsel %vm2701_vm3, %v2703_v45, %v2699_v8 }
0x1483   :  { %v2679_v42 = vmul.f32 %v3438_v6, %v2678_v15  ;;  %v2705_v19 = vmul.f32 %v3432_v3, %v2704_v11  ;;  %v2871_v3 = vld [vmem:[%s4524_s23 + $0x38] sm:$0xff] }
0x1484   :  { %2886 = vmatpush.msra.mxu3 %v2871_v3 }
0x1485   :  { %v2680_v12 = vadd.f32 %v3438_v6, %v2679_v42  ;;  %3279 = vmatmul.msk.f32.vlgmr.msra.gmra.mxu1 %vm183_vm8, %v2705_v19  ;;  %v2865_v19 = vld [vmem:[%s4524_s23 + $0x8] sm:$0xff] }
0x1486   :  { %2887 = vmatpush.msra.mxu3 %v2870_v2 }
0x1487   :  { %v2684_v21 = vsel %vm2683_vm6, %v3438_v6, %v2680_v12  ;;  %v2864_v12 = vld [vmem:[%s4524_s23] sm:$0xff]  ;;  %s3534_s23 = smov 16  }
0x1488   :  { %v2689_v22 = vsel %vm2686_vm7, %v2688_v0, %v2684_v21  ;;  %2888 = vmatpush.msra.mxu3 %v2869_v58 }
0x1489   :  { %v2690_v14 = vmul.f32 %v3434_v17, %v2689_v22 }
0x148a   :  { %2889 = vmatpush.msra.mxu3 %v2868_v40  ;;  %v3320_v40 = vld [vmem:[%s4525_s24] ss:$0 sm:$0xff] }
0x148c   :  { %2890 = vmatpush.msra.mxu3 %v2867_v44 }
0x148e   :  { %2891 = vmatpush.msra.mxu3 %v2866_v48 }
0x148f   :  { %v2707_v24 = vpop.permute.xlu1 %2706 }
0x1490   :  { %2727 = vmatpush.msrb.mxu0 %v2707_v24  ;;  %2892 = vmatpush.msra.mxu3 %v2865_v19 }
0x1491   :  { %3278 = vmatmul.msk.f32.vlgmr.msrb.gmra.mxu0 %vm183_vm8, %v2690_v14 }
0x1492   :  { %2851 = vmatpush.msra.mxu0 %v2832_v32  ;;  %2893 = vmatpush.msra.mxu3 %v2864_v12 }
0x1494   :  { %2852 = vmatpush.msra.mxu0 %v2831_v54 }
0x1496   :  { %2853 = vmatpush.msra.mxu0 %v2830_v23 }
0x1498   :  { %2854 = vmatpush.msra.mxu0 %v2829_v60 }
0x1502   :  { %v2755_v1 = vpop.f32.mrf.mxu1 }
0x1504   :  { %v2597_v35 = vpop.f32.mrf.mxu3 }
0x1505   :  { %v2601_v56 = vadd.f32 %v2597_v35, %v2414_v34  ;;  %v2943_v35 = vld [vmem:[%s4526_s25] sm:$0xff]  ;;  %v2944_v34 = vld [vmem:[%s4526_s25 + $0x8] sm:$0xff] }
0x150e   :  { %v2729_v25 = vpop.f32.mrf.mxu0 }
0x150f   :  { %3280 = vmatmul.msk.f32.vlgmr.msra.gmra.mxu2 %vm183_vm8, %v2729_v25 }
0x1517   :  { %3281 = vmatmul.msk.f32.gmra.mxu2 %vm183_vm8, %v2755_v1 }
0x1592   :  { %v2781_v47 = vpop.f32.mrf.mxu2 }
0x1593   :  { %v4356_v29 = vadd.f32 %v2781_v47, %v2600_v28  ;;  %v2950_v28 = vld [vmem:[%s4526_s25 + $0x38] sm:$0xff]  ;;  %v2947_v47 = vld [vmem:[%s4526_s25 + $0x20] sm:$0xff] }
0x1594   :  { %2992 = vmatpush.msrb.mxu2 %v2950_v28  ;;  %2970 = vmatpush.msrb.mxu1 %v2947_v47 }
0x1595   :  { %v2790_v31 = vmul.f32 %v4356_v29, %v4356_v29 }
0x1596   :  { %2971 = vmatpush.msrb.mxu1 %v2945_v30 }
0x1597   :  { %v2792_v52 = vsel %vm94_vm0, %v2790_v31, 0.0  ;;  %v2946_v31 = vld [vmem:[%s4526_s25 + $0x18] sm:$0xff] }
0x1598   :  { %2793 = vadd.xlane.f32.xlu0 %v2792_v52  ;;  %2972 = vmatpush.msrb.mxu1 %v2943_v35 }
0x159a   :  { %v2784_v39 = vpop.f32.mrf.mxu2 }
0x159b   :  { %v4364_v36 = vadd.f32 %v2784_v39, %v2601_v56 }
0x159d   :  { %v2791_v20 = vmul.f32 %v4364_v36, %v4364_v36 }
0x159f   :  { %v2795_v37 = vsel %vm94_vm0, %v2791_v20, 0.0  ;;  %v3531_v20 = vmov 0  }
0x15a0   :  { %2796 = vadd.xlane.f32.xlu1 %v2795_v37  ;;  %3310 = vset.pattern.permute.xlu2 %v3531_v20 }
0x15a1   :  { %3311 = vset.pattern.permute.xlu0 %v3531_v20 }
0x160b   :  { %v2794_v38 = vpop.xlane.xlu0 %2793 }
0x160c   :  { %v2798_v55 = vmul.f32 %v2794_v38, %v3705_v16 }
0x160e   :  { %v2800_v61 = vadd.f32 1e-06, %v2798_v55 }
0x1610   :  { %3439 = vrsqrt.f32 %v2800_v61  ;;  %vm2808_vm9 = vweird.f32 %v2800_v61 }
0x1613   :  { %v2797_v46 = vpop.xlane.xlu1 %2796 }
0x1614   :  { %v2799_v41 = vmul.f32 %v2797_v46, %v3705_v16 }
0x1616   :  { %v3440_v9 = vpop.eup %3439  ;;  %v2801_v17 = vadd.f32 1e-06, %v2799_v41 }
0x1617   :  { %v2803_v49 = vmul.f32 %v3440_v9, %v2800_v61  ;;  %vm2809_vm8 = vweird.f32 %v3440_v9 }
0x1618   :  { %3441 = vrsqrt.f32 %v2801_v17  ;;  %vm2810_vm10 = vmor %vm2808_vm9, %vm2809_vm8  ;;  %vm2818_vm13 = vweird.f32 %v2801_v17 }
0x1619   :  { %v2804_v50 = vmul.f32 %v3440_v9, %v2803_v49 }
0x161b   :  { %v2805_v51 = vmul.f32 0.5, %v2804_v50 }
0x161d   :  { %v2806_v53 = vsub.f32 1.5, %v2805_v51 }
0x161e   :  { %v3442_v5 = vpop.eup %3441 }
0x161f   :  { %v2807_v57 = vmul.f32 %v3440_v9, %v2806_v53  ;;  %v2813_v62 = vmul.f32 %v3442_v5, %v2801_v17  ;;  %vm2819_vm12 = vweird.f32 %v3442_v5 }
0x1620   :  { %vm2820_vm14 = vmor %vm2818_vm13, %vm2819_vm12 }
0x1621   :  { %v2811_v4 = vsel %vm2810_vm10, %v3440_v9, %v2807_v57  ;;  %v2814_v6 = vmul.f32 %v3442_v5, %v2813_v62  ;;  %vm3072_vm10 = vcmask 7168  }
0x1622   :  { %v2822_v7 = vmul.f32 %v2811_v4, %v4356_v29 }
0x1623   :  { %v2815_v10 = vmul.f32 0.5, %v2814_v6  ;;  %v4462_v6 = vld [vmem:[%s4586_s10 + $0x8] sm:$0xff] }
0x1624   :  { %v2827_v45 = vmul.f32 %v3319_v63, %v2822_v7  ;;  %vm3063_vm9 = vcmp.ne.s32.totalorder %v4462_v6, 4294967196 }
0x1625   :  { %v2816_v43 = vsub.f32 1.5, %v2815_v10 }
0x1626   :  { %3282 = vmatmul.msk.f32.vlgmr.msra.gmra.mxu0 %vm94_vm0, %v2827_v45 }
0x1627   :  { %v2817_v8 = vmul.f32 %v3442_v5, %v2816_v43 }
0x1629   :  { %v2821_v15 = vsel %vm2820_vm14, %v3442_v5, %v2817_v8 }
0x162a   :  { %v2823_v11 = vmul.f32 %v2821_v15, %v4364_v36 }
0x162c   :  { %v2828_v42 = vmul.f32 %v3319_v63, %v2823_v11 }
0x162e   :  { %3283 = vmatmul.msk.f32.gmra.mxu0 %vm94_vm0, %v2828_v42 }
0x16a3   :  { %v2856_v13 = vpop.f32.mrf.mxu0 }
0x16a4   :  { %v2862_v18 = vmax.f32 %v2856_v13, 0.0 }
0x16a6   :  { %3284 = vmatmul.msk.f32.vlgmr.msra.gmra.mxu3 %vm1024_vm11, %v2862_v18 }
0x16ab   :  { %v2859_v21 = vpop.f32.mrf.mxu0 }
0x16ac   :  { %v2863_v0 = vmax.f32 %v2859_v21, 0.0  ;;  %v3039_v21 = vlaneseq }
0x16ae   :  { %3285 = vmatmul.msk.f32.gmra.mxu3 %vm1024_vm11, %v2863_v0 }
0x1729   :  { %v2895_v22 = vpop.f32.mrf.mxu3 }
0x172a   :  { %v2901_v24 = vadd.f32 %v2895_v22, %v4356_v29  ;;  %v2948_v29 = vld [vmem:[%s4526_s25 + $0x28] sm:$0xff]  ;;  %v3040_v22 = vand.u32 127, %v3039_v21 }
0x172b   :  { %2993 = vmatpush.msrb.mxu2 %v2948_v29 }
0x172c   :  { %v2904_v14 = vmul.f32 %v2901_v24, %v2901_v24 }
0x172d   :  { %2994 = vmatpush.msrb.mxu2 %v2946_v31  ;;  %v3535_v31 = vmov 0.0  }
0x172e   :  { %v2906_v33 = vsel %vm94_vm0, %v2904_v14, 0.0 }
0x172f   :  { %2907 = vadd.xlane.f32.xlu2 %v2906_v33  ;;  %2995 = vmatpush.msrb.mxu2 %v2944_v34  ;;  %v3291_v34 = vsel %vm3063_vm9, 1.0, %v3535_v31 }
0x1731   :  { %v2898_v25 = vpop.f32.mrf.mxu3 }
0x1732   :  { %v2902_v1 = vadd.f32 %v2898_v25, %v4364_v36  ;;  %v4448_v36 = vld [vmem:[%s4586_s10] sm:$0xff] }
0x1733   :  { %vm3062_vm8 = vcmp.ne.s32.totalorder %v4448_v36, 4294967196 }
0x1734   :  { %v2905_v59 = vmul.f32 %v2902_v1, %v2902_v1  ;;  %v3290_v35 = vsel %vm3062_vm8, 1.0, %v3535_v31 }
0x1736   :  { %v2909_v26 = vsel %vm94_vm0, %v2905_v59, 0.0 }
0x1737   :  { %2910 = vadd.xlane.f32.xlu0 %v2909_v26 }
0x1747   :  { %3043 = vperm.xlu2 %3310, %v4448_v36  }
0x17a2   :  { %v2908_v52 = vpop.xlane.xlu2 %2907 }
0x17a3   :  { %v2912_v56 = vmul.f32 %v2908_v52, %v3705_v16  ;;  %v3073_v52 = vsel %vm3072_vm10, %v3290_v35, 0.0 }
0x17a5   :  { %v2914_v39 = vadd.f32 1e-06, %v2912_v56  ;;  %v3080_v56 = vsel %vm3072_vm10, %v3291_v34, 0.0 }
0x17a6   :  { %v3081_v20 = vrot.slane %v3080_v56, 4 }
0x17a7   :  { %3443 = vrsqrt.f32 %v2914_v39  ;;  %vm2922_vm15 = vweird.f32 %v2914_v39 }
0x17aa   :  { %v2911_v37 = vpop.xlane.xlu0 %2910  ;;  %v3044_v27 = vpop.permute.xlu2 %3043 }
0x17ab   :  { %v2913_v32 = vmul.f32 %v2911_v37, %v3705_v16  ;;  %vm3048_vm7 = vcmp.eq.s32.totalorder %v3040_v22, %v3044_v27 }
0x17ad   :  { %v3444_v54 = vpop.eup %3443  ;;  %v2915_v23 = vadd.f32 1e-06, %v2913_v32  ;;  %v3082_v32 = vadd.f32 %v3081_v20, %v3080_v56 }
0x17ae   :  { %v2917_v60 = vmul.f32 %v3444_v54, %v2914_v39  ;;  %vm2923_vm11 = vweird.f32 %v3444_v54  ;;  %v3074_v39 = vrot.slane %v3073_v52, 4 }
0x17af   :  { %3445 = vrsqrt.f32 %v2915_v23  ;;  %vm2924_vm1 = vmor %vm2922_vm15, %vm2923_vm11  ;;  %vm2932_vm3 = vweird.f32 %v2915_v23 }
0x17b0   :  { %v2918_v38 = vmul.f32 %v3444_v54, %v2917_v60  ;;  %v3075_v37 = vadd.f32 %v3074_v39, %v3073_v52 }
0x17b2   :  { %v2919_v55 = vmul.f32 0.5, %v2918_v38 }
0x17b4   :  { %v2920_v61 = vsub.f32 1.5, %v2919_v55 }
0x17b5   :  { %v3446_v3 = vpop.eup %3445 }
0x17b6   :  { %v2921_v2 = vmul.f32 %v3444_v54, %v2920_v61  ;;  %v2927_v58 = vmul.f32 %v3446_v3, %v2915_v23  ;;  %vm2933_vm2 = vweird.f32 %v3446_v3  ;;  %v3083_v23 = vrot.slane %v3082_v32, 2 }
0x17b7   :  { %vm2934_vm4 = vmor %vm2932_vm3, %vm2933_vm2 }
0x17b8   :  { %v2925_v46 = vsel %vm2924_vm1, %v3444_v54, %v2921_v2  ;;  %v2928_v41 = vmul.f32 %v3446_v3, %v2927_v58  ;;  %v3076_v54 = vrot.slane %v3075_v37, 2  ;;  %v3084_v38 = vadd.f32 %v3083_v23, %v3082_v32 }
0x17b9   :  { %v2936_v16 = vmul.f32 %v2925_v46, %v2901_v24  ;;  %v3041_v24 = vadd.s32 128, %v3040_v22 }
0x17ba   :  { %v2929_v44 = vmul.f32 0.5, %v2928_v41  ;;  %v3077_v60 = vadd.f32 %v3076_v54, %v3075_v37  ;;  %v3085_v61 = vrot.slane %v3084_v38, 1 }
0x17bb   :  { %v2941_v9 = vmul.f32 %v3320_v40, %v2936_v16  ;;  %vm3049_vm6 = vcmp.eq.s32.totalorder %v3041_v24, %v3044_v27 }
0x17bc   :  { %v2930_v17 = vsub.f32 1.5, %v2929_v44  ;;  %v3078_v55 = vrot.slane %v3077_v60, 1  ;;  %v3086_v2 = vadd.f32 %v3085_v61, %v3084_v38 }
0x17bd   :  { %3286 = vmatmul.msk.f32.vlgmr.msrb.gmra.mxu1 %vm94_vm0, %v2941_v9  ;;  %3288 = vmatmul.msk.f32.vlgmr.msrb.gmra.mxu2 %vm94_vm0, %v2941_v9 }
0x17be   :  { %v2931_v48 = vmul.f32 %v3446_v3, %v2930_v17  ;;  %v3102_v46 = vmax.f32 %v3086_v2, 1.0 }
0x17c0   :  { %v2935_v49 = vsel %vm2934_vm4, %v3446_v3, %v2931_v48  ;;  %v3079_v3 = vadd.f32 %v3078_v55, %v3077_v60  ;;  %vm3123_vm14 = vweird.f32 %v3102_v46  ;;  %vm3135_vm4 = vcmask 1041409  }
0x17c1   :  { %v2937_v50 = vmul.f32 %v2935_v49, %v2902_v1 }
0x17c2   :  { %v3101_v58 = vmax.f32 %v3079_v3, 1.0 }
0x17c3   :  { %v2942_v51 = vmul.f32 %v3320_v40, %v2937_v50 }
0x17c4   :  { %vm3108_vm12 = vweird.f32 %v3101_v58  ;;  %v3114_v21 = vand.u32 2147483648, %v3101_v58 }
0x17c5   :  { %3287 = vmatmul.msk.f32.gmra.mxu1 %vm94_vm0, %v2942_v51  ;;  %3289 = vmatmul.msk.f32.gmra.mxu2 %vm94_vm0, %v2942_v51 }
0x17c6   :  { %v3115_v27 = vor.u32 1.1754944e-38, %v3114_v21 }
0x183a   :  { %v2974_v53 = vpop.f32.mrf.mxu1 }
0x183b   :  { %3003 = vst [vmem:[#allocation2] sm:$0xff] %v2974_v53  ;;  %v3052_v29 = vsel %vm3048_vm7, %v2974_v53, 0.0 }
0x1840   :  { %v2997_v5 = vpop.f32.mrf.mxu2 }
0x1841   :  { %3004 = vst [vmem:[#allocation2 + $0x8] sm:$0xff] %v2997_v5  ;;  %v3009_v57 = vmax.f32 %v2974_v53, %v2997_v5  ;;  %v3053_v47 = vsel %vm3049_vm6, %v2997_v5, 0.0 }
0x1842   :  { %v2977_v62 = vpop.f32.mrf.mxu1  ;;  %v3056_v30 = vadd.f32 %v3053_v47, %v3052_v29 }
0x1843   :  { %3005 = vst [vmem:[#allocation2 + $0x10] sm:$0xff] %v2977_v62  ;;  %3010 = vmax.xlane.f32.xlu0 %v3009_v57 }
0x1848   :  { %v3000_v63 = vpop.f32.mrf.mxu2 }
0x1849   :  { %3006 = vst [vmem:[#allocation2 + $0x18] sm:$0xff] %v3000_v63  ;;  %v3012_v4 = vmax.f32 %v2977_v62, %v3000_v63 }
0x184a   :  { %3152 = dma.vmem_to_hbm [thread:$0]  %s3145_s9, 512, %s3147_s21, [#allocation3], %s3533_s6, %s3533_s6, %s3534_s23  }
0x184b   :  { %3013 = vmax.xlane.f32.xlu1 %v3012_v4 }
0x1857   :  { %3046 = vperm.xlu0 %3311, %v4462_v6   ;;  %v3112_v6 = vand.u32 2147483647, %v3101_v58 }
0x1859   :  { %vm3113_vm2 = vcmp.eq.f32.partialorder %v3112_v6, 8.507059e+37 }
0x18b6   :  { %v4465_v7 = vpop.xlane.xlu0 %3010 }
0x18b7   :  { %v3015_v10 = vsub.f32 %v2974_v53, %v4465_v7  ;;  %v3016_v45 = vsub.f32 %v2997_v5, %v4465_v7 }
0x18b9   :  { %v3019_v43 = vmul.f32 1.442695, %v3015_v10  ;;  %v3021_v8 = vmul.f32 1.442695, %v3016_v45 }
0x18bb   :  { %3447 = vpow2.f32 %v3019_v43 }
0x18bc   :  { %3449 = vpow2.f32 %v3021_v8 }
0x18be   :  { %v4469_v15 = vpop.xlane.xlu1 %3013 }
0x18bf   :  { %v3017_v11 = vsub.f32 %v2977_v62, %v4469_v15  ;;  %v3018_v42 = vsub.f32 %v3000_v63, %v4469_v15 }
0x18c1   :  { %v3448_v19 = vpop.eup %3447  ;;  %v3023_v12 = vmul.f32 1.442695, %v3017_v11  ;;  %v3025_v13 = vmul.f32 1.442695, %v3018_v42 }
0x18c2   :  { %v3450_v18 = vpop.eup %3449 }
0x18c3   :  { %3451 = vpow2.f32 %v3023_v12  ;;  %v3027_v0 = vadd.f32 %v3450_v18, %v3448_v19 }
0x18c4   :  { %3453 = vpow2.f32 %v3025_v13 }
0x18c5   :  { %3028 = vadd.xlane.f32.xlu1 %v3027_v0  ;;  %v3129_v0 = vand.u32 2147483648, %v3102_v46 }
0x18c9   :  { %v3452_v14 = vpop.eup %3451  ;;  %v3047_v33 = vpop.permute.xlu0 %3046 }
0x18ca   :  { %v3454_v25 = vpop.eup %3453  ;;  %vm3050_vm0 = vcmp.eq.s32.totalorder %v3040_v22, %v3047_v33  ;;  %vm3051_vm5 = vcmp.eq.s32.totalorder %v3041_v24, %v3047_v33  ;;  %v3127_v33 = vand.u32 2147483647, %v3102_v46 }
0x18cb   :  { %v3054_v1 = vsel %vm3050_vm0, %v2977_v62, 0.0  ;;  %v3055_v59 = vsel %vm3051_vm5, %v3000_v63, 0.0  ;;  %v3030_v26 = vadd.f32 %v3454_v25, %v3452_v14  ;;  %vm3138_vm0 = vcmask 1024  }
0x18cc   :  { %v3059_v28 = vadd.f32 %v3055_v59, %v3054_v1  ;;  %vm3128_vm3 = vcmp.eq.f32.partialorder %v3127_v33, 8.507059e+37 }
0x18cd   :  { %3031 = vadd.xlane.f32.xlu1 %v3030_v26 }
0x18ce   :  { %3060 = vadd.xlane.f32.xlu2 %v3059_v28  ;;  %v3130_v28 = vor.u32 1.1754944e-38, %v3129_v0 }
0x18d5   :  { %3057 = vadd.xlane.f32.xlu1 %v3056_v30 }
0x1938   :  { %v3029_v40 = vpop.xlane.xlu1 %3028 }
0x1939   :  { %3455 = vlog2.f32 %v3029_v40 }
0x193a   :  { %3457 = vrcp.f32 %v3101_v58 }
0x193b   :  { %3459 = vrcp.f32 %v3102_v46 }
0x193f   :  { %v3456_v41 = vpop.eup %3455 }
0x1940   :  { %v3032_v16 = vpop.xlane.xlu1 %3031  ;;  %v3458_v44 = vpop.eup %3457  ;;  %v3034_v17 = vmul.f32 0.6931472, %v3456_v41 }
0x1941   :  { %3461 = vlog2.f32 %v3032_v16  ;;  %v3460_v9 = vpop.eup %3459  ;;  %v3104_v48 = vmul.f32 %v3458_v44, %v3101_v58  ;;  %v3061_v10 = vpop.xlane.xlu2 %3060  ;;  %vm3109_vm13 = vweird.f32 %v3458_v44 }
0x1942   :  { %v3119_v49 = vmul.f32 %v3460_v9, %v3102_v46  ;;  %v3037_v51 = vadd.f32 %v3034_v17, %v4465_v7  ;;  %vm3124_vm11 = vweird.f32 %v3460_v9  ;;  %vm4492_vm15 = vmor %vm3108_vm12, %vm3109_vm13 }
0x1943   :  { %v3105_v62 = vsub.f32 1.0, %v3104_v48  ;;  %vm3125_vm1 = vmor %vm3123_vm14, %vm3124_vm11 }
0x1944   :  { %v3120_v4 = vsub.f32 1.0, %v3119_v49 }
0x1945   :  { %v3106_v42 = vmul.f32 %v3458_v44, %v3105_v62 }
0x1946   :  { %v3121_v7 = vmul.f32 %v3460_v9, %v3120_v4 }
0x1947   :  { %v3462_v50 = vpop.eup %3461  ;;  %v3107_v36 = vadd.f32 %v3458_v44, %v3106_v42 }
0x1948   :  { %v3036_v53 = vmul.f32 0.6931472, %v3462_v50  ;;  %v3058_v5 = vpop.xlane.xlu1 %3057  ;;  %v3122_v14 = vadd.f32 %v3460_v9, %v3121_v7 }
0x1949   :  { %v3064_v57 = vsub.f32 %v3037_v51, %v3058_v5  ;;  %v3111_v26 = vsel %vm4492_vm15, %v3458_v44, %v3107_v36 }
0x194a   :  { %v3038_v63 = vadd.f32 %v3036_v53, %v4469_v15  ;;  %v3126_v29 = vsel %vm3125_vm1, %v3460_v9, %v3122_v14  ;;  %v3116_v35 = vsel %vm3113_vm2, %v3115_v27, %v3111_v26 }
0x194b   :  { %v3066_v45 = vsel %vm3062_vm8, %v3064_v57, 0.0  ;;  %v3131_v34 = vsel %vm3128_vm3, %v3130_v28, %v3126_v29 }
0x194c   :  { %v3065_v43 = vsub.f32 %v3038_v63, %v3061_v10  ;;  %v3087_v8 = vsel %vm3072_vm10, %v3066_v45, 0.0 }
0x194d   :  { %v3088_v11 = vrot.slane %v3087_v8, 4 }
0x194e   :  { %v3067_v19 = vsel %vm3063_vm9, %v3065_v43, 0.0 }
0x194f   :  { %v3094_v12 = vsel %vm3072_vm10, %v3067_v19, 0.0  ;;  %v3089_v13 = vadd.f32 %v3088_v11, %v3087_v8 }
0x1950   :  { %v3095_v15 = vrot.slane %v3094_v12, 4 }
0x1951   :  { %v3090_v18 = vrot.slane %v3089_v13, 2 }
0x1952   :  { %v3096_v22 = vadd.f32 %v3095_v15, %v3094_v12 }
0x1953   :  { %v3091_v25 = vadd.f32 %v3090_v18, %v3089_v13 }
0x1954   :  { %v3097_v1 = vrot.slane %v3096_v22, 2 }
0x1955   :  { %v3092_v59 = vrot.slane %v3091_v25, 1 }
0x1956   :  { %v3098_v47 = vadd.f32 %v3097_v1, %v3096_v22 }
0x1957   :  { %v3093_v31 = vadd.f32 %v3092_v59, %v3091_v25 }
0x1958   :  { %v3099_v30 = vrot.slane %v3098_v47, 1 }
0x1959   :  { %v3117_v56 = vmul.f32 %v3116_v35, %v3093_v31 }
0x195a   :  { %v3100_v52 = vadd.f32 %v3099_v30, %v3098_v47 }
0x195c   :  { %v3132_v39 = vmul.f32 %v3131_v34, %v3100_v52 }
0x195e   :  { %v3136_v20 = vsel %vm3135_vm4, %v3132_v39, %v3117_v56 }
0x195f   :  { %3139 = vst.msk [vmem:[#allocation4] sm:$0x3] %vm3138_vm0, %v3136_v20 }
0x1960   :  { %3163 = dma.vmem_to_hbm [thread:$0]  %s3159_s20, 32, %s3161_s12, [#allocation5]  }
0x1961   :  { %3515 = dma.done.wait [#allocation3], 512  }
0x1962   :  { %3516 = vsyncadd [#allocation3], 4294966784 }
0x1963   :  { %3517 = dma.done.wait [#allocation5], 32  }
0x1964   :  { %3518 = vsyncadd [#allocation5], 4294967264 }
0x1965   :  { %3172 = vsyncpa [#allocation3], 1 }
0x1966   :  { %3173 = vsyncpa [#allocation5], 1 }

</bundles_post_ra>
